<compile_context>
chip_gen: v5e
topology: v5e:2x2
jax: 0.10.0
libtpu: 0.0.40
codegen_flags: <defaults>
</compile_context>

<pallas_src>
import functools

import numpy as np
import jax
import jax.numpy as jnp
from jax import lax
from jax.experimental import pallas as pl
from jax.experimental.pallas import tpu as pltpu


def _pool_out(L_in, K, pool_k, pool_s):
    return (L_in - K + 1 - pool_k) // pool_s + 1


# ----------------------------------------------------------------------------
# Fused STN kernel (one grid step == one recurrence of the STN)
# ----------------------------------------------------------------------------
def cfdtan_stn_kernel(
        x_ncw_ref, x_cl_ref,
        c1w_ref, c1b_ref, g1_ref, be1_ref,
        c2w_ref, c2b_ref, g2_ref, be2_ref,
        c3w_ref, c3b_ref, g3_ref, be3_ref,
        w1r_ref, b1_ref, w2_ref, b2_ref, w3_ref, b3_ref, w4_ref, b4_ref,
        basa_ref, basb_ref,
        out_ref,
        st_cl, st_ncw, ybuf1, h2buf, ybuf2, h3buf, ybuf3, h3p,
        *, B, C, L, nC, nsteps):
    f32 = jnp.float32
    r = pl.program_id(0)

    # ---- recurrence state lives in VMEM; initialise it once from HBM inputs
    @pl.when(r == 0)
    def _():
        st_cl[...] = x_cl_ref[...]
        st_ncw[...] = x_ncw_ref[...]

    x_cl_cur = st_cl[...]                       # (B*L, C) channels-last signal

    # --- Conv1d(valid) + BatchNorm1d(batch stats) + MaxPool1d + ReLU ---------
    # Batch is folded into the row dimension of a flat (B*L_in, Cin) slab.
    def conv_bn_pool(x_full, L_in, K, w_ref, b_ref, g_ref, be_ref,
                     pool_k, pool_s, ybuf, store, im2col):
        n = B * L_in
        L_conv = L_in - K + 1                   # per-sequence conv length
        R = n - K + 1                           # folded-batch conv rows
        Lp = (L_conv - pool_k) // pool_s + 1

        if im2col:
            # Fold the K taps into the contraction dim (lane-aligned concat:
            # each piece is Cin=128 lanes wide) -> a single deep matmul.
            xcat = jnp.concatenate([x_full[k:k + R, :] for k in range(K)],
                                   axis=1)                      # (R, K*Cin)
            y = jnp.dot(xcat, w_ref[...], preferred_element_type=f32)
        else:
            # Tiny Cin: K shifted matmuls (unaligned im2col concat not worth it)
            y = jnp.dot(x_full[0:R, :], w_ref[0], preferred_element_type=f32)
            for k in range(1, K):
                y = y + jnp.dot(x_full[k:k + R, :], w_ref[k],
                                preferred_element_type=f32)
        y = y + b_ref[...]

        # BatchNorm (training-mode batch stats).  Rows whose conv window
        # straddles a batch boundary are junk; O(1) periodic-position mask.
        ridx = lax.broadcasted_iota(jnp.int32, (R, 1), 0).astype(f32)
        bidx = jnp.floor((ridx + 0.5) * (1.0 / L_in))
        pos = ridx - bidx * L_in
        mask = jnp.where(pos < L_conv, 1.0, 0.0)
        inv_cnt = 1.0 / float(B * L_conv)
        mean = jnp.sum(y * mask, axis=0, keepdims=True) * inv_cnt
        d = (y - mean) * mask
        var = jnp.sum(d * d, axis=0, keepdims=True) * inv_cnt   # two-pass var
        y = (y - mean) * lax.rsqrt(var + 1e-5) * g_ref[...] + be_ref[...]

        # MaxPool1d(pool_k, pool_s) + ReLU: shift-max the whole slab once,
        # then one strided read per batch.
        nm = R - pool_k + 1
        ym = y[0:nm, :]
        for j in range(1, pool_k):
            ym = jnp.maximum(ym, y[j:nm + j, :])
        ym = jnp.maximum(ym, 0.0)
        ybuf[0:nm, :] = ym
        for bi in range(B):
            store(bi, Lp, ybuf[pl.ds(bi * L_in, Lp, pool_s), :])
        return Lp

    def store_h2(bi, Lp, v): h2buf[bi * Lp:(bi + 1) * Lp, :] = v
    def store_h3(bi, Lp, v): h3buf[bi * Lp:(bi + 1) * Lp, :] = v
    def store_h3p(bi, Lp, v): h3p[:, bi, :] = v        # (Lp3, B, C3) for FC1

    Lp1 = conv_bn_pool(x_cl_cur, L, 3, c1w_ref, c1b_ref, g1_ref, be1_ref,
                       3, 2, ybuf1, store_h2, im2col=False)
    Lp2 = conv_bn_pool(h2buf[...], Lp1, 5, c2w_ref, c2b_ref, g2_ref, be2_ref,
                       3, 3, ybuf2, store_h3, im2col=True)
    Lp3 = conv_bn_pool(h3buf[...], Lp2, 3, c3w_ref, c3b_ref, g3_ref, be3_ref,
                       3, 2, ybuf3, store_h3p, im2col=False)

    # --- FC stack (PyTorch channel-major flatten folded into w1r host-side) --
    h = jnp.dot(h3p[0], w1r_ref[0], preferred_element_type=f32)
    for l in range(1, Lp3):
        h = h + jnp.dot(h3p[l], w1r_ref[l], preferred_element_type=f32)
    h = jnp.maximum(h + b1_ref[...], 0.0)
    h = jnp.maximum(jnp.dot(h, w2_ref[...], preferred_element_type=f32)
                    + b2_ref[...], 0.0)
    h = jnp.maximum(jnp.dot(h, w3_ref[...], preferred_element_type=f32)
                    + b3_ref[...], 0.0)
    theta = jnp.tanh(jnp.dot(h, w4_ref[...], preferred_element_type=f32)
                     + b4_ref[...])                               # (B, dim)

    # --- CPAB: piecewise-affine velocity field, closed-form per-cell steps ---
    # TODO(synk): libcpab composes the map via scaling-and-squaring; here we
    # take 2**num_scaling closed-form steps (exact while a step stays in-cell).
    a_cf = jnp.dot(theta, basa_ref[...], preferred_element_type=f32)  # (B, nC)
    b_cf = jnp.dot(theta, basb_ref[...], preferred_element_type=f32)  # (B, nC)
    col = lax.broadcasted_iota(jnp.int32, (B, L), 1).astype(f32)
    phi = col * (1.0 / (L - 1))
    dt = 1.0 / nsteps
    for _ in range(nsteps):
        cell = jnp.clip(jnp.floor(phi * nC), 0.0, nC - 1.0)
        a_s = jnp.zeros_like(phi)
        b_s = jnp.zeros_like(phi)
        for c in range(nC):                       # nC=6 selects; tiny at nsteps=1
            m = cell == float(c)
            a_s = jnp.where(m, a_cf[:, c:c + 1], a_s)
            b_s = jnp.where(m, b_cf[:, c:c + 1], b_s)
        at = a_s * dt
        e = jnp.exp(at)                           # EUP
        small = jnp.abs(at) < 1e-6
        frac = jnp.where(small, dt, (e - 1.0) / jnp.where(small, 1.0, a_s))
        phi = phi * e + b_s * frac
    phi = jnp.clip(phi, 0.0, 1.0)

    # --- Linear-interp warp; weight build batched, per-b loop = dots only ----
    src = phi * (L - 1.0)                                         # (B, L)
    l_mid = lax.broadcasted_iota(jnp.int32, (B, L, L), 1).astype(f32)
    Wm = jnp.maximum(0.0, 1.0 - jnp.abs(src[:, None, :] - l_mid))   # [b, l, j]
    l_last = lax.broadcasted_iota(jnp.int32, (B, L, L), 2).astype(f32)
    WmT = jnp.maximum(0.0, 1.0 - jnp.abs(src[:, :, None] - l_last))  # [b, j, l]

    for bi in range(B):
        w_b = Wm[bi]                                              # (L, L)
        wt_b = WmT[bi]                                            # (L, L)
        new_ncw_b = jnp.dot(st_ncw[bi], w_b,
                            preferred_element_type=f32)           # (C, L)
        new_cl_b = jnp.dot(wt_b, x_cl_cur[bi * L:(bi + 1) * L, :],
                           preferred_element_type=f32)            # (L, C)
        st_ncw[bi] = new_ncw_b
        st_cl[bi * L:(bi + 1) * L, :] = new_cl_b
        out_ref[bi] = new_ncw_b.astype(out_ref.dtype)


# ----------------------------------------------------------------------------
# Wrapper
# ----------------------------------------------------------------------------
def _fs(shape):
    nd = len(shape)
    return pl.BlockSpec(shape, lambda *_: (0,) * nd)


def _padded_bytes(shape, itemsize=4):
    s = [int(d) for d in shape]
    s[-1] = -(-s[-1] // 128) * 128
    if len(s) >= 2:
        s[-2] = -(-s[-2] // 8) * 8
    n = 1
    for d in s:
        n *= d
    return n * itemsize


def cfdtan_forward(x_ncw, p, basis_a_t, basis_b_t, nC,
                   n_recurrence=1, num_scaling=0):
    B, C, L = (int(d) for d in x_ncw.shape)
    # channels-last flat slab for the conv path (tiny XLA transpose at the edge)
    x_cl = jnp.transpose(x_ncw, (0, 2, 1)).reshape(B * L, C)

    C1 = int(p["c1_w"].shape[2])
    C2 = int(p["c2_w"].shape[2])
    C3 = int(p["c3_w"].shape[2])
    Lp1 = _pool_out(L, 3, 3, 2)
    Lp2 = _pool_out(Lp1, 5, 3, 3)
    Lp3 = _pool_out(Lp2, 3, 3, 2)

    # conv2 weight in im2col layout (K*Cin, Cout); conv1/conv3 stay (K,Cin,Cout)
    c2w = p["c2_w"].reshape(5 * C1, C2)
    # Fold PyTorch's channel-major flatten (row index = c*Lp3 + l) into FC1.
    nfc1 = int(p["f1_w"].shape[1])
    w1r = p["f1_w"].reshape(C3, Lp3, nfc1).transpose(1, 0, 2)     # (Lp3, C3, 48)

    args = (x_ncw, x_cl,
            p["c1_w"], p["c1_b"], p["bn1_g"], p["bn1_b"],
            c2w, p["c2_b"], p["bn2_g"], p["bn2_b"],
            p["c3_w"], p["c3_b"], p["bn3_g"], p["bn3_b"],
            w1r, p["f1_b"], p["f2_w"], p["f2_b"],
            p["f3_w"], p["f3_b"], p["f4_w"], p["f4_b"],
            basis_a_t, basis_b_t)

    scratch_py = [
        (B * L, C),        # st_cl  : channels-last carried signal
        (B, C, L),         # st_ncw : NCW carried signal
        (B * L, C1),       # ybuf1  : conv1+BN pooled staging
        (B * Lp1, C1),     # h2buf  : pooled1 (conv2 input)
        (B * Lp1, C2),     # ybuf2  : conv2+BN pooled staging
        (B * Lp2, C2),     # h3buf  : pooled2 (conv3 input)
        (B * Lp2, C3),     # ybuf3  : conv3+BN pooled staging
        (Lp3, B, C3),      # h3p    : pooled3 (FC input)
    ]
    scratch = [pltpu.VMEM(s, jnp.float32) for s in scratch_py]

    vmem_bytes = (2 * sum(_padded_bytes(a.shape) for a in args)
                  + sum(_padded_bytes(s) for s in scratch_py)
                  + 2 * _padded_bytes((B, C, L))
                  + (8 << 20))
    vmem_limit = int(min(64 << 20, vmem_bytes))

    kernel = functools.partial(cfdtan_stn_kernel, B=B, C=C, L=L, nC=nC,
                               nsteps=2 ** num_scaling)
    out = pl.pallas_call(
        kernel,
        out_shape=jax.ShapeDtypeStruct((B, C, L), jnp.float32),
        grid=(max(1, int(n_recurrence)),),
        in_specs=[_fs(tuple(int(d) for d in a.shape)) for a in args],
        out_specs=_fs((B, C, L)),
        scratch_shapes=scratch,
        compiler_params=pltpu.CompilerParams(
            dimension_semantics=("arbitrary",),
            vmem_limit_bytes=vmem_limit),
    )(*args)
    return out


# ----------------------------------------------------------------------------
# CPAB QR null-space basis (host-side numpy)
# ----------------------------------------------------------------------------
def cpab_qr_basis(nC):
    """Null-space basis of continuity + zero-boundary constraints on a
    piecewise-affine 1D velocity field with nC cells."""
    rows = []
    for i in range(1, nC):                       # continuity at interior knots
        xk = i / nC
        r = np.zeros(2 * nC)
        r[2 * (i - 1)] = xk
        r[2 * (i - 1) + 1] = 1.0
        r[2 * i] = -xk
        r[2 * i + 1] = -1.0
        rows.append(r)
    r = np.zeros(2 * nC); r[1] = 1.0; rows.append(r)                   # v(0)=0
    r = np.zeros(2 * nC); r[2 * (nC - 1)] = 1.0; r[2 * (nC - 1) + 1] = 1.0
    rows.append(r)                                                     # v(1)=0
    Lmat = np.stack(rows)
    q, _ = np.linalg.qr(Lmat.T, mode="complete")
    return np.asarray(q[:, Lmat.shape[0]:], np.float32)   # (2nC, nC-1)


# ----------------------------------------------------------------------------
# Deterministic parameter init (synthetic; mirrors module __init__ shapes)
# ----------------------------------------------------------------------------
def init_params(channels, fc_dim, dim, key):
    ks = jax.random.split(key, 12)

    def u(k, shape, fan_in):
        bound = 1.0 / np.sqrt(fan_in)
        return jax.random.uniform(k, shape, jnp.float32, -bound, bound)

    return {
        # conv weights stored (K, Cin, Cout) for the channels-last conv path
        "c1_w": u(ks[0], (3, channels, 128), channels * 3),
        "c1_b": u(ks[1], (1, 128), channels * 3),
        "bn1_g": jnp.ones((1, 128), jnp.float32),
        "bn1_b": jnp.zeros((1, 128), jnp.float32),
        "c2_w": u(ks[2], (5, 128, 64), 128 * 5),
        "c2_b": u(ks[3], (1, 64), 128 * 5),
        "bn2_g": jnp.ones((1, 64), jnp.float32),
        "bn2_b": jnp.zeros((1, 64), jnp.float32),
        "c3_w": u(ks[4], (3, 64, 64), 64 * 3),
        "c3_b": u(ks[5], (1, 64), 64 * 3),
        "bn3_g": jnp.ones((1, 64), jnp.float32),
        "bn3_b": jnp.zeros((1, 64), jnp.float32),
        # FC weights stored (Din, Dout); f1_w rows are channel-major (c*Lp+l)
        "f1_w": u(ks[6], (fc_dim, 48), fc_dim),
        "f1_b": u(ks[7], (1, 48), fc_dim),
        "f2_w": u(ks[8], (48, 32), 48),
        "f2_b": u(ks[9], (1, 32), 48),
        "f3_w": u(ks[10], (32, 16), 32),
        "f3_b": u(ks[11], (1, 16), 32),
        # net_part3: Linear(16, dim) zero weights, bias = T.identity(eps=1e-3)
        "f4_w": jnp.zeros((16, 5), jnp.float32)[:, :dim] if dim <= 5 else
                jnp.zeros((16, dim), jnp.float32),
        "f4_b": 1e-3 * jax.random.normal(jax.random.PRNGKey(1), (1, dim),
                                         jnp.float32),
    }


def conv_to_fc_dim(signal_len):
    L = signal_len - 2                       # Conv1d k=3
    L = (L - 3) // 2 + 1                     # MaxPool 3, s=2
    L = L - 4                                # Conv1d k=5
    L = (L - 3) // 3 + 1                     # MaxPool 3, s=3
    L = L - 2                                # Conv1d k=3
    L = (L - 3) // 2 + 1                     # MaxPool 3, s=2
    return 64 * L                            # back_version=True: C_out * L_out


# ----------------------------------------------------------------------------
if __name__ == "__main__":
    batch, channels, signal_len = 2, 2, 64
    tess_size, n_recur, num_scaling = 6, 2, 0
    nC = tess_size                           # zero_boundary=True
    dim = tess_size - 1                      # 5

    fc_dim = conv_to_fc_dim(signal_len)      # 128 for signal_len=64
    basis = cpab_qr_basis(nC)                # (2nC, dim)
    basis_a_t = jnp.asarray(basis[0::2, :].T)   # slope basis,     (dim, nC)
    basis_b_t = jnp.asarray(basis[1::2, :].T)   # intercept basis, (dim, nC)

    key = jax.random.PRNGKey(0)
    kx, kp = jax.random.split(key)
    x = jax.random.normal(kx, (batch, channels, signal_len), jnp.float32)
    params = init_params(channels, fc_dim, dim, kp)

    out = cfdtan_forward(x, params, basis_a_t, basis_b_t, nC,
                         n_recurrence=n_recur, num_scaling=num_scaling)
    out = jax.block_until_ready(out)
    assert out.shape == (batch, channels, signal_len)
    assert bool(jnp.all(jnp.isfinite(out)))
    print("KERNEL_OK")
</pallas_src>

<mosaic_0001>
module attributes {stable_mosaic.version = 11 : i64} {
  func.func @cfdtan_stn_kernel(%arg0: i32, %arg1: memref<2x2x64xf32, #tpu.memory_space<vmem>>, %arg2: memref<128x2xf32, #tpu.memory_space<vmem>>, %arg3: memref<3x2x128xf32, #tpu.memory_space<vmem>>, %arg4: memref<1x128xf32, #tpu.memory_space<vmem>>, %arg5: memref<1x128xf32, #tpu.memory_space<vmem>>, %arg6: memref<1x128xf32, #tpu.memory_space<vmem>>, %arg7: memref<640x64xf32, #tpu.memory_space<vmem>>, %arg8: memref<1x64xf32, #tpu.memory_space<vmem>>, %arg9: memref<1x64xf32, #tpu.memory_space<vmem>>, %arg10: memref<1x64xf32, #tpu.memory_space<vmem>>, %arg11: memref<3x64x64xf32, #tpu.memory_space<vmem>>, %arg12: memref<1x64xf32, #tpu.memory_space<vmem>>, %arg13: memref<1x64xf32, #tpu.memory_space<vmem>>, %arg14: memref<1x64xf32, #tpu.memory_space<vmem>>, %arg15: memref<2x64x48xf32, #tpu.memory_space<vmem>>, %arg16: memref<1x48xf32, #tpu.memory_space<vmem>>, %arg17: memref<48x32xf32, #tpu.memory_space<vmem>>, %arg18: memref<1x32xf32, #tpu.memory_space<vmem>>, %arg19: memref<32x16xf32, #tpu.memory_space<vmem>>, %arg20: memref<1x16xf32, #tpu.memory_space<vmem>>, %arg21: memref<16x5xf32, #tpu.memory_space<vmem>>, %arg22: memref<1x5xf32, #tpu.memory_space<vmem>>, %arg23: memref<5x6xf32, #tpu.memory_space<vmem>>, %arg24: memref<5x6xf32, #tpu.memory_space<vmem>>, %arg25: memref<2x2x64xf32, #tpu.memory_space<vmem>>, %arg26: memref<128x2xf32, #tpu.memory_space<vmem>>, %arg27: memref<2x2x64xf32, #tpu.memory_space<vmem>>, %arg28: memref<128x128xf32, #tpu.memory_space<vmem>>, %arg29: memref<60x128xf32, #tpu.memory_space<vmem>>, %arg30: memref<60x64xf32, #tpu.memory_space<vmem>>, %arg31: memref<16x64xf32, #tpu.memory_space<vmem>>, %arg32: memref<16x64xf32, #tpu.memory_space<vmem>>, %arg33: memref<2x2x64xf32, #tpu.memory_space<vmem>>) attributes {dimension_semantics = [#tpu.dimension_semantics<arbitrary>], iteration_bounds = array<i64: 2>, scalar_prefetch = 0 : i64, scratch_operands = 8 : i64, tpu.core_type = #tpu.core_type<tc>, window_params = [{pipeline_mode = #tpu.pipeline_mode<synchronous>, transform_indices = @transform_0, window_bounds = array<i64: 2, 2, 64>}, {pipeline_mode = #tpu.pipeline_mode<synchronous>, transform_indices = @transform_1, window_bounds = array<i64: 128, 2>}, {pipeline_mode = #tpu.pipeline_mode<synchronous>, transform_indices = @transform_2, window_bounds = array<i64: 3, 2, 128>}, {pipeline_mode = #tpu.pipeline_mode<synchronous>, transform_indices = @transform_3, window_bounds = array<i64: 1, 128>}, {pipeline_mode = #tpu.pipeline_mode<synchronous>, transform_indices = @transform_4, window_bounds = array<i64: 1, 128>}, {pipeline_mode = #tpu.pipeline_mode<synchronous>, transform_indices = @transform_5, window_bounds = array<i64: 1, 128>}, {pipeline_mode = #tpu.pipeline_mode<synchronous>, transform_indices = @transform_6, window_bounds = array<i64: 640, 64>}, {pipeline_mode = #tpu.pipeline_mode<synchronous>, transform_indices = @transform_7, window_bounds = array<i64: 1, 64>}, {pipeline_mode = #tpu.pipeline_mode<synchronous>, transform_indices = @transform_8, window_bounds = array<i64: 1, 64>}, {pipeline_mode = #tpu.pipeline_mode<synchronous>, transform_indices = @transform_9, window_bounds = array<i64: 1, 64>}, {pipeline_mode = #tpu.pipeline_mode<synchronous>, transform_indices = @transform_10, window_bounds = array<i64: 3, 64, 64>}, {pipeline_mode = #tpu.pipeline_mode<synchronous>, transform_indices = @transform_11, window_bounds = array<i64: 1, 64>}, {pipeline_mode = #tpu.pipeline_mode<synchronous>, transform_indices = @transform_12, window_bounds = array<i64: 1, 64>}, {pipeline_mode = #tpu.pipeline_mode<synchronous>, transform_indices = @transform_13, window_bounds = array<i64: 1, 64>}, {pipeline_mode = #tpu.pipeline_mode<synchronous>, transform_indices = @transform_14, window_bounds = array<i64: 2, 64, 48>}, {pipeline_mode = #tpu.pipeline_mode<synchronous>, transform_indices = @transform_15, window_bounds = array<i64: 1, 48>}, {pipeline_mode = #tpu.pipeline_mode<synchronous>, transform_indices = @transform_16, window_bounds = array<i64: 48, 32>}, {pipeline_mode = #tpu.pipeline_mode<synchronous>, transform_indices = @transform_17, window_bounds = array<i64: 1, 32>}, {pipeline_mode = #tpu.pipeline_mode<synchronous>, transform_indices = @transform_18, window_bounds = array<i64: 32, 16>}, {pipeline_mode = #tpu.pipeline_mode<synchronous>, transform_indices = @transform_19, window_bounds = array<i64: 1, 16>}, {pipeline_mode = #tpu.pipeline_mode<synchronous>, transform_indices = @transform_20, window_bounds = array<i64: 16, 5>}, {pipeline_mode = #tpu.pipeline_mode<synchronous>, transform_indices = @transform_21, window_bounds = array<i64: 1, 5>}, {pipeline_mode = #tpu.pipeline_mode<synchronous>, transform_indices = @transform_22, window_bounds = array<i64: 5, 6>}, {pipeline_mode = #tpu.pipeline_mode<synchronous>, transform_indices = @transform_23, window_bounds = array<i64: 5, 6>}, {pipeline_mode = #tpu.pipeline_mode<synchronous>, transform_indices = @transform_24, window_bounds = array<i64: 2, 2, 64>}]} {
    %c0_i32 = arith.constant 0 : i32
    %0 = arith.cmpi eq, %arg0, %c0_i32 : i32
    %1 = arith.extui %0 : i1 to i32
    %c0_i32_0 = arith.constant 0 : i32
    %2 = arith.cmpi ne, %1, %c0_i32_0 : i32
    scf.if %2 {
      %c0_203 = arith.constant 0 : index
      %c0_204 = arith.constant 0 : index
      %407 = vector.load %arg2[%c0_203, %c0_204] : memref<128x2xf32, #tpu.memory_space<vmem>>, vector<128x2xf32>
      %c0_205 = arith.constant 0 : index
      %c0_206 = arith.constant 0 : index
      %408 = vector.load %arg26[%c0_205, %c0_206] : memref<128x2xf32, #tpu.memory_space<vmem>>, vector<128x2xf32>
      tpu.vector_store %arg26[%c0_205, %c0_206], %407 {strides = array<i32>} : memref<128x2xf32, #tpu.memory_space<vmem>>, vector<128x2xf32>,
      %c0_207 = arith.constant 0 : index
      %c0_208 = arith.constant 0 : index
      %c0_209 = arith.constant 0 : index
      %409 = vector.load %arg1[%c0_207, %c0_208, %c0_209] : memref<2x2x64xf32, #tpu.memory_space<vmem>>, vector<2x2x64xf32>
      %c0_210 = arith.constant 0 : index
      %c0_211 = arith.constant 0 : index
      %c0_212 = arith.constant 0 : index
      %410 = vector.load %arg27[%c0_210, %c0_211, %c0_212] : memref<2x2x64xf32, #tpu.memory_space<vmem>>, vector<2x2x64xf32>
      tpu.vector_store %arg27[%c0_210, %c0_211, %c0_212], %409 {strides = array<i32>} : memref<2x2x64xf32, #tpu.memory_space<vmem>>, vector<2x2x64xf32>,
    } else {
    }
    %c0 = arith.constant 0 : index
    %c0_1 = arith.constant 0 : index
    %3 = vector.load %arg26[%c0, %c0_1] : memref<128x2xf32, #tpu.memory_space<vmem>>, vector<128x2xf32>
    %4 = vector.extract_strided_slice %3 {offsets = [0, 0], sizes = [126, 2], strides = [1, 1]} : vector<128x2xf32> to vector<126x2xf32>
    %c0_2 = arith.constant 0 : index
    %c0_3 = arith.constant 0 : index
    %c0_4 = arith.constant 0 : index
    %5 = vector.load %arg3[%c0_2, %c0_3, %c0_4] : memref<3x2x128xf32, #tpu.memory_space<vmem>>, vector<1x2x128xf32>
    %6 = vector.shape_cast %5 : vector<1x2x128xf32> to vector<2x128xf32>
    %cst = arith.constant dense<0.000000e+00> : vector<126x128xf32>
    %7 = tpu.matmul %4, %6, %cst {dimension_numbers = #tpu.dot_dimension_numbers<[1], [0], [0], [1], [0, 0, 1, 1], [], []>} : vector<126x2xf32>, vector<2x128xf32>, vector<126x128xf32> -> vector<126x128xf32>
    %8 = vector.extract_strided_slice %3 {offsets = [1, 0], sizes = [126, 2], strides = [1, 1]} : vector<128x2xf32> to vector<126x2xf32>
    %c1 = arith.constant 1 : index
    %c0_5 = arith.constant 0 : index
    %c0_6 = arith.constant 0 : index
    %9 = vector.load %arg3[%c1, %c0_5, %c0_6] : memref<3x2x128xf32, #tpu.memory_space<vmem>>, vector<1x2x128xf32>
    %10 = vector.shape_cast %9 : vector<1x2x128xf32> to vector<2x128xf32>
    %cst_7 = arith.constant dense<0.000000e+00> : vector<126x128xf32>
    %11 = tpu.matmul %8, %10, %cst_7 {dimension_numbers = #tpu.dot_dimension_numbers<[1], [0], [0], [1], [0, 0, 1, 1], [], []>} : vector<126x2xf32>, vector<2x128xf32>, vector<126x128xf32> -> vector<126x128xf32>
    %12 = arith.addf %7, %11 : vector<126x128xf32>
    %13 = vector.extract_strided_slice %3 {offsets = [2, 0], sizes = [126, 2], strides = [1, 1]} : vector<128x2xf32> to vector<126x2xf32>
    %c2 = arith.constant 2 : index
    %c0_8 = arith.constant 0 : index
    %c0_9 = arith.constant 0 : index
    %14 = vector.load %arg3[%c2, %c0_8, %c0_9] : memref<3x2x128xf32, #tpu.memory_space<vmem>>, vector<1x2x128xf32>
    %15 = vector.shape_cast %14 : vector<1x2x128xf32> to vector<2x128xf32>
    %cst_10 = arith.constant dense<0.000000e+00> : vector<126x128xf32>
    %16 = tpu.matmul %13, %15, %cst_10 {dimension_numbers = #tpu.dot_dimension_numbers<[1], [0], [0], [1], [0, 0, 1, 1], [], []>} : vector<126x2xf32>, vector<2x128xf32>, vector<126x128xf32> -> vector<126x128xf32>
    %17 = arith.addf %12, %16 : vector<126x128xf32>
    %c0_11 = arith.constant 0 : index
    %c0_12 = arith.constant 0 : index
    %18 = vector.load %arg4[%c0_11, %c0_12] : memref<1x128xf32, #tpu.memory_space<vmem>>, vector<1x128xf32>
    %19 = vector.broadcast %18 : vector<1x128xf32> to vector<126x128xf32>
    %20 = arith.addf %17, %19 : vector<126x128xf32>
    %21 = tpu.iota {dimensions = array<i32: 0>} : vector<126x1xi32>
    %22 = arith.sitofp %21 : vector<126x1xi32> to vector<126x1xf32>
    %cst_13 = arith.constant 5.000000e-01 : f32
    %23 = vector.broadcast %cst_13 : f32 to vector<126x1xf32>
    %24 = arith.addf %22, %23 : vector<126x1xf32>
    %cst_14 = arith.constant 1.562500e-02 : f32
    %25 = vector.broadcast %cst_14 : f32 to vector<126x1xf32>
    %26 = arith.mulf %24, %25 : vector<126x1xf32>
    %27 = math.floor %26 : vector<126x1xf32>
    %cst_15 = arith.constant 6.400000e+01 : f32
    %28 = vector.broadcast %cst_15 : f32 to vector<126x1xf32>
    %29 = arith.mulf %27, %28 : vector<126x1xf32>
    %30 = arith.subf %22, %29 : vector<126x1xf32>
    %cst_16 = arith.constant 6.200000e+01 : f32
    %31 = vector.broadcast %cst_16 : f32 to vector<126x1xf32>
    %32 = arith.cmpf olt, %30, %31 : vector<126x1xf32>
    %cst_17 = arith.constant 1.000000e+00 : f32
    %cst_18 = arith.constant 0.000000e+00 : f32
    %33 = vector.broadcast %cst_17 : f32 to vector<126x1xf32>
    %34 = vector.broadcast %cst_18 : f32 to vector<126x1xf32>
    %35 = arith.select %32, %33, %34 : vector<126x1xi1>, vector<126x1xf32>
    %36 = vector.broadcast %35 : vector<126x1xf32> to vector<126x128xf32>
    %37 = arith.mulf %20, %36 : vector<126x128xf32>
    %cst_19 = arith.constant dense<0.000000e+00> : vector<128xf32>
    %38 = vector.multi_reduction <add>, %37, %cst_19 [0] : vector<126x128xf32> to vector<128xf32>
    %39 = vector.shape_cast %38 : vector<128xf32> to vector<1x128xf32>
    %cst_20 = arith.constant 0.00806451589 : f32
    %40 = vector.broadcast %cst_20 : f32 to vector<1x128xf32>
    %41 = arith.mulf %39, %40 : vector<1x128xf32>
    %42 = vector.broadcast %41 : vector<1x128xf32> to vector<126x128xf32>
    %43 = arith.subf %20, %42 : vector<126x128xf32>
    %44 = vector.broadcast %35 : vector<126x1xf32> to vector<126x128xf32>
    %45 = arith.mulf %43, %44 : vector<126x128xf32>
    %46 = arith.mulf %45, %45 : vector<126x128xf32>
    %cst_21 = arith.constant dense<0.000000e+00> : vector<128xf32>
    %47 = vector.multi_reduction <add>, %46, %cst_21 [0] : vector<126x128xf32> to vector<128xf32>
    %48 = vector.shape_cast %47 : vector<128xf32> to vector<1x128xf32>
    %cst_22 = arith.constant 0.00806451589 : f32
    %49 = vector.broadcast %cst_22 : f32 to vector<1x128xf32>
    %50 = arith.mulf %48, %49 : vector<1x128xf32>
    %51 = vector.broadcast %41 : vector<1x128xf32> to vector<126x128xf32>
    %52 = arith.subf %20, %51 : vector<126x128xf32>
    %cst_23 = arith.constant 9.99999974E-6 : f32
    %53 = vector.broadcast %cst_23 : f32 to vector<1x128xf32>
    %54 = arith.addf %50, %53 : vector<1x128xf32>
    %55 = math.rsqrt %54 : vector<1x128xf32>
    %56 = vector.broadcast %55 : vector<1x128xf32> to vector<126x128xf32>
    %57 = arith.mulf %52, %56 : vector<126x128xf32>
    %c0_24 = arith.constant 0 : index
    %c0_25 = arith.constant 0 : index
    %58 = vector.load %arg5[%c0_24, %c0_25] : memref<1x128xf32, #tpu.memory_space<vmem>>, vector<1x128xf32>
    %59 = vector.broadcast %58 : vector<1x128xf32> to vector<126x128xf32>
    %60 = arith.mulf %57, %59 : vector<126x128xf32>
    %c0_26 = arith.constant 0 : index
    %c0_27 = arith.constant 0 : index
    %61 = vector.load %arg6[%c0_26, %c0_27] : memref<1x128xf32, #tpu.memory_space<vmem>>, vector<1x128xf32>
    %62 = vector.broadcast %61 : vector<1x128xf32> to vector<126x128xf32>
    %63 = arith.addf %60, %62 : vector<126x128xf32>
    %64 = vector.extract_strided_slice %63 {offsets = [0, 0], sizes = [124, 128], strides = [1, 1]} : vector<126x128xf32> to vector<124x128xf32>
    %65 = vector.extract_strided_slice %63 {offsets = [1, 0], sizes = [124, 128], strides = [1, 1]} : vector<126x128xf32> to vector<124x128xf32>
    %66 = arith.maximumf %64, %65 : vector<124x128xf32>
    %67 = vector.extract_strided_slice %63 {offsets = [2, 0], sizes = [124, 128], strides = [1, 1]} : vector<126x128xf32> to vector<124x128xf32>
    %68 = arith.maximumf %66, %67 : vector<124x128xf32>
    %cst_28 = arith.constant 0.000000e+00 : f32
    %69 = vector.broadcast %cst_28 : f32 to vector<124x128xf32>
    %70 = arith.maximumf %68, %69 : vector<124x128xf32>
    %c0_29 = arith.constant 0 : index
    %c0_30 = arith.constant 0 : index
    %71 = vector.load %arg28[%c0_29, %c0_30] : memref<128x128xf32, #tpu.memory_space<vmem>>, vector<124x128xf32>
    tpu.vector_store %arg28[%c0_29, %c0_30], %70 {strides = array<i32>} : memref<128x128xf32, #tpu.memory_space<vmem>>, vector<124x128xf32>,
    %c0_31 = arith.constant 0 : index
    %c0_32 = arith.constant 0 : index
    %72 = tpu.strided_load %arg28[%c0_31, %c0_32] {strides = array<i32: 2, 1>} : memref<128x128xf32, #tpu.memory_space<vmem>>, vector<30x128xf32>
    %c0_33 = arith.constant 0 : index
    %c0_34 = arith.constant 0 : index
    %73 = vector.load %arg29[%c0_33, %c0_34] : memref<60x128xf32, #tpu.memory_space<vmem>>, vector<30x128xf32>
    tpu.vector_store %arg29[%c0_33, %c0_34], %72 {strides = array<i32>} : memref<60x128xf32, #tpu.memory_space<vmem>>, vector<30x128xf32>,
    %c64 = arith.constant 64 : index
    %c0_35 = arith.constant 0 : index
    %74 = tpu.strided_load %arg28[%c64, %c0_35] {strides = array<i32: 2, 1>} : memref<128x128xf32, #tpu.memory_space<vmem>>, vector<30x128xf32>
    %c30 = arith.constant 30 : index
    %c0_36 = arith.constant 0 : index
    %75 = vector.load %arg29[%c30, %c0_36] : memref<60x128xf32, #tpu.memory_space<vmem>>, vector<30x128xf32>
    tpu.vector_store %arg29[%c30, %c0_36], %74 {strides = array<i32>} : memref<60x128xf32, #tpu.memory_space<vmem>>, vector<30x128xf32>,
    %c0_37 = arith.constant 0 : index
    %c0_38 = arith.constant 0 : index
    %76 = vector.load %arg29[%c0_37, %c0_38] : memref<60x128xf32, #tpu.memory_space<vmem>>, vector<60x128xf32>
    %77 = vector.extract_strided_slice %76 {offsets = [0, 0], sizes = [56, 128], strides = [1, 1]} : vector<60x128xf32> to vector<56x128xf32>
    %78 = vector.extract_strided_slice %76 {offsets = [1, 0], sizes = [56, 128], strides = [1, 1]} : vector<60x128xf32> to vector<56x128xf32>
    %79 = vector.extract_strided_slice %76 {offsets = [2, 0], sizes = [56, 128], strides = [1, 1]} : vector<60x128xf32> to vector<56x128xf32>
    %80 = vector.extract_strided_slice %76 {offsets = [3, 0], sizes = [56, 128], strides = [1, 1]} : vector<60x128xf32> to vector<56x128xf32>
    %81 = vector.extract_strided_slice %76 {offsets = [4, 0], sizes = [56, 128], strides = [1, 1]} : vector<60x128xf32> to vector<56x128xf32>
    %82 = tpu.concatenate %77, %78, %79, %80, %81 in 1 : vector<56x128xf32>, vector<56x128xf32>, vector<56x128xf32>, vector<56x128xf32>, vector<56x128xf32> -> vector<56x640xf32>
    %c0_39 = arith.constant 0 : index
    %c0_40 = arith.constant 0 : index
    %83 = vector.load %arg7[%c0_39, %c0_40] : memref<640x64xf32, #tpu.memory_space<vmem>>, vector<640x64xf32>
    %cst_41 = arith.constant dense<0.000000e+00> : vector<56x64xf32>
    %84 = tpu.matmul %82, %83, %cst_41 {dimension_numbers = #tpu.dot_dimension_numbers<[1], [0], [0], [1], [0, 0, 1, 1], [], []>} : vector<56x640xf32>, vector<640x64xf32>, vector<56x64xf32> -> vector<56x64xf32>
    %c0_42 = arith.constant 0 : index
    %c0_43 = arith.constant 0 : index
    %85 = vector.load %arg8[%c0_42, %c0_43] : memref<1x64xf32, #tpu.memory_space<vmem>>, vector<1x64xf32>
    %86 = vector.broadcast %85 : vector<1x64xf32> to vector<56x64xf32>
    %87 = arith.addf %84, %86 : vector<56x64xf32>
    %88 = tpu.iota {dimensions = array<i32: 0>} : vector<56x1xi32>
    %89 = arith.sitofp %88 : vector<56x1xi32> to vector<56x1xf32>
    %cst_44 = arith.constant 5.000000e-01 : f32
    %90 = vector.broadcast %cst_44 : f32 to vector<56x1xf32>
    %91 = arith.addf %89, %90 : vector<56x1xf32>
    %cst_45 = arith.constant 0.0333333351 : f32
    %92 = vector.broadcast %cst_45 : f32 to vector<56x1xf32>
    %93 = arith.mulf %91, %92 : vector<56x1xf32>
    %94 = math.floor %93 : vector<56x1xf32>
    %cst_46 = arith.constant 3.000000e+01 : f32
    %95 = vector.broadcast %cst_46 : f32 to vector<56x1xf32>
    %96 = arith.mulf %94, %95 : vector<56x1xf32>
    %97 = arith.subf %89, %96 : vector<56x1xf32>
    %cst_47 = arith.constant 2.600000e+01 : f32
    %98 = vector.broadcast %cst_47 : f32 to vector<56x1xf32>
    %99 = arith.cmpf olt, %97, %98 : vector<56x1xf32>
    %cst_48 = arith.constant 1.000000e+00 : f32
    %cst_49 = arith.constant 0.000000e+00 : f32
    %100 = vector.broadcast %cst_48 : f32 to vector<56x1xf32>
    %101 = vector.broadcast %cst_49 : f32 to vector<56x1xf32>
    %102 = arith.select %99, %100, %101 : vector<56x1xi1>, vector<56x1xf32>
    %103 = vector.broadcast %102 : vector<56x1xf32> to vector<56x64xf32>
    %104 = arith.mulf %87, %103 : vector<56x64xf32>
    %cst_50 = arith.constant dense<0.000000e+00> : vector<64xf32>
    %105 = vector.multi_reduction <add>, %104, %cst_50 [0] : vector<56x64xf32> to vector<64xf32>
    %106 = vector.shape_cast %105 : vector<64xf32> to vector<1x64xf32>
    %cst_51 = arith.constant 0.0192307699 : f32
    %107 = vector.broadcast %cst_51 : f32 to vector<1x64xf32>
    %108 = arith.mulf %106, %107 : vector<1x64xf32>
    %109 = vector.broadcast %108 : vector<1x64xf32> to vector<56x64xf32>
    %110 = arith.subf %87, %109 : vector<56x64xf32>
    %111 = vector.broadcast %102 : vector<56x1xf32> to vector<56x64xf32>
    %112 = arith.mulf %110, %111 : vector<56x64xf32>
    %113 = arith.mulf %112, %112 : vector<56x64xf32>
    %cst_52 = arith.constant dense<0.000000e+00> : vector<64xf32>
    %114 = vector.multi_reduction <add>, %113, %cst_52 [0] : vector<56x64xf32> to vector<64xf32>
    %115 = vector.shape_cast %114 : vector<64xf32> to vector<1x64xf32>
    %cst_53 = arith.constant 0.0192307699 : f32
    %116 = vector.broadcast %cst_53 : f32 to vector<1x64xf32>
    %117 = arith.mulf %115, %116 : vector<1x64xf32>
    %118 = vector.broadcast %108 : vector<1x64xf32> to vector<56x64xf32>
    %119 = arith.subf %87, %118 : vector<56x64xf32>
    %cst_54 = arith.constant 9.99999974E-6 : f32
    %120 = vector.broadcast %cst_54 : f32 to vector<1x64xf32>
    %121 = arith.addf %117, %120 : vector<1x64xf32>
    %122 = math.rsqrt %121 : vector<1x64xf32>
    %123 = vector.broadcast %122 : vector<1x64xf32> to vector<56x64xf32>
    %124 = arith.mulf %119, %123 : vector<56x64xf32>
    %c0_55 = arith.constant 0 : index
    %c0_56 = arith.constant 0 : index
    %125 = vector.load %arg9[%c0_55, %c0_56] : memref<1x64xf32, #tpu.memory_space<vmem>>, vector<1x64xf32>
    %126 = vector.broadcast %125 : vector<1x64xf32> to vector<56x64xf32>
    %127 = arith.mulf %124, %126 : vector<56x64xf32>
    %c0_57 = arith.constant 0 : index
    %c0_58 = arith.constant 0 : index
    %128 = vector.load %arg10[%c0_57, %c0_58] : memref<1x64xf32, #tpu.memory_space<vmem>>, vector<1x64xf32>
    %129 = vector.broadcast %128 : vector<1x64xf32> to vector<56x64xf32>
    %130 = arith.addf %127, %129 : vector<56x64xf32>
    %131 = vector.extract_strided_slice %130 {offsets = [0, 0], sizes = [54, 64], strides = [1, 1]} : vector<56x64xf32> to vector<54x64xf32>
    %132 = vector.extract_strided_slice %130 {offsets = [1, 0], sizes = [54, 64], strides = [1, 1]} : vector<56x64xf32> to vector<54x64xf32>
    %133 = arith.maximumf %131, %132 : vector<54x64xf32>
    %134 = vector.extract_strided_slice %130 {offsets = [2, 0], sizes = [54, 64], strides = [1, 1]} : vector<56x64xf32> to vector<54x64xf32>
    %135 = arith.maximumf %133, %134 : vector<54x64xf32>
    %cst_59 = arith.constant 0.000000e+00 : f32
    %136 = vector.broadcast %cst_59 : f32 to vector<54x64xf32>
    %137 = arith.maximumf %135, %136 : vector<54x64xf32>
    %c0_60 = arith.constant 0 : index
    %c0_61 = arith.constant 0 : index
    %138 = vector.load %arg30[%c0_60, %c0_61] : memref<60x64xf32, #tpu.memory_space<vmem>>, vector<54x64xf32>
    tpu.vector_store %arg30[%c0_60, %c0_61], %137 {strides = array<i32>} : memref<60x64xf32, #tpu.memory_space<vmem>>, vector<54x64xf32>,
    %c0_62 = arith.constant 0 : index
    %c0_63 = arith.constant 0 : index
    %139 = tpu.strided_load %arg30[%c0_62, %c0_63] {strides = array<i32: 3, 1>} : memref<60x64xf32, #tpu.memory_space<vmem>>, vector<8x64xf32>
    %c0_64 = arith.constant 0 : index
    %c0_65 = arith.constant 0 : index
    %140 = vector.load %arg31[%c0_64, %c0_65] : memref<16x64xf32, #tpu.memory_space<vmem>>, vector<8x64xf32>
    tpu.vector_store %arg31[%c0_64, %c0_65], %139 {strides = array<i32>} : memref<16x64xf32, #tpu.memory_space<vmem>>, vector<8x64xf32>,
    %c30_66 = arith.constant 30 : index
    %c0_67 = arith.constant 0 : index
    %141 = tpu.strided_load %arg30[%c30_66, %c0_67] {strides = array<i32: 3, 1>} : memref<60x64xf32, #tpu.memory_space<vmem>>, vector<8x64xf32>
    %c8 = arith.constant 8 : index
    %c0_68 = arith.constant 0 : index
    %142 = vector.load %arg31[%c8, %c0_68] : memref<16x64xf32, #tpu.memory_space<vmem>>, vector<8x64xf32>
    tpu.vector_store %arg31[%c8, %c0_68], %141 {strides = array<i32>} : memref<16x64xf32, #tpu.memory_space<vmem>>, vector<8x64xf32>,
    %c0_69 = arith.constant 0 : index
    %c0_70 = arith.constant 0 : index
    %143 = vector.load %arg31[%c0_69, %c0_70] : memref<16x64xf32, #tpu.memory_space<vmem>>, vector<16x64xf32>
    %144 = vector.extract_strided_slice %143 {offsets = [0, 0], sizes = [14, 64], strides = [1, 1]} : vector<16x64xf32> to vector<14x64xf32>
    %c0_71 = arith.constant 0 : index
    %c0_72 = arith.constant 0 : index
    %c0_73 = arith.constant 0 : index
    %145 = vector.load %arg11[%c0_71, %c0_72, %c0_73] : memref<3x64x64xf32, #tpu.memory_space<vmem>>, vector<1x64x64xf32>
    %146 = vector.shape_cast %145 : vector<1x64x64xf32> to vector<64x64xf32>
    %cst_74 = arith.constant dense<0.000000e+00> : vector<14x64xf32>
    %147 = tpu.matmul %144, %146, %cst_74 {dimension_numbers = #tpu.dot_dimension_numbers<[1], [0], [0], [1], [0, 0, 1, 1], [], []>} : vector<14x64xf32>, vector<64x64xf32>, vector<14x64xf32> -> vector<14x64xf32>
    %148 = vector.extract_strided_slice %143 {offsets = [1, 0], sizes = [14, 64], strides = [1, 1]} : vector<16x64xf32> to vector<14x64xf32>
    %c1_75 = arith.constant 1 : index
    %c0_76 = arith.constant 0 : index
    %c0_77 = arith.constant 0 : index
    %149 = vector.load %arg11[%c1_75, %c0_76, %c0_77] : memref<3x64x64xf32, #tpu.memory_space<vmem>>, vector<1x64x64xf32>
    %150 = vector.shape_cast %149 : vector<1x64x64xf32> to vector<64x64xf32>
    %cst_78 = arith.constant dense<0.000000e+00> : vector<14x64xf32>
    %151 = tpu.matmul %148, %150, %cst_78 {dimension_numbers = #tpu.dot_dimension_numbers<[1], [0], [0], [1], [0, 0, 1, 1], [], []>} : vector<14x64xf32>, vector<64x64xf32>, vector<14x64xf32> -> vector<14x64xf32>
    %152 = arith.addf %147, %151 : vector<14x64xf32>
    %153 = vector.extract_strided_slice %143 {offsets = [2, 0], sizes = [14, 64], strides = [1, 1]} : vector<16x64xf32> to vector<14x64xf32>
    %c2_79 = arith.constant 2 : index
    %c0_80 = arith.constant 0 : index
    %c0_81 = arith.constant 0 : index
    %154 = vector.load %arg11[%c2_79, %c0_80, %c0_81] : memref<3x64x64xf32, #tpu.memory_space<vmem>>, vector<1x64x64xf32>
    %155 = vector.shape_cast %154 : vector<1x64x64xf32> to vector<64x64xf32>
    %cst_82 = arith.constant dense<0.000000e+00> : vector<14x64xf32>
    %156 = tpu.matmul %153, %155, %cst_82 {dimension_numbers = #tpu.dot_dimension_numbers<[1], [0], [0], [1], [0, 0, 1, 1], [], []>} : vector<14x64xf32>, vector<64x64xf32>, vector<14x64xf32> -> vector<14x64xf32>
    %157 = arith.addf %152, %156 : vector<14x64xf32>
    %c0_83 = arith.constant 0 : index
    %c0_84 = arith.constant 0 : index
    %158 = vector.load %arg12[%c0_83, %c0_84] : memref<1x64xf32, #tpu.memory_space<vmem>>, vector<1x64xf32>
    %159 = vector.broadcast %158 : vector<1x64xf32> to vector<14x64xf32>
    %160 = arith.addf %157, %159 : vector<14x64xf32>
    %161 = tpu.iota {dimensions = array<i32: 0>} : vector<14x1xi32>
    %162 = arith.sitofp %161 : vector<14x1xi32> to vector<14x1xf32>
    %cst_85 = arith.constant 5.000000e-01 : f32
    %163 = vector.broadcast %cst_85 : f32 to vector<14x1xf32>
    %164 = arith.addf %162, %163 : vector<14x1xf32>
    %cst_86 = arith.constant 1.250000e-01 : f32
    %165 = vector.broadcast %cst_86 : f32 to vector<14x1xf32>
    %166 = arith.mulf %164, %165 : vector<14x1xf32>
    %167 = math.floor %166 : vector<14x1xf32>
    %cst_87 = arith.constant 8.000000e+00 : f32
    %168 = vector.broadcast %cst_87 : f32 to vector<14x1xf32>
    %169 = arith.mulf %167, %168 : vector<14x1xf32>
    %170 = arith.subf %162, %169 : vector<14x1xf32>
    %cst_88 = arith.constant 6.000000e+00 : f32
    %171 = vector.broadcast %cst_88 : f32 to vector<14x1xf32>
    %172 = arith.cmpf olt, %170, %171 : vector<14x1xf32>
    %cst_89 = arith.constant 1.000000e+00 : f32
    %cst_90 = arith.constant 0.000000e+00 : f32
    %173 = vector.broadcast %cst_89 : f32 to vector<14x1xf32>
    %174 = vector.broadcast %cst_90 : f32 to vector<14x1xf32>
    %175 = arith.select %172, %173, %174 : vector<14x1xi1>, vector<14x1xf32>
    %176 = vector.broadcast %175 : vector<14x1xf32> to vector<14x64xf32>
    %177 = arith.mulf %160, %176 : vector<14x64xf32>
    %cst_91 = arith.constant dense<0.000000e+00> : vector<64xf32>
    %178 = vector.multi_reduction <add>, %177, %cst_91 [0] : vector<14x64xf32> to vector<64xf32>
    %179 = vector.shape_cast %178 : vector<64xf32> to vector<1x64xf32>
    %cst_92 = arith.constant 0.0833333358 : f32
    %180 = vector.broadcast %cst_92 : f32 to vector<1x64xf32>
    %181 = arith.mulf %179, %180 : vector<1x64xf32>
    %182 = vector.broadcast %181 : vector<1x64xf32> to vector<14x64xf32>
    %183 = arith.subf %160, %182 : vector<14x64xf32>
    %184 = vector.broadcast %175 : vector<14x1xf32> to vector<14x64xf32>
    %185 = arith.mulf %183, %184 : vector<14x64xf32>
    %186 = arith.mulf %185, %185 : vector<14x64xf32>
    %cst_93 = arith.constant dense<0.000000e+00> : vector<64xf32>
    %187 = vector.multi_reduction <add>, %186, %cst_93 [0] : vector<14x64xf32> to vector<64xf32>
    %188 = vector.shape_cast %187 : vector<64xf32> to vector<1x64xf32>
    %cst_94 = arith.constant 0.0833333358 : f32
    %189 = vector.broadcast %cst_94 : f32 to vector<1x64xf32>
    %190 = arith.mulf %188, %189 : vector<1x64xf32>
    %191 = vector.broadcast %181 : vector<1x64xf32> to vector<14x64xf32>
    %192 = arith.subf %160, %191 : vector<14x64xf32>
    %cst_95 = arith.constant 9.99999974E-6 : f32
    %193 = vector.broadcast %cst_95 : f32 to vector<1x64xf32>
    %194 = arith.addf %190, %193 : vector<1x64xf32>
    %195 = math.rsqrt %194 : vector<1x64xf32>
    %196 = vector.broadcast %195 : vector<1x64xf32> to vector<14x64xf32>
    %197 = arith.mulf %192, %196 : vector<14x64xf32>
    %c0_96 = arith.constant 0 : index
    %c0_97 = arith.constant 0 : index
    %198 = vector.load %arg13[%c0_96, %c0_97] : memref<1x64xf32, #tpu.memory_space<vmem>>, vector<1x64xf32>
    %199 = vector.broadcast %198 : vector<1x64xf32> to vector<14x64xf32>
    %200 = arith.mulf %197, %199 : vector<14x64xf32>
    %c0_98 = arith.constant 0 : index
    %c0_99 = arith.constant 0 : index
    %201 = vector.load %arg14[%c0_98, %c0_99] : memref<1x64xf32, #tpu.memory_space<vmem>>, vector<1x64xf32>
    %202 = vector.broadcast %201 : vector<1x64xf32> to vector<14x64xf32>
    %203 = arith.addf %200, %202 : vector<14x64xf32>
    %204 = vector.extract_strided_slice %203 {offsets = [0, 0], sizes = [12, 64], strides = [1, 1]} : vector<14x64xf32> to vector<12x64xf32>
    %205 = vector.extract_strided_slice %203 {offsets = [1, 0], sizes = [12, 64], strides = [1, 1]} : vector<14x64xf32> to vector<12x64xf32>
    %206 = arith.maximumf %204, %205 : vector<12x64xf32>
    %207 = vector.extract_strided_slice %203 {offsets = [2, 0], sizes = [12, 64], strides = [1, 1]} : vector<14x64xf32> to vector<12x64xf32>
    %208 = arith.maximumf %206, %207 : vector<12x64xf32>
    %cst_100 = arith.constant 0.000000e+00 : f32
    %209 = vector.broadcast %cst_100 : f32 to vector<12x64xf32>
    %210 = arith.maximumf %208, %209 : vector<12x64xf32>
    %c0_101 = arith.constant 0 : index
    %c0_102 = arith.constant 0 : index
    %211 = vector.load %arg32[%c0_101, %c0_102] : memref<16x64xf32, #tpu.memory_space<vmem>>, vector<12x64xf32>
    tpu.vector_store %arg32[%c0_101, %c0_102], %210 {strides = array<i32>} : memref<16x64xf32, #tpu.memory_space<vmem>>, vector<12x64xf32>,
    %c0_103 = arith.constant 0 : index
    %c0_104 = arith.constant 0 : index
    %212 = tpu.strided_load %arg32[%c0_103, %c0_104] {strides = array<i32: 2, 1>} : memref<16x64xf32, #tpu.memory_space<vmem>>, vector<2x64xf32>
    %c0_105 = arith.constant 0 : index
    %c0_106 = arith.constant 0 : index
    %c0_107 = arith.constant 0 : index
    %213 = vector.load %arg33[%c0_105, %c0_106, %c0_107] : memref<2x2x64xf32, #tpu.memory_space<vmem>>, vector<2x1x64xf32>
    %214 = vector.shape_cast %213 : vector<2x1x64xf32> to vector<2x64xf32>
    %215 = vector.shape_cast %212 : vector<2x64xf32> to vector<2x1x64xf32>
    tpu.vector_store %arg33[%c0_105, %c0_106, %c0_107], %215 {strides = array<i32>} : memref<2x2x64xf32, #tpu.memory_space<vmem>>, vector<2x1x64xf32>,
    %c8_108 = arith.constant 8 : index
    %c0_109 = arith.constant 0 : index
    %216 = tpu.strided_load %arg32[%c8_108, %c0_109] {strides = array<i32: 2, 1>} : memref<16x64xf32, #tpu.memory_space<vmem>>, vector<2x64xf32>
    %c0_110 = arith.constant 0 : index
    %c1_111 = arith.constant 1 : index
    %c0_112 = arith.constant 0 : index
    %217 = vector.load %arg33[%c0_110, %c1_111, %c0_112] : memref<2x2x64xf32, #tpu.memory_space<vmem>>, vector<2x1x64xf32>
    %218 = vector.shape_cast %217 : vector<2x1x64xf32> to vector<2x64xf32>
    %219 = vector.shape_cast %216 : vector<2x64xf32> to vector<2x1x64xf32>
    tpu.vector_store %arg33[%c0_110, %c1_111, %c0_112], %219 {strides = array<i32>} : memref<2x2x64xf32, #tpu.memory_space<vmem>>, vector<2x1x64xf32>,
    %c0_113 = arith.constant 0 : index
    %c0_114 = arith.constant 0 : index
    %c0_115 = arith.constant 0 : index
    %220 = vector.load %arg33[%c0_113, %c0_114, %c0_115] : memref<2x2x64xf32, #tpu.memory_space<vmem>>, vector<1x2x64xf32>
    %221 = vector.shape_cast %220 : vector<1x2x64xf32> to vector<2x64xf32>
    %c0_116 = arith.constant 0 : index
    %c0_117 = arith.constant 0 : index
    %c0_118 = arith.constant 0 : index
    %222 = vector.load %arg15[%c0_116, %c0_117, %c0_118] : memref<2x64x48xf32, #tpu.memory_space<vmem>>, vector<1x64x48xf32>
    %223 = vector.shape_cast %222 : vector<1x64x48xf32> to vector<64x48xf32>
    %cst_119 = arith.constant dense<0.000000e+00> : vector<2x48xf32>
    %224 = tpu.matmul %221, %223, %cst_119 {dimension_numbers = #tpu.dot_dimension_numbers<[1], [0], [0], [1], [0, 0, 1, 1], [], []>} : vector<2x64xf32>, vector<64x48xf32>, vector<2x48xf32> -> vector<2x48xf32>
    %c1_120 = arith.constant 1 : index
    %c0_121 = arith.constant 0 : index
    %c0_122 = arith.constant 0 : index
    %225 = vector.load %arg33[%c1_120, %c0_121, %c0_122] : memref<2x2x64xf32, #tpu.memory_space<vmem>>, vector<1x2x64xf32>
    %226 = vector.shape_cast %225 : vector<1x2x64xf32> to vector<2x64xf32>
    %c1_123 = arith.constant 1 : index
    %c0_124 = arith.constant 0 : index
    %c0_125 = arith.constant 0 : index
    %227 = vector.load %arg15[%c1_123, %c0_124, %c0_125] : memref<2x64x48xf32, #tpu.memory_space<vmem>>, vector<1x64x48xf32>
    %228 = vector.shape_cast %227 : vector<1x64x48xf32> to vector<64x48xf32>
    %cst_126 = arith.constant dense<0.000000e+00> : vector<2x48xf32>
    %229 = tpu.matmul %226, %228, %cst_126 {dimension_numbers = #tpu.dot_dimension_numbers<[1], [0], [0], [1], [0, 0, 1, 1], [], []>} : vector<2x64xf32>, vector<64x48xf32>, vector<2x48xf32> -> vector<2x48xf32>
    %230 = arith.addf %224, %229 : vector<2x48xf32>
    %c0_127 = arith.constant 0 : index
    %c0_128 = arith.constant 0 : index
    %231 = vector.load %arg16[%c0_127, %c0_128] : memref<1x48xf32, #tpu.memory_space<vmem>>, vector<1x48xf32>
    %232 = vector.broadcast %231 : vector<1x48xf32> to vector<2x48xf32>
    %233 = arith.addf %230, %232 : vector<2x48xf32>
    %cst_129 = arith.constant 0.000000e+00 : f32
    %234 = vector.broadcast %cst_129 : f32 to vector<2x48xf32>
    %235 = arith.maximumf %233, %234 : vector<2x48xf32>
    %c0_130 = arith.constant 0 : index
    %c0_131 = arith.constant 0 : index
    %236 = vector.load %arg17[%c0_130, %c0_131] : memref<48x32xf32, #tpu.memory_space<vmem>>, vector<48x32xf32>
    %cst_132 = arith.constant dense<0.000000e+00> : vector<2x32xf32>
    %237 = tpu.matmul %235, %236, %cst_132 {dimension_numbers = #tpu.dot_dimension_numbers<[1], [0], [0], [1], [0, 0, 1, 1], [], []>} : vector<2x48xf32>, vector<48x32xf32>, vector<2x32xf32> -> vector<2x32xf32>
    %c0_133 = arith.constant 0 : index
    %c0_134 = arith.constant 0 : index
    %238 = vector.load %arg18[%c0_133, %c0_134] : memref<1x32xf32, #tpu.memory_space<vmem>>, vector<1x32xf32>
    %239 = vector.broadcast %238 : vector<1x32xf32> to vector<2x32xf32>
    %240 = arith.addf %237, %239 : vector<2x32xf32>
    %cst_135 = arith.constant 0.000000e+00 : f32
    %241 = vector.broadcast %cst_135 : f32 to vector<2x32xf32>
    %242 = arith.maximumf %240, %241 : vector<2x32xf32>
    %c0_136 = arith.constant 0 : index
    %c0_137 = arith.constant 0 : index
    %243 = vector.load %arg19[%c0_136, %c0_137] : memref<32x16xf32, #tpu.memory_space<vmem>>, vector<32x16xf32>
    %cst_138 = arith.constant dense<0.000000e+00> : vector<2x16xf32>
    %244 = tpu.matmul %242, %243, %cst_138 {dimension_numbers = #tpu.dot_dimension_numbers<[1], [0], [0], [1], [0, 0, 1, 1], [], []>} : vector<2x32xf32>, vector<32x16xf32>, vector<2x16xf32> -> vector<2x16xf32>
    %c0_139 = arith.constant 0 : index
    %c0_140 = arith.constant 0 : index
    %245 = vector.load %arg20[%c0_139, %c0_140] : memref<1x16xf32, #tpu.memory_space<vmem>>, vector<1x16xf32>
    %246 = vector.broadcast %245 : vector<1x16xf32> to vector<2x16xf32>
    %247 = arith.addf %244, %246 : vector<2x16xf32>
    %cst_141 = arith.constant 0.000000e+00 : f32
    %248 = vector.broadcast %cst_141 : f32 to vector<2x16xf32>
    %249 = arith.maximumf %247, %248 : vector<2x16xf32>
    %c0_142 = arith.constant 0 : index
    %c0_143 = arith.constant 0 : index
    %250 = vector.load %arg21[%c0_142, %c0_143] : memref<16x5xf32, #tpu.memory_space<vmem>>, vector<16x5xf32>
    %cst_144 = arith.constant dense<0.000000e+00> : vector<2x5xf32>
    %251 = tpu.matmul %249, %250, %cst_144 {dimension_numbers = #tpu.dot_dimension_numbers<[1], [0], [0], [1], [0, 0, 1, 1], [], []>} : vector<2x16xf32>, vector<16x5xf32>, vector<2x5xf32> -> vector<2x5xf32>
    %c0_145 = arith.constant 0 : index
    %c0_146 = arith.constant 0 : index
    %252 = vector.load %arg22[%c0_145, %c0_146] : memref<1x5xf32, #tpu.memory_space<vmem>>, vector<1x5xf32>
    %253 = vector.broadcast %252 : vector<1x5xf32> to vector<2x5xf32>
    %254 = arith.addf %251, %253 : vector<2x5xf32>
    %255 = math.tanh %254 : vector<2x5xf32>
    %c0_147 = arith.constant 0 : index
    %c0_148 = arith.constant 0 : index
    %256 = vector.load %arg23[%c0_147, %c0_148] : memref<5x6xf32, #tpu.memory_space<vmem>>, vector<5x6xf32>
    %cst_149 = arith.constant dense<0.000000e+00> : vector<2x6xf32>
    %257 = tpu.matmul %255, %256, %cst_149 {dimension_numbers = #tpu.dot_dimension_numbers<[1], [0], [0], [1], [0, 0, 1, 1], [], []>} : vector<2x5xf32>, vector<5x6xf32>, vector<2x6xf32> -> vector<2x6xf32>
    %c0_150 = arith.constant 0 : index
    %c0_151 = arith.constant 0 : index
    %258 = vector.load %arg24[%c0_150, %c0_151] : memref<5x6xf32, #tpu.memory_space<vmem>>, vector<5x6xf32>
    %cst_152 = arith.constant dense<0.000000e+00> : vector<2x6xf32>
    %259 = tpu.matmul %255, %258, %cst_152 {dimension_numbers = #tpu.dot_dimension_numbers<[1], [0], [0], [1], [0, 0, 1, 1], [], []>} : vector<2x5xf32>, vector<5x6xf32>, vector<2x6xf32> -> vector<2x6xf32>
    %260 = tpu.iota {dimensions = array<i32: 1>} : vector<2x64xi32>
    %261 = arith.sitofp %260 : vector<2x64xi32> to vector<2x64xf32>
    %cst_153 = arith.constant 0.0158730168 : f32
    %262 = vector.broadcast %cst_153 : f32 to vector<2x64xf32>
    %263 = arith.mulf %261, %262 : vector<2x64xf32>
    %cst_154 = arith.constant 6.000000e+00 : f32
    %264 = vector.broadcast %cst_154 : f32 to vector<2x64xf32>
    %265 = arith.mulf %263, %264 : vector<2x64xf32>
    %266 = math.floor %265 : vector<2x64xf32>
    %cst_155 = arith.constant 0.000000e+00 : f32
    %cst_156 = arith.constant 5.000000e+00 : f32
    %267 = vector.broadcast %cst_155 : f32 to vector<2x64xf32>
    %268 = arith.maximumf %267, %266 : vector<2x64xf32>
    %269 = vector.broadcast %cst_156 : f32 to vector<2x64xf32>
    %270 = arith.minimumf %269, %268 : vector<2x64xf32>
    %cst_157 = arith.constant 0.000000e+00 : f32
    %271 = vector.broadcast %cst_157 : f32 to vector<2x64xf32>
    %cst_158 = arith.constant 0.000000e+00 : f32
    %272 = vector.broadcast %cst_158 : f32 to vector<2x64xf32>
    %cst_159 = arith.constant 0.000000e+00 : f32
    %273 = vector.broadcast %cst_159 : f32 to vector<2x64xf32>
    %274 = arith.cmpf oeq, %270, %273 : vector<2x64xf32>
    %275 = vector.extract_strided_slice %257 {offsets = [0, 0], sizes = [2, 1], strides = [1, 1]} : vector<2x6xf32> to vector<2x1xf32>
    %276 = vector.shape_cast %275 : vector<2x1xf32> to vector<2x1xf32>
    %277 = vector.broadcast %276 : vector<2x1xf32> to vector<2x64xf32>
    %278 = arith.select %274, %277, %271 : vector<2x64xi1>, vector<2x64xf32>
    %279 = vector.extract_strided_slice %259 {offsets = [0, 0], sizes = [2, 1], strides = [1, 1]} : vector<2x6xf32> to vector<2x1xf32>
    %280 = vector.shape_cast %279 : vector<2x1xf32> to vector<2x1xf32>
    %281 = vector.broadcast %280 : vector<2x1xf32> to vector<2x64xf32>
    %282 = arith.select %274, %281, %272 : vector<2x64xi1>, vector<2x64xf32>
    %cst_160 = arith.constant 1.000000e+00 : f32
    %283 = vector.broadcast %cst_160 : f32 to vector<2x64xf32>
    %284 = arith.cmpf oeq, %270, %283 : vector<2x64xf32>
    %285 = vector.extract_strided_slice %257 {offsets = [0, 1], sizes = [2, 1], strides = [1, 1]} : vector<2x6xf32> to vector<2x1xf32>
    %286 = vector.shape_cast %285 : vector<2x1xf32> to vector<2x1xf32>
    %287 = vector.broadcast %286 : vector<2x1xf32> to vector<2x64xf32>
    %288 = arith.select %284, %287, %278 : vector<2x64xi1>, vector<2x64xf32>
    %289 = vector.extract_strided_slice %259 {offsets = [0, 1], sizes = [2, 1], strides = [1, 1]} : vector<2x6xf32> to vector<2x1xf32>
    %290 = vector.shape_cast %289 : vector<2x1xf32> to vector<2x1xf32>
    %291 = vector.broadcast %290 : vector<2x1xf32> to vector<2x64xf32>
    %292 = arith.select %284, %291, %282 : vector<2x64xi1>, vector<2x64xf32>
    %cst_161 = arith.constant 2.000000e+00 : f32
    %293 = vector.broadcast %cst_161 : f32 to vector<2x64xf32>
    %294 = arith.cmpf oeq, %270, %293 : vector<2x64xf32>
    %295 = vector.extract_strided_slice %257 {offsets = [0, 2], sizes = [2, 1], strides = [1, 1]} : vector<2x6xf32> to vector<2x1xf32>
    %296 = vector.shape_cast %295 : vector<2x1xf32> to vector<2x1xf32>
    %297 = vector.broadcast %296 : vector<2x1xf32> to vector<2x64xf32>
    %298 = arith.select %294, %297, %288 : vector<2x64xi1>, vector<2x64xf32>
    %299 = vector.extract_strided_slice %259 {offsets = [0, 2], sizes = [2, 1], strides = [1, 1]} : vector<2x6xf32> to vector<2x1xf32>
    %300 = vector.shape_cast %299 : vector<2x1xf32> to vector<2x1xf32>
    %301 = vector.broadcast %300 : vector<2x1xf32> to vector<2x64xf32>
    %302 = arith.select %294, %301, %292 : vector<2x64xi1>, vector<2x64xf32>
    %cst_162 = arith.constant 3.000000e+00 : f32
    %303 = vector.broadcast %cst_162 : f32 to vector<2x64xf32>
    %304 = arith.cmpf oeq, %270, %303 : vector<2x64xf32>
    %305 = vector.extract_strided_slice %257 {offsets = [0, 3], sizes = [2, 1], strides = [1, 1]} : vector<2x6xf32> to vector<2x1xf32>
    %306 = vector.shape_cast %305 : vector<2x1xf32> to vector<2x1xf32>
    %307 = vector.broadcast %306 : vector<2x1xf32> to vector<2x64xf32>
    %308 = arith.select %304, %307, %298 : vector<2x64xi1>, vector<2x64xf32>
    %309 = vector.extract_strided_slice %259 {offsets = [0, 3], sizes = [2, 1], strides = [1, 1]} : vector<2x6xf32> to vector<2x1xf32>
    %310 = vector.shape_cast %309 : vector<2x1xf32> to vector<2x1xf32>
    %311 = vector.broadcast %310 : vector<2x1xf32> to vector<2x64xf32>
    %312 = arith.select %304, %311, %302 : vector<2x64xi1>, vector<2x64xf32>
    %cst_163 = arith.constant 4.000000e+00 : f32
    %313 = vector.broadcast %cst_163 : f32 to vector<2x64xf32>
    %314 = arith.cmpf oeq, %270, %313 : vector<2x64xf32>
    %315 = vector.extract_strided_slice %257 {offsets = [0, 4], sizes = [2, 1], strides = [1, 1]} : vector<2x6xf32> to vector<2x1xf32>
    %316 = vector.shape_cast %315 : vector<2x1xf32> to vector<2x1xf32>
    %317 = vector.broadcast %316 : vector<2x1xf32> to vector<2x64xf32>
    %318 = arith.select %314, %317, %308 : vector<2x64xi1>, vector<2x64xf32>
    %319 = vector.extract_strided_slice %259 {offsets = [0, 4], sizes = [2, 1], strides = [1, 1]} : vector<2x6xf32> to vector<2x1xf32>
    %320 = vector.shape_cast %319 : vector<2x1xf32> to vector<2x1xf32>
    %321 = vector.broadcast %320 : vector<2x1xf32> to vector<2x64xf32>
    %322 = arith.select %314, %321, %312 : vector<2x64xi1>, vector<2x64xf32>
    %cst_164 = arith.constant 5.000000e+00 : f32
    %323 = vector.broadcast %cst_164 : f32 to vector<2x64xf32>
    %324 = arith.cmpf oeq, %270, %323 : vector<2x64xf32>
    %325 = vector.extract_strided_slice %257 {offsets = [0, 5], sizes = [2, 1], strides = [1, 1]} : vector<2x6xf32> to vector<2x1xf32>
    %326 = vector.shape_cast %325 : vector<2x1xf32> to vector<2x1xf32>
    %327 = vector.broadcast %326 : vector<2x1xf32> to vector<2x64xf32>
    %328 = arith.select %324, %327, %318 : vector<2x64xi1>, vector<2x64xf32>
    %329 = vector.extract_strided_slice %259 {offsets = [0, 5], sizes = [2, 1], strides = [1, 1]} : vector<2x6xf32> to vector<2x1xf32>
    %330 = vector.shape_cast %329 : vector<2x1xf32> to vector<2x1xf32>
    %331 = vector.broadcast %330 : vector<2x1xf32> to vector<2x64xf32>
    %332 = arith.select %324, %331, %322 : vector<2x64xi1>, vector<2x64xf32>
    %cst_165 = arith.constant 1.000000e+00 : f32
    %333 = vector.broadcast %cst_165 : f32 to vector<2x64xf32>
    %334 = arith.mulf %328, %333 : vector<2x64xf32>
    %335 = math.exp %334 : vector<2x64xf32>
    %336 = math.absf %334 : vector<2x64xf32>
    %cst_166 = arith.constant 9.99999997E-7 : f32
    %337 = vector.broadcast %cst_166 : f32 to vector<2x64xf32>
    %338 = arith.cmpf olt, %336, %337 : vector<2x64xf32>
    %cst_167 = arith.constant 1.000000e+00 : f32
    %339 = vector.broadcast %cst_167 : f32 to vector<2x64xf32>
    %340 = arith.subf %335, %339 : vector<2x64xf32>
    %cst_168 = arith.constant 1.000000e+00 : f32
    %341 = vector.broadcast %cst_168 : f32 to vector<2x64xf32>
    %342 = arith.select %338, %341, %328 : vector<2x64xi1>, vector<2x64xf32>
    %343 = arith.divf %340, %342 : vector<2x64xf32>
    %cst_169 = arith.constant 1.000000e+00 : f32
    %344 = vector.broadcast %cst_169 : f32 to vector<2x64xf32>
    %345 = arith.select %338, %344, %343 : vector<2x64xi1>, vector<2x64xf32>
    %346 = arith.mulf %263, %335 : vector<2x64xf32>
    %347 = arith.mulf %332, %345 : vector<2x64xf32>
    %348 = arith.addf %346, %347 : vector<2x64xf32>
    %cst_170 = arith.constant 0.000000e+00 : f32
    %cst_171 = arith.constant 1.000000e+00 : f32
    %349 = vector.broadcast %cst_170 : f32 to vector<2x64xf32>
    %350 = arith.maximumf %349, %348 : vector<2x64xf32>
    %351 = vector.broadcast %cst_171 : f32 to vector<2x64xf32>
    %352 = arith.minimumf %351, %350 : vector<2x64xf32>
    %cst_172 = arith.constant 6.300000e+01 : f32
    %353 = vector.broadcast %cst_172 : f32 to vector<2x64xf32>
    %354 = arith.mulf %352, %353 : vector<2x64xf32>
    %355 = tpu.iota {dimensions = array<i32: 1>} : vector<2x64x64xi32>
    %356 = arith.sitofp %355 : vector<2x64x64xi32> to vector<2x64x64xf32>
    %357 = vector.shape_cast %354 : vector<2x64xf32> to vector<2x1x64xf32>
    %358 = vector.broadcast %357 : vector<2x1x64xf32> to vector<2x64x64xf32>
    %359 = arith.subf %358, %356 : vector<2x64x64xf32>
    %360 = math.absf %359 : vector<2x64x64xf32>
    %cst_173 = arith.constant 1.000000e+00 : f32
    %361 = vector.broadcast %cst_173 : f32 to vector<2x64x64xf32>
    %362 = arith.subf %361, %360 : vector<2x64x64xf32>
    %cst_174 = arith.constant 0.000000e+00 : f32
    %363 = vector.broadcast %cst_174 : f32 to vector<2x64x64xf32>
    %364 = arith.maximumf %363, %362 : vector<2x64x64xf32>
    %365 = tpu.iota {dimensions = array<i32: 2>} : vector<2x64x64xi32>
    %366 = arith.sitofp %365 : vector<2x64x64xi32> to vector<2x64x64xf32>
    %367 = vector.shape_cast %354 : vector<2x64xf32> to vector<2x64x1xf32>
    %368 = vector.broadcast %367 : vector<2x64x1xf32> to vector<2x64x64xf32>
    %369 = arith.subf %368, %366 : vector<2x64x64xf32>
    %370 = math.absf %369 : vector<2x64x64xf32>
    %cst_175 = arith.constant 1.000000e+00 : f32
    %371 = vector.broadcast %cst_175 : f32 to vector<2x64x64xf32>
    %372 = arith.subf %371, %370 : vector<2x64x64xf32>
    %cst_176 = arith.constant 0.000000e+00 : f32
    %373 = vector.broadcast %cst_176 : f32 to vector<2x64x64xf32>
    %374 = arith.maximumf %373, %372 : vector<2x64x64xf32>
    %375 = vector.extract_strided_slice %364 {offsets = [0, 0, 0], sizes = [1, 64, 64], strides = [1, 1, 1]} : vector<2x64x64xf32> to vector<1x64x64xf32>
    %376 = vector.shape_cast %375 : vector<1x64x64xf32> to vector<64x64xf32>
    %377 = vector.extract_strided_slice %374 {offsets = [0, 0, 0], sizes = [1, 64, 64], strides = [1, 1, 1]} : vector<2x64x64xf32> to vector<1x64x64xf32>
    %378 = vector.shape_cast %377 : vector<1x64x64xf32> to vector<64x64xf32>
    %c0_177 = arith.constant 0 : index
    %c0_178 = arith.constant 0 : index
    %c0_179 = arith.constant 0 : index
    %379 = vector.load %arg27[%c0_177, %c0_178, %c0_179] : memref<2x2x64xf32, #tpu.memory_space<vmem>>, vector<1x2x64xf32>
    %380 = vector.shape_cast %379 : vector<1x2x64xf32> to vector<2x64xf32>
    %cst_180 = arith.constant dense<0.000000e+00> : vector<2x64xf32>
    %381 = tpu.matmul %380, %376, %cst_180 {dimension_numbers = #tpu.dot_dimension_numbers<[1], [0], [0], [1], [0, 0, 1, 1], [], []>} : vector<2x64xf32>, vector<64x64xf32>, vector<2x64xf32> -> vector<2x64xf32>
    %382 = vector.extract_strided_slice %3 {offsets = [0, 0], sizes = [64, 2], strides = [1, 1]} : vector<128x2xf32> to vector<64x2xf32>
    %cst_181 = arith.constant dense<0.000000e+00> : vector<64x2xf32>
    %383 = tpu.matmul %378, %382, %cst_181 {dimension_numbers = #tpu.dot_dimension_numbers<[1], [0], [0], [1], [0, 0, 1, 1], [], []>} : vector<64x64xf32>, vector<64x2xf32>, vector<64x2xf32> -> vector<64x2xf32>
    %c0_182 = arith.constant 0 : index
    %c0_183 = arith.constant 0 : index
    %c0_184 = arith.constant 0 : index
    %384 = vector.load %arg27[%c0_182, %c0_183, %c0_184] : memref<2x2x64xf32, #tpu.memory_space<vmem>>, vector<1x2x64xf32>
    %385 = vector.shape_cast %384 : vector<1x2x64xf32> to vector<2x64xf32>
    %386 = vector.shape_cast %381 : vector<2x64xf32> to vector<1x2x64xf32>
    tpu.vector_store %arg27[%c0_182, %c0_183, %c0_184], %386 {strides = array<i32>} : memref<2x2x64xf32, #tpu.memory_space<vmem>>, vector<1x2x64xf32>,
    %c0_185 = arith.constant 0 : index
    %c0_186 = arith.constant 0 : index
    %387 = vector.load %arg26[%c0_185, %c0_186] : memref<128x2xf32, #tpu.memory_space<vmem>>, vector<64x2xf32>
    tpu.vector_store %arg26[%c0_185, %c0_186], %383 {strides = array<i32>} : memref<128x2xf32, #tpu.memory_space<vmem>>, vector<64x2xf32>,
    %c0_187 = arith.constant 0 : index
    %c0_188 = arith.constant 0 : index
    %c0_189 = arith.constant 0 : index
    %388 = vector.load %arg25[%c0_187, %c0_188, %c0_189] : memref<2x2x64xf32, #tpu.memory_space<vmem>>, vector<1x2x64xf32>
    %389 = vector.shape_cast %388 : vector<1x2x64xf32> to vector<2x64xf32>
    %390 = vector.shape_cast %381 : vector<2x64xf32> to vector<1x2x64xf32>
    tpu.vector_store %arg25[%c0_187, %c0_188, %c0_189], %390 {strides = array<i32>} : memref<2x2x64xf32, #tpu.memory_space<vmem>>, vector<1x2x64xf32>,
    %391 = vector.extract_strided_slice %364 {offsets = [1, 0, 0], sizes = [1, 64, 64], strides = [1, 1, 1]} : vector<2x64x64xf32> to vector<1x64x64xf32>
    %392 = vector.shape_cast %391 : vector<1x64x64xf32> to vector<64x64xf32>
    %393 = vector.extract_strided_slice %374 {offsets = [1, 0, 0], sizes = [1, 64, 64], strides = [1, 1, 1]} : vector<2x64x64xf32> to vector<1x64x64xf32>
    %394 = vector.shape_cast %393 : vector<1x64x64xf32> to vector<64x64xf32>
    %c1_190 = arith.constant 1 : index
    %c0_191 = arith.constant 0 : index
    %c0_192 = arith.constant 0 : index
    %395 = vector.load %arg27[%c1_190, %c0_191, %c0_192] : memref<2x2x64xf32, #tpu.memory_space<vmem>>, vector<1x2x64xf32>
    %396 = vector.shape_cast %395 : vector<1x2x64xf32> to vector<2x64xf32>
    %cst_193 = arith.constant dense<0.000000e+00> : vector<2x64xf32>
    %397 = tpu.matmul %396, %392, %cst_193 {dimension_numbers = #tpu.dot_dimension_numbers<[1], [0], [0], [1], [0, 0, 1, 1], [], []>} : vector<2x64xf32>, vector<64x64xf32>, vector<2x64xf32> -> vector<2x64xf32>
    %398 = vector.extract_strided_slice %3 {offsets = [64, 0], sizes = [64, 2], strides = [1, 1]} : vector<128x2xf32> to vector<64x2xf32>
    %cst_194 = arith.constant dense<0.000000e+00> : vector<64x2xf32>
    %399 = tpu.matmul %394, %398, %cst_194 {dimension_numbers = #tpu.dot_dimension_numbers<[1], [0], [0], [1], [0, 0, 1, 1], [], []>} : vector<64x64xf32>, vector<64x2xf32>, vector<64x2xf32> -> vector<64x2xf32>
    %c1_195 = arith.constant 1 : index
    %c0_196 = arith.constant 0 : index
    %c0_197 = arith.constant 0 : index
    %400 = vector.load %arg27[%c1_195, %c0_196, %c0_197] : memref<2x2x64xf32, #tpu.memory_space<vmem>>, vector<1x2x64xf32>
    %401 = vector.shape_cast %400 : vector<1x2x64xf32> to vector<2x64xf32>
    %402 = vector.shape_cast %397 : vector<2x64xf32> to vector<1x2x64xf32>
    tpu.vector_store %arg27[%c1_195, %c0_196, %c0_197], %402 {strides = array<i32>} : memref<2x2x64xf32, #tpu.memory_space<vmem>>, vector<1x2x64xf32>,
    %c64_198 = arith.constant 64 : index
    %c0_199 = arith.constant 0 : index
    %403 = vector.load %arg26[%c64_198, %c0_199] : memref<128x2xf32, #tpu.memory_space<vmem>>, vector<64x2xf32>
    tpu.vector_store %arg26[%c64_198, %c0_199], %399 {strides = array<i32>} : memref<128x2xf32, #tpu.memory_space<vmem>>, vector<64x2xf32>,
    %c1_200 = arith.constant 1 : index
    %c0_201 = arith.constant 0 : index
    %c0_202 = arith.constant 0 : index
    %404 = vector.load %arg25[%c1_200, %c0_201, %c0_202] : memref<2x2x64xf32, #tpu.memory_space<vmem>>, vector<1x2x64xf32>
    %405 = vector.shape_cast %404 : vector<1x2x64xf32> to vector<2x64xf32>
    %406 = vector.shape_cast %397 : vector<2x64xf32> to vector<1x2x64xf32>
    tpu.vector_store %arg25[%c1_200, %c0_201, %c0_202], %406 {strides = array<i32>} : memref<2x2x64xf32, #tpu.memory_space<vmem>>, vector<1x2x64xf32>,
    return
  }
  func.func @transform_0(%arg0: i32) -> (i32, i32, i32) {
    %c0_i32 = arith.constant 0 : i32
    %c0_i32_0 = arith.constant 0 : i32
    %c0_i32_1 = arith.constant 0 : i32
    %c0_i32_2 = arith.constant 0 : i32
    return %c0_i32, %c0_i32_0, %c0_i32_1 : i32, i32, i32
  }
  func.func @transform_1(%arg0: i32) -> (i32, i32) {
    %c0_i32 = arith.constant 0 : i32
    %c0_i32_0 = arith.constant 0 : i32
    %c0_i32_1 = arith.constant 0 : i32
    return %c0_i32, %c0_i32_0 : i32, i32
  }
  func.func @transform_2(%arg0: i32) -> (i32, i32, i32) {
    %c0_i32 = arith.constant 0 : i32
    %c0_i32_0 = arith.constant 0 : i32
    %c0_i32_1 = arith.constant 0 : i32
    %c0_i32_2 = arith.constant 0 : i32
    return %c0_i32, %c0_i32_0, %c0_i32_1 : i32, i32, i32
  }
  func.func @transform_3(%arg0: i32) -> (i32, i32) {
    %c0_i32 = arith.constant 0 : i32
    %c0_i32_0 = arith.constant 0 : i32
    %c0_i32_1 = arith.constant 0 : i32
    return %c0_i32, %c0_i32_0 : i32, i32
  }
  func.func @transform_4(%arg0: i32) -> (i32, i32) {
    %c0_i32 = arith.constant 0 : i32
    %c0_i32_0 = arith.constant 0 : i32
    %c0_i32_1 = arith.constant 0 : i32
    return %c0_i32, %c0_i32_0 : i32, i32
  }
  func.func @transform_5(%arg0: i32) -> (i32, i32) {
    %c0_i32 = arith.constant 0 : i32
    %c0_i32_0 = arith.constant 0 : i32
    %c0_i32_1 = arith.constant 0 : i32
    return %c0_i32, %c0_i32_0 : i32, i32
  }
  func.func @transform_6(%arg0: i32) -> (i32, i32) {
    %c0_i32 = arith.constant 0 : i32
    %c0_i32_0 = arith.constant 0 : i32
    %c0_i32_1 = arith.constant 0 : i32
    return %c0_i32, %c0_i32_0 : i32, i32
  }
  func.func @transform_7(%arg0: i32) -> (i32, i32) {
    %c0_i32 = arith.constant 0 : i32
    %c0_i32_0 = arith.constant 0 : i32
    %c0_i32_1 = arith.constant 0 : i32
    return %c0_i32, %c0_i32_0 : i32, i32
  }
  func.func @transform_8(%arg0: i32) -> (i32, i32) {
    %c0_i32 = arith.constant 0 : i32
    %c0_i32_0 = arith.constant 0 : i32
    %c0_i32_1 = arith.constant 0 : i32
    return %c0_i32, %c0_i32_0 : i32, i32
  }
  func.func @transform_9(%arg0: i32) -> (i32, i32) {
    %c0_i32 = arith.constant 0 : i32
    %c0_i32_0 = arith.constant 0 : i32
    %c0_i32_1 = arith.constant 0 : i32
    return %c0_i32, %c0_i32_0 : i32, i32
  }
  func.func @transform_10(%arg0: i32) -> (i32, i32, i32) {
    %c0_i32 = arith.constant 0 : i32
    %c0_i32_0 = arith.constant 0 : i32
    %c0_i32_1 = arith.constant 0 : i32
    %c0_i32_2 = arith.constant 0 : i32
    return %c0_i32, %c0_i32_0, %c0_i32_1 : i32, i32, i32
  }
  func.func @transform_11(%arg0: i32) -> (i32, i32) {
    %c0_i32 = arith.constant 0 : i32
    %c0_i32_0 = arith.constant 0 : i32
    %c0_i32_1 = arith.constant 0 : i32
    return %c0_i32, %c0_i32_0 : i32, i32
  }
  func.func @transform_12(%arg0: i32) -> (i32, i32) {
    %c0_i32 = arith.constant 0 : i32
    %c0_i32_0 = arith.constant 0 : i32
    %c0_i32_1 = arith.constant 0 : i32
    return %c0_i32, %c0_i32_0 : i32, i32
  }
  func.func @transform_13(%arg0: i32) -> (i32, i32) {
    %c0_i32 = arith.constant 0 : i32
    %c0_i32_0 = arith.constant 0 : i32
    %c0_i32_1 = arith.constant 0 : i32
    return %c0_i32, %c0_i32_0 : i32, i32
  }
  func.func @transform_14(%arg0: i32) -> (i32, i32, i32) {
    %c0_i32 = arith.constant 0 : i32
    %c0_i32_0 = arith.constant 0 : i32
    %c0_i32_1 = arith.constant 0 : i32
    %c0_i32_2 = arith.constant 0 : i32
    return %c0_i32, %c0_i32_0, %c0_i32_1 : i32, i32, i32
  }
  func.func @transform_15(%arg0: i32) -> (i32, i32) {
    %c0_i32 = arith.constant 0 : i32
    %c0_i32_0 = arith.constant 0 : i32
    %c0_i32_1 = arith.constant 0 : i32
    return %c0_i32, %c0_i32_0 : i32, i32
  }
  func.func @transform_16(%arg0: i32) -> (i32, i32) {
    %c0_i32 = arith.constant 0 : i32
    %c0_i32_0 = arith.constant 0 : i32
    %c0_i32_1 = arith.constant 0 : i32
    return %c0_i32, %c0_i32_0 : i32, i32
  }
  func.func @transform_17(%arg0: i32) -> (i32, i32) {
    %c0_i32 = arith.constant 0 : i32
    %c0_i32_0 = arith.constant 0 : i32
    %c0_i32_1 = arith.constant 0 : i32
    return %c0_i32, %c0_i32_0 : i32, i32
  }
  func.func @transform_18(%arg0: i32) -> (i32, i32) {
    %c0_i32 = arith.constant 0 : i32
    %c0_i32_0 = arith.constant 0 : i32
    %c0_i32_1 = arith.constant 0 : i32
    return %c0_i32, %c0_i32_0 : i32, i32
  }
  func.func @transform_19(%arg0: i32) -> (i32, i32) {
    %c0_i32 = arith.constant 0 : i32
    %c0_i32_0 = arith.constant 0 : i32
    %c0_i32_1 = arith.constant 0 : i32
    return %c0_i32, %c0_i32_0 : i32, i32
  }
  func.func @transform_20(%arg0: i32) -> (i32, i32) {
    %c0_i32 = arith.constant 0 : i32
    %c0_i32_0 = arith.constant 0 : i32
    %c0_i32_1 = arith.constant 0 : i32
    return %c0_i32, %c0_i32_0 : i32, i32
  }
  func.func @transform_21(%arg0: i32) -> (i32, i32) {
    %c0_i32 = arith.constant 0 : i32
    %c0_i32_0 = arith.constant 0 : i32
    %c0_i32_1 = arith.constant 0 : i32
    return %c0_i32, %c0_i32_0 : i32, i32
  }
  func.func @transform_22(%arg0: i32) -> (i32, i32) {
    %c0_i32 = arith.constant 0 : i32
    %c0_i32_0 = arith.constant 0 : i32
    %c0_i32_1 = arith.constant 0 : i32
    return %c0_i32, %c0_i32_0 : i32, i32
  }
  func.func @transform_23(%arg0: i32) -> (i32, i32) {
    %c0_i32 = arith.constant 0 : i32
    %c0_i32_0 = arith.constant 0 : i32
    %c0_i32_1 = arith.constant 0 : i32
    return %c0_i32, %c0_i32_0 : i32, i32
  }
  func.func @transform_24(%arg0: i32) -> (i32, i32, i32) {
    %c0_i32 = arith.constant 0 : i32
    %c0_i32_0 = arith.constant 0 : i32
    %c0_i32_1 = arith.constant 0 : i32
    %c0_i32_2 = arith.constant 0 : i32
    return %c0_i32, %c0_i32_0, %c0_i32_1 : i32, i32, i32
  }
}

</mosaic_0001>

<bundles_post_ra>
// kernel: tpu_custom_call.1
= control target key start
LH: loop header
LB: loop body
LE: loop exit
PB: predicated region body
PF: predicated region fallthrough
CT: control target
= control target key end

     0   :  { %s5466_s0 = inlined_call_operand.vmem [shape: f32[2,2,64], index: 0, kind: input, shape index: {}]   ;;  %s5467_s1 = inlined_call_operand.vmem [shape: f32[128,2], index: 1, kind: input, shape index: {}]   ;;  %s5468_s2 = inlined_call_operand.vmem [shape: f32[3,2,128], index: 2, kind: input, shape index: {}]   ;;  %s5469_s3 = inlined_call_operand.vmem [shape: f32[1,128], index: 3, kind: input, shape index: {}]   ;;  %s5470_s4 = inlined_call_operand.vmem [shape: f32[1,128], index: 4, kind: input, shape index: {}]   ;;  %s5471_s5 = inlined_call_operand.vmem [shape: f32[1,128], index: 5, kind: input, shape index: {}]   ;;  %s5472_s6 = inlined_call_operand.vmem [shape: f32[640,64], index: 6, kind: input, shape index: {}]   ;;  %s5473_s7 = inlined_call_operand.vmem [shape: f32[1,64], index: 7, kind: input, shape index: {}]   ;;  %s5474_s8 = inlined_call_operand.vmem [shape: f32[1,64], index: 8, kind: input, shape index: {}]   ;;  %s5475_s9 = inlined_call_operand.vmem [shape: f32[1,64], index: 9, kind: input, shape index: {}]   ;;  %s5476_s10 = inlined_call_operand.vmem [shape: f32[3,64,64], index: 10, kind: input, shape index: {}]   ;;  %s5477_s11 = inlined_call_operand.vmem [shape: f32[1,64], index: 11, kind: input, shape index: {}]   ;;  %s5478_s12 = inlined_call_operand.vmem [shape: f32[1,64], index: 12, kind: input, shape index: {}]   ;;  %s5479_s13 = inlined_call_operand.vmem [shape: f32[1,64], index: 13, kind: input, shape index: {}]   ;;  %s5480_s14 = inlined_call_operand.vmem [shape: f32[2,64,48], index: 14, kind: input, shape index: {}]   ;;  %s5481_s15 = inlined_call_operand.vmem [shape: f32[1,48], index: 15, kind: input, shape index: {}]   ;;  %s5482_s16 = inlined_call_operand.vmem [shape: f32[48,32], index: 16, kind: input, shape index: {}]   ;;  %s5483_s17 = inlined_call_operand.vmem [shape: f32[1,32], index: 17, kind: input, shape index: {}]   ;;  %s5484_s18 = inlined_call_operand.vmem [shape: f32[32,16], index: 18, kind: input, shape index: {}]   ;;  %s5485_s19 = inlined_call_operand.vmem [shape: f32[1,16], index: 19, kind: input, shape index: {}]   ;;  %s5486_s20 = inlined_call_operand.vmem [shape: f32[16,5], index: 20, kind: input, shape index: {}]   ;;  %s5487_s21 = inlined_call_operand.vmem [shape: f32[1,5], index: 21, kind: input, shape index: {}]   ;;  %s5488_s22 = inlined_call_operand.vmem [shape: f32[5,6], index: 22, kind: input, shape index: {}]   ;;  %s5489_s23 = inlined_call_operand.vmem [shape: f32[5,6], index: 23, kind: input, shape index: {}]   ;;  %s5490_s24 = inlined_call_operand.hbm [shape: f32[2,2,64], index: 24, kind: output, shape index: {}]  }
   0x1   :  { %5546 = sst [smem:[#allocation40_spill]] %s5466_s0 }
   0x2   :  { %5547 = sst [smem:[#allocation41_spill]] %s5467_s1 }
   0x3   :  { %5548 = sst [smem:[#allocation42_spill]] %s5468_s2 }
   0x4   :  { %5549 = sst [smem:[#allocation43_spill]] %s5469_s3 }
   0x5   :  { %5550 = sst [smem:[#allocation44_spill]] %s5470_s4 }
   0x6   :  { %5551 = sst [smem:[#allocation45_spill]] %s5471_s5 }
   0x7   :  { %5552 = sst [smem:[#allocation46_spill]] %s5472_s6 }
   0x8   :  { %5553 = sst [smem:[#allocation47_spill]] %s5473_s7 }
   0x9   :  { %5554 = sst [smem:[#allocation48_spill]] %s5474_s8 }
   0xa   :  { %29 = vsyncpa [#allocation11], 0  ;;  %s3729_s5 = smov 0  }
   0xb LB: > { %s5545_s26 = sadd.s32 4294967295, %s3592_s5   ;;  %p3341_p0 = scmp.ge.s32.totalorder %s3592_s5, 1  ;;  %s3592_s5 = sphi %s3729_s5, %s35_s5  }
   0xc   : > { %p648_p1 = scmp.lt.s32.totalorder %s3592_s5, 3 }
   0xe   : > { %p649_p2 = pnand %p3341_p0, %p648_p1 }
  0x10   : > { %652 = sbr.rel (%p649_p2) target bundleno = 2294 (0x8f6), region = 116 }
  0x15   : > { %p3342_p3 = scmp.ne.s32.totalorder %s5545_s26, 0 }
  0x16   : > { %s5555_s6 = sld [smem:[#allocation41_spill]] (!%p3342_p3) }
  0x17   : > { %707 = sbr.rel (%p3342_p3) target bundleno = 47 (0x2f), region = 120  ;;  %s5556_s4 = sld [smem:[#allocation40_spill]] (!%p3342_p3) }
  0x1c   : > { %v708_v0 = vld [vmem:[%s5555_s6] sm:$0xff]  ;;  %vm724_vm0 = vcmask 15360   ;;  %v709_v1 = vld [vmem:[%s5555_s6 + $0x8] sm:$0xff]  ;;  %v710_v2 = vld [vmem:[%s5555_s6 + $0x10] sm:$0xff]  ;;  %vm743_vm1 = vcmask 517120  }
  0x1d   : > { %725 = vst.msk [vmem:[#allocation2] sm:$0xff] %vm724_vm0, %v708_v0  ;;  %v711_v3 = vld [vmem:[%s5555_s6 + $0x18] sm:$0xff]  ;;  %v712_v4 = vld [vmem:[%s5555_s6 + $0x20] sm:$0xff]  ;;  %v713_v5 = vld [vmem:[%s5555_s6 + $0x28] sm:$0xff] }
  0x1e   : > { %726 = vst.msk [vmem:[#allocation2 + $0x8] sm:$0xff] %vm724_vm0, %v709_v1  ;;  %v714_v6 = vld [vmem:[%s5555_s6 + $0x30] sm:$0xff]  ;;  %v715_v7 = vld [vmem:[%s5555_s6 + $0x38] sm:$0xff]  ;;  %v716_v8 = vld [vmem:[%s5555_s6 + $0x40] sm:$0xff] }
  0x1f   : > { %727 = vst.msk [vmem:[#allocation2 + $0x10] sm:$0xff] %vm724_vm0, %v710_v2  ;;  %v717_v9 = vld [vmem:[%s5555_s6 + $0x48] sm:$0xff]  ;;  %v718_v10 = vld [vmem:[%s5555_s6 + $0x50] sm:$0xff]  ;;  %v719_v11 = vld [vmem:[%s5555_s6 + $0x58] sm:$0xff] }
  0x20   : > { %728 = vst.msk [vmem:[#allocation2 + $0x18] sm:$0xff] %vm724_vm0, %v711_v3  ;;  %v720_v12 = vld [vmem:[%s5555_s6 + $0x60] sm:$0xff]  ;;  %v721_v13 = vld [vmem:[%s5555_s6 + $0x68] sm:$0xff]  ;;  %v722_v14 = vld [vmem:[%s5555_s6 + $0x70] sm:$0xff] }
  0x21   : > { %729 = vst.msk [vmem:[#allocation2 + $0x20] sm:$0xff] %vm724_vm0, %v712_v4  ;;  %v723_v15 = vld [vmem:[%s5555_s6 + $0x78] sm:$0xff]  ;;  %v741_v16 = vld [vmem:[%s5556_s4] sm:$0x3]  ;;  %v742_v17 = vld [vmem:[%s5556_s4 + $0x2] sm:$0x3] }
  0x22   : > { %730 = vst.msk [vmem:[#allocation2 + $0x28] sm:$0xff] %vm724_vm0, %v713_v5 }
  0x23   : > { %731 = vst.msk [vmem:[#allocation2 + $0x30] sm:$0xff] %vm724_vm0, %v714_v6 }
  0x24   : > { %732 = vst.msk [vmem:[#allocation2 + $0x38] sm:$0xff] %vm724_vm0, %v715_v7 }
  0x25   : > { %733 = vst.msk [vmem:[#allocation2 + $0x40] sm:$0xff] %vm724_vm0, %v716_v8 }
  0x26   : > { %734 = vst.msk [vmem:[#allocation2 + $0x48] sm:$0xff] %vm724_vm0, %v717_v9 }
  0x27   : > { %735 = vst.msk [vmem:[#allocation2 + $0x50] sm:$0xff] %vm724_vm0, %v718_v10 }
  0x28   : > { %736 = vst.msk [vmem:[#allocation2 + $0x58] sm:$0xff] %vm724_vm0, %v719_v11 }
  0x29   : > { %737 = vst.msk [vmem:[#allocation2 + $0x60] sm:$0xff] %vm724_vm0, %v720_v12 }
  0x2a   : > { %738 = vst.msk [vmem:[#allocation2 + $0x68] sm:$0xff] %vm724_vm0, %v721_v13 }
  0x2b   : > { %739 = vst.msk [vmem:[#allocation2 + $0x70] sm:$0xff] %vm724_vm0, %v722_v14 }
  0x2c   : > { %740 = vst.msk [vmem:[#allocation2 + $0x78] sm:$0xff] %vm724_vm0, %v723_v15 }
  0x2d   : > { %744 = vst.msk [vmem:[#allocation3] sm:$0x3] %vm743_vm1, %v741_v16 }
  0x2e   : > { %745 = vst.msk [vmem:[#allocation3 + $0x2] sm:$0x3] %vm743_vm1, %v742_v17 }
  0x2f PF: > { %s5557_s29 = sld [smem:[#allocation42_spill]]  ;;  %vm846_vm2 = vcmask 1041408   ;;  %v3812_v19 = vld [vmem:[#allocation2] sm:$0xff]  ;;  %vm813_vm3 = vcmask 15360   ;;  %v3814_v20 = vld [vmem:[#allocation2 + $0x8] sm:$0xff]  ;;  %vm781_vm4 = vcmask 1046528  }
  0x30   : > { %v782_v23 = vrot.slane %v3812_v19, 1  ;;  %v783_v24 = vrot.slane %v3814_v20, 1  ;;  %v3828_v25 = vld [vmem:[#allocation2 + $0x10] sm:$0xff]  ;;  %v3830_v26 = vld [vmem:[#allocation2 + $0x20] sm:$0xff]  ;;  %v751_v27 = vld [vmem:[#allocation2 + $0x28] sm:$0xff]  ;;  %vm1017_vm5 = vcmask 1045504  }
  0x31   : > { %v1025_v28 = vrot.slane %v3830_v26, 2  ;;  %v752_v29 = vld [vmem:[#allocation2 + $0x30] sm:$0xff]  ;;  %v785_v31 = vrot.slane %v3828_v25, 1  ;;  %v1027_v32 = vrot.slane %v751_v27, 2  ;;  %v3846_v36 = vld [vmem:[#allocation2 + $0x18] sm:$0xff]  ;;  %v754_v43 = vld [vmem:[#allocation2 + $0x40] sm:$0xff] }
  0x32   : > { %v784_v30 = vsel %vm781_vm4, %v782_v23, %v783_v24  ;;  %v1029_v33 = vrot.slane %v752_v29, 2  ;;  %v753_v38 = vld [vmem:[#allocation2 + $0x38] sm:$0xff]  ;;  %v787_v39 = vrot.slane %v3846_v36, 1  ;;  %v789_v44 = vrot.slane %v3830_v26, 1  ;;  %v755_v48 = vld [vmem:[#allocation2 + $0x48] sm:$0xff]  ;;  %v756_v53 = vld [vmem:[#allocation2 + $0x50] sm:$0xff] }
  0x33   : > { %v1028_v34 = vsel %vm1017_vm5, %v1025_v28, %v1027_v32  ;;  %v786_v35 = vsel %vm781_vm4, %v783_v24, %v785_v31  ;;  %v1031_v40 = vrot.slane %v753_v38, 2  ;;  %v1033_v45 = vrot.slane %v754_v43, 2  ;;  %v757_v58 = vld [vmem:[#allocation2 + $0x58] sm:$0xff]  ;;  %v758_v63 = vld [vmem:[#allocation2 + $0x60] sm:$0xff]  ;;  %v759_v2 = vld [vmem:[#allocation2 + $0x68] sm:$0xff]  ;;  %s5586_s1 = sld [smem:[#allocation43_spill]] }
  0x34   : > { %v1030_v37 = vsel %vm1017_vm5, %v1027_v32, %v1029_v33  ;;  %v788_v41 = vsel %vm781_vm4, %v785_v31, %v787_v39  ;;  %v790_v46 = vsel %vm781_vm4, %v787_v39, %v789_v44  ;;  %v791_v49 = vrot.slane %v751_v27, 1  ;;  %v760_v10 = vld [vmem:[#allocation2 + $0x70] sm:$0xff]  ;;  %v761_v17 = vld [vmem:[#allocation2 + $0x78] sm:$0xff]  ;;  %s5605_s2 = sld [smem:[#allocation46_spill]]  ;;  %s3601_s28 = smov [#allocation10]  }
  0x35   : > { %v762_v18 = vld [vmem:[%s5557_s29] sm:$0x3]  ;;  %v3378_v21 = vld [vmem:[%s5557_s29 + $0x4] sm:$0x3]  ;;  %v3343_v22 = vld [vmem:[%s5557_s29 + $0x2] sm:$0x3]  ;;  %v1032_v42 = vsel %vm1017_vm5, %v1029_v33, %v1031_v40  ;;  %v1034_v47 = vsel %vm1017_vm5, %v1031_v40, %v1033_v45 }
  0x36   : > { %3361 = vmatpush.msk.msra.mxu1 %vm846_vm2, %v762_v18  ;;  %3344 = vmatpush.msk.msra.mxu0 %vm846_vm2, %v3343_v22  ;;  %v1035_v50 = vrot.slane %v755_v48, 2  ;;  %v792_v51 = vsel %vm781_vm4, %v789_v44, %v791_v49  ;;  %v793_v54 = vrot.slane %v752_v29, 1  ;;  %v1037_v55 = vrot.slane %v756_v53, 2  ;;  %s5606_s25 = sld [smem:[#allocation44_spill]]  ;;  %s3306_s0 = sshll.u32 %s3601_s28, 4  ;;  %s3307_s0 = int_to_ptr.vmem [resolvable:$true] %s3306_s0 }
  0x37   : > { %3362 = vmatmul.msk.f32.vlgmr.msra.gmra.mxu1 %vm813_vm3, %v3812_v19  ;;  %3459 = vmatpush.msk.msra.mxu2 %vm846_vm2, %v3378_v21  ;;  %v795_v59 = vrot.slane %v753_v38, 1  ;;  %v1039_v60 = vrot.slane %v757_v58, 2  ;;  %v797_v0 = vrot.slane %v754_v43, 1  ;;  %v1041_v1 = vrot.slane %v758_v63, 2  ;;  %s5607_s7 = sld [smem:[#allocation45_spill]]  ;;  %s3308_s26 = sshll.u32 %s5490_s24, 4  ;;  %s3309_s26 = int_to_ptr.hbm [resolvable:$true] %s3308_s26 }
  0x38   : > { %3379 = vmatpush.msk.msrb.mxu1 %vm846_vm2, %v3378_v21  ;;  %3458 = vmatpush.msk.msra.mxu3 %vm846_vm2, %v3343_v22  ;;  %v1036_v52 = vsel %vm1017_vm5, %v1033_v45, %v1035_v50  ;;  %v794_v56 = vsel %vm781_vm4, %v791_v49, %v793_v54  ;;  %v1038_v57 = vsel %vm1017_vm5, %v1035_v50, %v1037_v55  ;;  %v805_v4 = vrot.slane %v758_v63, 1  ;;  %s5644_s3 = sadd.s32 4294967295, %s3592_s5   ;;  %s3602_s8 = smov 32  }
  0x39   : > { %3345 = vmatmul.msk.f32.vlgmr.msra.gmra.mxu0 %vm813_vm3, %v784_v30  ;;  %3384 = vmatmul.msk.f32.vlgmr.msra.gmra.mxu2 %vm813_vm3, %v1028_v34  ;;  %v796_v61 = vsel %vm781_vm4, %v793_v54, %v795_v59  ;;  %v1040_v62 = vsel %vm1017_vm5, %v1037_v55, %v1039_v60  ;;  %v798_v3 = vsel %vm781_vm4, %v795_v59, %v797_v0  ;;  %v807_v5 = vrot.slane %v759_v2, 1  ;;  %p5449_p4 = scmp.eq.s32.totalorder %s5644_s3, 1 }
  0x3a   : > { %v1042_v6 = vsel %vm1017_vm5, %v1039_v60, %v1041_v1  ;;  %v799_v8 = vrot.slane %v755_v48, 1  ;;  %v1043_v9 = vrot.slane %v759_v2, 2  ;;  %v809_v12 = vrot.slane %v760_v10, 1 }
  0x3b   : > { %v808_v7 = vsel %vm781_vm4, %v805_v4, %v807_v5  ;;  %v801_v15 = vrot.slane %v756_v53, 1  ;;  %v1045_v16 = vrot.slane %v760_v10, 2  ;;  %v811_v21 = vrot.slane %v761_v17, 1 }
  0x3c   : > { %3357 = vmatmul.msk.f32.vlgmr.msra.gmra.mxu3 %vm813_vm3, %v808_v7  ;;  %v800_v11 = vsel %vm781_vm4, %v797_v0, %v799_v8  ;;  %v1044_v13 = vsel %vm1017_vm5, %v1041_v1, %v1043_v9  ;;  %v810_v14 = vsel %vm781_vm4, %v807_v5, %v809_v12  ;;  %v803_v24 = vrot.slane %v757_v58, 1 }
  0x3d   : > { %v802_v18 = vsel %vm781_vm4, %v799_v8, %v801_v15  ;;  %v1046_v22 = vsel %vm1017_vm5, %v1043_v9, %v1045_v16  ;;  %v812_v23 = vsel %vm781_vm4, %v809_v12, %v811_v21  ;;  %v1018_v32 = vrot.slane %v3812_v19, 2 }
  0x3e   : > { %v806_v31 = vsel %vm781_vm4, %v803_v24, %v805_v4  ;;  %v1019_v33 = vrot.slane %v3814_v20, 2  ;;  %v1023_v40 = vrot.slane %v3846_v36, 2 }
  0x3f   : > { %3363 = vmatmul.msk.f32.gmra.mxu1 %vm813_vm3, %v3814_v20 }
  0x41   : > { %3346 = vmatmul.msk.f32.gmra.mxu0 %vm813_vm3, %v786_v35  ;;  %3385 = vmatmul.msk.f32.gmra.mxu2 %vm813_vm3, %v1030_v37  ;;  %v1020_v35 = vsel %vm1017_vm5, %v1018_v32, %v1019_v33  ;;  %v1021_v37 = vrot.slane %v3828_v25, 2 }
  0x43   : > { %v1022_v39 = vsel %vm1017_vm5, %v1019_v33, %v1021_v37  ;;  %v1024_v19 = vsel %vm1017_vm5, %v1021_v37, %v1023_v40 }
  0x44   : > { %3358 = vmatmul.msk.f32.gmra.mxu3 %vm813_vm3, %v810_v14 }
  0x47   : > { %3364 = vmatmul.msk.f32.gmra.mxu1 %vm813_vm3, %v3828_v25  ;;  %v1026_v25 = vsel %vm1017_vm5, %v1023_v40, %v1025_v28 }
  0x49   : > { %3347 = vmatmul.msk.f32.gmra.mxu0 %vm813_vm3, %v788_v41  ;;  %3386 = vmatmul.msk.f32.gmra.mxu2 %vm813_vm3, %v1032_v42 }
  0x4c   : > { %3359 = vmatmul.msk.f32.gmra.mxu3 %vm813_vm3, %v812_v23 }
  0x4f   : > { %3365 = vmatmul.msk.f32.gmra.mxu1 %vm813_vm3, %v3846_v36 }
  0x51   : > { %3348 = vmatmul.msk.f32.gmra.mxu0 %vm813_vm3, %v790_v46  ;;  %3387 = vmatmul.msk.f32.gmra.mxu2 %vm813_vm3, %v1034_v47 }
  0x54   : > { %3360 = vmatmul.msk.f32.gmra.mxu3 %vm813_vm3, %v811_v21 }
  0x57   : > { %3366 = vmatmul.msk.f32.gmra.mxu1 %vm813_vm3, %v3830_v26 }
  0x59   : > { %3349 = vmatmul.msk.f32.gmra.mxu0 %vm813_vm3, %v792_v51  ;;  %3388 = vmatmul.msk.f32.gmra.mxu2 %vm813_vm3, %v1036_v52 }
  0x5f   : > { %3367 = vmatmul.msk.f32.gmra.mxu1 %vm813_vm3, %v751_v27  ;;  %v1047_v27 = vrot.slane %v761_v17, 2 }
  0x61   : > { %3350 = vmatmul.msk.f32.gmra.mxu0 %vm813_vm3, %v794_v56  ;;  %3389 = vmatmul.msk.f32.gmra.mxu2 %vm813_vm3, %v1038_v57  ;;  %v1048_v30 = vsel %vm1017_vm5, %v1045_v16, %v1047_v27  ;;  %v5495_v56 = vlaneseq }
  0x63   : > { %v3979_v60 = vshrl.u32 %v5495_v56, 7 }
  0x65   : > { %5558 = vst [vmem:[#allocation13_spill] sm:$0xff] %v3979_v60  ;;  %v4003_v5 = vadd.s32 56, %v3979_v60  ;;  %v4027_v16 = vadd.s32 8, %v3979_v60  ;;  %v4034_v23 = vadd.s32 16, %v3979_v60 }
  0x67   : > { %3368 = vmatmul.msk.f32.gmra.mxu1 %vm813_vm3, %v752_v29  ;;  %v804_v29 = vsel %vm781_vm4, %v801_v15, %v803_v24  ;;  %5564 = vst [vmem:[#allocation19_spill] sm:$0xff] %v4003_v5  ;;  %v4046_v37 = vcvt.s32.f32 %v4034_v23 }
  0x68   : > { %5571 = vst [vmem:[#allocation26_spill] sm:$0xff] %v4027_v16 }
  0x69   : > { %3351 = vmatmul.msk.f32.gmra.mxu0 %vm813_vm3, %v796_v61  ;;  %3390 = vmatmul.msk.f32.gmra.mxu2 %vm813_vm3, %v1040_v62  ;;  %v3982_v61 = vadd.s32 32, %v3979_v60  ;;  %5572 = vst [vmem:[#allocation27_spill] sm:$0xff] %v4034_v23 }
  0x6a   : > { %5575 = vst [vmem:[#allocation30_spill] sm:$0xff] %v4046_v37 }
  0x6b   : > { %5559 = vst [vmem:[#allocation14_spill] sm:$0xff] %v3982_v61  ;;  %v3992_v1 = vcvt.s32.f32 %v3982_v61 }
  0x6d   : > { %5561 = vst [vmem:[#allocation16_spill] sm:$0xff] %v3992_v1  ;;  %v4007_v7 = vadd.f32 0.5, %v3992_v1 }
  0x6f   : > { %3369 = vmatmul.msk.f32.gmra.mxu1 %vm813_vm3, %v753_v38  ;;  %5565 = vst [vmem:[#allocation20_spill] sm:$0xff] %v4007_v7 }
  0x71   : > { %3352 = vmatmul.msk.f32.gmra.mxu0 %vm813_vm3, %v798_v3  ;;  %3391 = vmatmul.msk.f32.gmra.mxu2 %vm813_vm3, %v1042_v6  ;;  %v3997_v3 = vadd.s32 48, %v3979_v60  ;;  %v1194_v6 = vadd.s32 64, %v3979_v60 }
  0x73   : > { %5562 = vst [vmem:[#allocation17_spill] sm:$0xff] %v3997_v3  ;;  %v4012_v9 = vcvt.s32.f32 %v3997_v3  ;;  %v1210_v12 = vcvt.s32.f32 %v1194_v6  ;;  %v4063_v3 = vadd.f32 0.5, %v4046_v37 }
  0x75   : > { %5567 = vst [vmem:[#allocation22_spill] sm:$0xff] %v4012_v9  ;;  %v4022_v14 = vadd.f32 0.5, %v4012_v9 }
  0x76   : > { %5579 = vst [vmem:[#allocation34_spill] sm:$0xff] %v4063_v3 }
  0x77   : > { %3370 = vmatmul.msk.f32.gmra.mxu1 %vm813_vm3, %v754_v43  ;;  %5570 = vst [vmem:[#allocation25_spill] sm:$0xff] %v4022_v14 }
  0x79   : > { %3353 = vmatmul.msk.f32.gmra.mxu0 %vm813_vm3, %v800_v11  ;;  %3392 = vmatmul.msk.f32.gmra.mxu2 %vm813_vm3, %v1044_v13  ;;  %v4018_v11 = vcvt.s32.f32 %v4003_v5  ;;  %v1238_v13 = vmul.f32 0.015625, %v4007_v7 }
  0x7b   : > { %5569 = vst [vmem:[#allocation24_spill] sm:$0xff] %v4018_v11  ;;  %v1225_v21 = vadd.f32 0.5, %v4018_v11  ;;  %v1254_v24 = vfloor.f32 %v1238_v13 }
  0x7d   : > { %v1241_v32 = vmul.f32 0.015625, %v1225_v21  ;;  %v1270_v40 = vmul.f32 64.0, %v1254_v24 }
  0x7f   : > { %3371 = vmatmul.msk.f32.gmra.mxu1 %vm813_vm3, %v755_v48  ;;  %v1257_v13 = vfloor.f32 %v1241_v32 }
  0x81   : > { %3354 = vmatmul.msk.f32.gmra.mxu0 %vm813_vm3, %v802_v18  ;;  %3393 = vmatmul.msk.f32.gmra.mxu2 %vm813_vm3, %v1046_v22  ;;  %v1226_v22 = vadd.f32 0.5, %v1210_v12 }
  0x83   : > { %v1242_v33 = vmul.f32 0.015625, %v1226_v22 }
  0x85   : > { %v1258_v21 = vfloor.f32 %v1242_v33 }
  0x87   : > { %3372 = vmatmul.msk.f32.gmra.mxu1 %vm813_vm3, %v756_v53 }
  0x89   : > { %3355 = vmatmul.msk.f32.gmra.mxu0 %vm813_vm3, %v804_v29  ;;  %3394 = vmatmul.msk.f32.gmra.mxu2 %vm813_vm3, %v1048_v30  ;;  %v1240_v29 = vmul.f32 0.015625, %v4022_v14  ;;  %v4040_v30 = vcvt.s32.f32 %v4027_v16  ;;  %v1274_v16 = vmul.f32 64.0, %v1258_v21 }
  0x8b   : > { %5573 = vst [vmem:[#allocation28_spill] sm:$0xff] %v4040_v30  ;;  %v1290_v7 = vsub.f32 %v1210_v12, %v1274_v16  ;;  %v4109_v12 = vld [vmem:[%s5586_s1] ss:$0 sm:$0xff]  ;;  %s5631_s1 = sld [smem:[#allocation48_spill]] }
  0x8d   : > { %vm1306_vm10 = vcmp.lt.f32.partialorder %v1290_v7, 62.0 }
  0x8f   : > { %3373 = vmatmul.msk.f32.gmra.mxu1 %vm813_vm3, %v757_v58 }
  0x91   : > { %3356 = vmatmul.msk.f32.gmra.mxu0 %vm813_vm3, %v806_v31  ;;  %3395 = vmatmul.msk.f32.gmra.mxu2 %vm813_vm3, %v1047_v27 }
  0x97   : > { %3374 = vmatmul.msk.f32.gmra.mxu1 %vm813_vm3, %v758_v63  ;;  %v3987_v63 = vadd.s32 40, %v3979_v60 }
  0x99   : > { %5560 = vst [vmem:[#allocation15_spill] sm:$0xff] %v3987_v63  ;;  %v4000_v4 = vcvt.s32.f32 %v3987_v63  ;;  %v1273_v63 = vmul.f32 64.0, %v1257_v13 }
  0x9b   : > { %5563 = vst [vmem:[#allocation18_spill] sm:$0xff] %v4000_v4 }
  0x9f   : > { %3375 = vmatmul.msk.f32.gmra.mxu1 %vm813_vm3, %v759_v2 }
  0xa7   : > { %3376 = vmatmul.msk.f32.gmra.mxu1 %vm813_vm3, %v760_v10  ;;  %v4015_v10 = vadd.f32 0.5, %v4000_v4 }
  0xa9   : > { %5568 = vst [vmem:[#allocation23_spill] sm:$0xff] %v4015_v10 }
  0xaf   : > { %3377 = vmatmul.msk.f32.gmra.mxu1 %vm813_vm3, %v761_v17  ;;  %v1239_v17 = vmul.f32 0.015625, %v4015_v10 }
  0xb1   : > { %v1255_v31 = vfloor.f32 %v1239_v17  ;;  %v4055_v17 = vadd.s32 72, %v3979_v60 }
  0xb3   : > { %v1271_v6 = vmul.f32 64.0, %v1255_v31 }
  0xb4   : > { %v3918_v34 = vpop.f32.mrf.mxu1 }
  0xb5   : > { %v1287_v61 = vsub.f32 %v4000_v4, %v1271_v6  ;;  %v1289_v4 = vsub.f32 %v4018_v11, %v1273_v63 }
  0xb6   : > { %v3942_v44 = vpop.f32.mrf.mxu0 }
  0xb7   : > { %3380 = vmatmul.msk.f32.vlgmr.msrb.gmra.mxu1 %vm813_vm3, %v1020_v35  ;;  %v4043_v35 = vcvt.s32.f32 %v3979_v60  ;;  %vm4089_vm7 = vcmp.lt.f32.partialorder %v1287_v61, 62.0  ;;  %vm1305_vm9 = vcmp.lt.f32.partialorder %v1289_v4, 62.0  ;;  %v4131_v4 = vadd.s32 96, %v3979_v60 }
  0xb9   : > { %5574 = vst [vmem:[#allocation29_spill] sm:$0xff] %v4043_v35  ;;  %v4060_v56 = vadd.f32 0.5, %v4043_v35 }
  0xbb   : > { %5578 = vst [vmem:[#allocation33_spill] sm:$0xff] %v4060_v56  ;;  %v1234_v14 = vmul.f32 0.015625, %v4060_v56 }
  0xbc   : > { %v3923_v38 = vpop.f32.mrf.mxu1  ;;  %v3948_v46 = vpop.f32.mrf.mxu2 }
  0xbe   : > { %v3950_v47 = vpop.f32.mrf.mxu0 }
  0xbf   : > { %3381 = vmatmul.msk.f32.gmra.mxu1 %vm813_vm3, %v1022_v39  ;;  %v4049_v39 = vadd.s32 24, %v3979_v60  ;;  %v4087_v13 = vpop.f32.mrf.mxu3  ;;  %v971_v63 = vadd.f32 %v3923_v38, %v3950_v47 }
  0xc1   : > { %5576 = vst [vmem:[#allocation31_spill] sm:$0xff] %v4049_v39  ;;  %v4066_v24 = vcvt.s32.f32 %v4049_v39  ;;  %v1236_v39 = vmul.f32 0.015625, %v4063_v3  ;;  %v1250_v3 = vfloor.f32 %v1234_v14 }
  0xc3   : > { %5580 = vst [vmem:[#allocation35_spill] sm:$0xff] %v4066_v24  ;;  %v4079_v10 = vadd.f32 0.5, %v4066_v24  ;;  %v1266_v47 = vmul.f32 64.0, %v1250_v3 }
  0xc4   : > { %v3928_v41 = vpop.f32.mrf.mxu1  ;;  %v3954_v26 = vpop.f32.mrf.mxu2 }
  0xc5   : > { %5581 = vst [vmem:[#allocation36_spill] sm:$0xff] %v4079_v10  ;;  %v1237_v56 = vmul.f32 0.015625, %v4079_v10 }
  0xc6   : > { %v3956_v28 = vpop.f32.mrf.mxu0 }
  0xc7   : > { %3382 = vmatmul.msk.f32.gmra.mxu1 %vm813_vm3, %v1024_v19  ;;  %v1256_v19 = vfloor.f32 %v1240_v29  ;;  %v1286_v29 = vsub.f32 %v3992_v1, %v1270_v40  ;;  %v4082_v40 = vadd.s32 80, %v3979_v60  ;;  %v5584_v1 = vcvt.s32.f32 %v4055_v17  ;;  %v4149_v11 = vpop.f32.mrf.mxu3 }
  0xc9   : > { %v1272_v32 = vmul.f32 64.0, %v1256_v19  ;;  %vm1302_vm6 = vcmp.lt.f32.partialorder %v1286_v29, 62.0  ;;  %v1227_v29 = vadd.f32 0.5, %v5584_v1  ;;  %v5522_v61 = vcvt.s32.f32 %v4082_v40 }
  0xcb   : > { %v1288_v6 = vsub.f32 %v4012_v9, %v1272_v32  ;;  %v1243_v38 = vmul.f32 0.015625, %v1227_v29  ;;  %v1228_v21 = vadd.f32 0.5, %v5522_v61  ;;  %v4147_v61 = vadd.s32 104, %v3979_v60 }
  0xcc   : > { %v3932_v20 = vpop.f32.mrf.mxu1  ;;  %v3960_v50 = vpop.f32.mrf.mxu2 }
  0xcd   : > { %vm1304_vm8 = vcmp.lt.f32.partialorder %v1288_v6, 62.0  ;;  %v974_v6 = vadd.f32 %v3928_v41, %v3956_v28  ;;  %v1259_v3 = vfloor.f32 %v1243_v38  ;;  %v1244_v10 = vmul.f32 0.015625, %v1228_v21 }
  0xce   : > { %v3962_v51 = vpop.f32.mrf.mxu0  ;;  %v4157_v38 = vadd.s32 120, %v3979_v60 }
  0xcf   : > { %3383 = vmatmul.msk.f32.gmra.mxu1 %vm813_vm3, %v1026_v25  ;;  %v4052_v25 = vadd.f32 0.5, %v4040_v30  ;;  %v977_v29 = vadd.f32 %v3932_v20, %v3962_v51  ;;  %v1282_v20 = vsub.f32 %v4043_v35, %v1266_v47  ;;  %v1275_v47 = vmul.f32 64.0, %v1259_v3 }
  0xd1   : > { %5577 = vst [vmem:[#allocation32_spill] sm:$0xff] %v4052_v25  ;;  %v1235_v33 = vmul.f32 0.015625, %v4052_v25  ;;  %v1252_v25 = vfloor.f32 %v1236_v39  ;;  %vm1298_vm12 = vcmp.lt.f32.partialorder %v1282_v20, 62.0 }
  0xd3   : > { %v1251_v23 = vfloor.f32 %v1235_v33  ;;  %v1268_v39 = vmul.f32 64.0, %v1252_v25 }
  0xd4   : > { %v3938_v42 = vpop.f32.mrf.mxu1  ;;  %v3966_v53 = vpop.f32.mrf.mxu2 }
  0xd6   : > { %v3968_v54 = vpop.f32.mrf.mxu0 }
  0xd7   : > { %v980_v19 = vadd.f32 %v3938_v42, %v3968_v54  ;;  %v968_v42 = vadd.f32 %v3918_v34, %v3942_v44  ;;  %v5528_v54 = vmov 0.0   ;;  %v1267_v34 = vmul.f32 64.0, %v1251_v23 }
  0xd8   : > { %v4100_v32 = vsel %vm1302_vm6, 1.0, %v5528_v54  ;;  %v4116_v44 = vsel %vm4089_vm7, 1.0, %v5528_v54  ;;  %v4126_v23 = vsel %vm1304_vm8, 1.0, %v5528_v54  ;;  %v4143_v28 = vsel %vm1306_vm10, 1.0, %v5528_v54 }
  0xd9   : > { %5585 = vst [vmem:[#allocation37_spill] sm:$0xff] %v4100_v32  ;;  %v1153_v1 = vadd.f32 %v3948_v46, %v980_v19  ;;  %v4121_v46 = vadd.s32 88, %v3979_v60  ;;  %v1253_v19 = vfloor.f32 %v1237_v56  ;;  %v4139_v56 = vsel %vm1305_vm9, 1.0, %v5528_v54 }
  0xda   : > { %v1283_v41 = vsub.f32 %v4040_v30, %v1267_v34  ;;  %v5534_v54 = vcvt.s32.f32 %v4131_v4  ;;  %v4160_v30 = vadd.s32 112, %v3979_v60 }
  0xdb   : > { %v4136_v7 = vadd.f32 %v4109_v12, %v1153_v1  ;;  %v1284_v1 = vsub.f32 %v4046_v37, %v1268_v39  ;;  %v1269_v9 = vmul.f32 64.0, %v1253_v19 }
  0xdc   : > { %v3940_v43 = vpop.f32.mrf.mxu1  ;;  %v3974_v58 = vpop.f32.mrf.mxu2  ;;  %vm1299_vm11 = vcmp.lt.f32.partialorder %v1283_v41, 62.0  ;;  %v1230_v41 = vadd.f32 0.5, %v5534_v54 }
  0xdd   : > { %5587 = vst [vmem:[#allocation38_spill] sm:$0xff] %v4136_v7  ;;  %vm1300_vm13 = vcmp.lt.f32.partialorder %v1284_v1, 62.0 }
  0xde   : > { %v3976_v59 = vpop.f32.mrf.mxu0  ;;  %v1246_v20 = vmul.f32 0.015625, %v1230_v41 }
  0xdf   : > { %v983_v34 = vadd.f32 %v3940_v43, %v3976_v59  ;;  %v5588_v43 = vcvt.s32.f32 %v4121_v46 }
  0xe1   : > { %v1229_v59 = vadd.f32 0.5, %v5588_v43  ;;  %v1154_v39 = vadd.f32 %v3954_v26, %v983_v34  ;;  %v5592_v34 = vcvt.s32.f32 %v4055_v17 }
  0xe4   : > { %v3944_v36 = vpop.f32.mrf.mxu1  ;;  %v3989_v0 = vpop.f32.mrf.mxu2 }
  0xe6   : > { %v3994_v2 = vpop.f32.mrf.mxu0 }
  0xe7   : > { %v986_v26 = vadd.f32 %v3944_v36, %v3994_v2 }
  0xec   : > { %v3946_v45 = vpop.f32.mrf.mxu1  ;;  %v4024_v15 = vpop.f32.mrf.mxu2 }
  0xee   : > { %v4030_v18 = vpop.f32.mrf.mxu0 }
  0xf4   : > { %v3952_v48 = vpop.f32.mrf.mxu1  ;;  %v4057_v22 = vpop.f32.mrf.mxu2 }
  0xf6   : > { %v4069_v5 = vpop.f32.mrf.mxu0 }
  0xfc   : > { %v3958_v49 = vpop.f32.mrf.mxu1  ;;  %v4111_v14 = vpop.f32.mrf.mxu2 }
  0xfe   : > { %v4118_v16 = vpop.f32.mrf.mxu0 }
 0x104   : > { %v3964_v52 = vpop.f32.mrf.mxu1  ;;  %v4170_v19 = vpop.f32.mrf.mxu2 }
 0x10c   : > { %v3970_v55 = vpop.f32.mrf.mxu1 }
 0x114   : > { %v3972_v57 = vpop.f32.mrf.mxu1 }
 0x11c   : > { %v3984_v62 = vpop.f32.mrf.mxu1 }
 0x124   : > { %v4009_v8 = vpop.f32.mrf.mxu1 }
 0x125   : > { %5566 = vst [vmem:[#allocation21_spill] sm:$0xff] %v4009_v8 }
 0x12c   : > { %v4036_v27 = vpop.f32.mrf.mxu1 }
 0x134   : > { %v4071_v31 = vpop.f32.mrf.mxu1 }
 0x135   : > { %v1149_v8 = vadd.f32 %v4071_v31, %v968_v42  ;;  %v1285_v31 = vsub.f32 %v4066_v24, %v1269_v9  ;;  %v897_v42 = vpop.f32.mrf.mxu0  ;;  %v1245_v9 = vmul.f32 0.015625, %v1229_v59  ;;  %v989_v59 = vadd.f32 %v3946_v45, %v4030_v18 }
 0x136   : > { %v5593_v24 = vcvt.s32.f32 %v4157_v38  ;;  %v992_v45 = vadd.f32 %v3952_v48, %v4069_v5  ;;  %v4227_v48 = vadd.f32 %v4109_v12, %v1154_v39 }
 0x137   : > { %vm1301_vm14 = vcmp.lt.f32.partialorder %v1285_v31, 62.0  ;;  %v1261_v18 = vfloor.f32 %v1245_v9 }
 0x138   : > { %v1233_v37 = vadd.f32 0.5, %v5593_v24  ;;  %v1155_v24 = vadd.f32 %v3960_v50, %v986_v26  ;;  %v1157_v26 = vadd.f32 %v3974_v58, %v992_v45 }
 0x13c   : > { %v1104_v33 = vpop.f32.mrf.mxu1 }
 0x13d   : > { %v1150_v51 = vadd.f32 %v1104_v33, %v971_v63  ;;  %v4165_v63 = vmul.f32 %v4100_v32, %v4136_v7  ;;  %v909_v32 = vpop.f32.mrf.mxu3  ;;  %v5594_v7 = vcvt.s32.f32 %v4160_v30 }
 0x13f   : > { %v4173_v21 = vadd.f32 %v4109_v12, %v1150_v51  ;;  %v4185_v51 = vadd.f32 %v4109_v12, %v1149_v8  ;;  %v1291_v8 = vsub.f32 %v5592_v34, %v1275_v47  ;;  %v1232_v36 = vadd.f32 0.5, %v5594_v7 }
 0x140   : > { %v1156_v34 = vadd.f32 %v3966_v53, %v989_v59  ;;  %v900_v53 = vpop.f32.mrf.mxu0  ;;  %v1277_v59 = vmul.f32 64.0, %v1261_v18  ;;  %v4251_v18 = vadd.f32 %v4109_v12, %v1157_v26 }
 0x141   : > { %vm1307_vm15 = vcmp.lt.f32.partialorder %v1291_v8, 62.0  ;;  %v1248_v5 = vmul.f32 0.015625, %v1232_v36  ;;  %v1335_v36 = vmul.f32 %v4116_v44, %v4227_v48 }
 0x143   : > { %v1264_v45 = vfloor.f32 %v1248_v5 }
 0x144   : > { %v1107_v25 = vpop.f32.mrf.mxu1 }
 0x145   : > { %v1151_v33 = vadd.f32 %v1107_v25, %v974_v6  ;;  %v1260_v6 = vfloor.f32 %v1244_v10  ;;  %v5589_v25 = vmov 0.0   ;;  %v5590_v10 = vcvt.s32.f32 %v4147_v61 }
 0x146   : > { %v4180_v43 = vsel %vm1299_vm11, 1.0, %v5589_v25  ;;  %v4193_v54 = vsel %vm1298_vm12, 1.0, %v5589_v25  ;;  %v4196_v3 = vsel %vm1300_vm13, 1.0, %v5589_v25  ;;  %vm1764_vm12 = vcmask 1044480  }
 0x147   : > { %v4188_v1 = vadd.f32 %v4109_v12, %v1151_v33  ;;  %v1231_v60 = vadd.f32 0.5, %v5590_v10  ;;  %5591 = vst [vmem:[#allocation39_spill] sm:$0xff] %v4196_v3  ;;  %v1331_v33 = vmul.f32 %v4180_v43, %v4173_v21  ;;  %v1276_v10 = vmul.f32 64.0, %v1260_v6 }
 0x148   : > { %v1330_v2 = vmul.f32 %v4193_v54, %v4185_v51  ;;  %v4217_v6 = vsel %vm1301_vm14, 1.0, %v5589_v25  ;;  %vm1787_vm13 = vcmask 1043456  }
 0x149   : > { %v1332_v17 = vmul.f32 %v4196_v3, %v4188_v1  ;;  %v1247_v31 = vmul.f32 0.015625, %v1231_v60  ;;  %v1249_v3 = vmul.f32 0.015625, %v1233_v37  ;;  %v1143_v60 = vpop.f32.mrf.mxu2  ;;  %v4239_v37 = vsel %vm1307_vm15, 1.0, %v5589_v25 }
 0x14a   : > { %v1346_v41 = vadd.f32 %v1331_v33, %v1330_v2  ;;  %v5595_v33 = vcvt.s32.f32 %v4082_v40 }
 0x14c   : > { %v1110_v35 = vpop.f32.mrf.mxu1  ;;  %v1347_v9 = vadd.f32 %v1346_v41, %v1332_v17  ;;  %v1292_v2 = vsub.f32 %v5595_v33, %v1276_v10  ;;  %v1265_v10 = vfloor.f32 %v1249_v3  ;;  %v1001_v17 = vadd.f32 %v3970_v55, %v900_v53  ;;  %v912_v55 = vpop.f32.mrf.mxu3 }
 0x14d   : > { %v1152_v47 = vadd.f32 %v1110_v35, %v977_v29  ;;  %v995_v35 = vadd.f32 %v3958_v49, %v4118_v16  ;;  %v1262_v29 = vfloor.f32 %v1246_v20  ;;  %v4235_v49 = vadd.f32 %v4109_v12, %v1155_v24 }
 0x14e   : > { %v998_v16 = vadd.f32 %v3964_v52, %v897_v42  ;;  %v4243_v20 = vadd.f32 %v4109_v12, %v1156_v34  ;;  %vm1308_vm0 = vcmp.lt.f32.partialorder %v1292_v2, 62.0  ;;  %v5596_v52 = vcvt.s32.f32 %v4121_v46 }
 0x14f   : > { %v4221_v7 = vadd.f32 %v4109_v12, %v1152_v47  ;;  %v1263_v47 = vfloor.f32 %v1247_v31  ;;  %v1158_v58 = vadd.f32 %v3989_v0, %v995_v35  ;;  %v1278_v40 = vmul.f32 64.0, %v1262_v29 }
 0x150   : > { %v1293_v42 = vsub.f32 %v5596_v52, %v1277_v59  ;;  %v1336_v0 = vmul.f32 %v4126_v23, %v4235_v49  ;;  %v1159_v3 = vadd.f32 %v4024_v15, %v998_v16  ;;  %v1004_v24 = vadd.f32 %v3972_v57, %v4087_v13  ;;  %v5599_v59 = vld [vmem:[#allocation21_spill] sm:$0xff] }
 0x151   : > { %v1333_v50 = vmul.f32 %v4217_v6, %v4221_v7  ;;  %v1279_v31 = vmul.f32 64.0, %v1263_v47  ;;  %v4263_v34 = vadd.f32 %v4109_v12, %v1158_v58  ;;  %v5597_v46 = vcvt.s32.f32 %v4131_v4  ;;  %v1146_v47 = vpop.f32.mrf.mxu2 }
 0x152   : > { %v1281_v29 = vmul.f32 64.0, %v1265_v10  ;;  %v1160_v5 = vadd.f32 %v4057_v22, %v1001_v17  ;;  %v1007_v15 = vadd.f32 %v3984_v62, %v4149_v11  ;;  %v1338_v57 = vmul.f32 %v4143_v28, %v4251_v18 }
 0x153   : > { %v1348_v39 = vadd.f32 %v1347_v9, %v1333_v50  ;;  %v1294_v35 = vsub.f32 %v5597_v46, %v1278_v40  ;;  %v1280_v9 = vmul.f32 64.0, %v1264_v45  ;;  %vm1309_vm1 = vcmp.lt.f32.partialorder %v1293_v42, 62.0 }
 0x154   : > { %v5598_v13 = vcvt.s32.f32 %v4147_v61  ;;  %v1013_v33 = vadd.f32 %v4036_v27, %v912_v55  ;;  %v1179_v4 = vadd.f32 %v4109_v12, %v1159_v3  ;;  %v1161_v53 = vadd.f32 %v4111_v14, %v1004_v24 }
 0x155   : > { %v1349_v8 = vadd.f32 %v1348_v39, %v4165_v63  ;;  %v1337_v63 = vmul.f32 %v4139_v56, %v4243_v20  ;;  %v1010_v22 = vadd.f32 %v5599_v59, %v909_v32  ;;  %v1339_v62 = vmul.f32 %v4239_v37, %v4263_v34 }
 0x156   : > { %v1295_v26 = vsub.f32 %v5598_v13, %v1279_v31  ;;  %v4282_v11 = vsel %vm1308_vm0, 1.0, %v5589_v25  ;;  %vm1310_vm2 = vcmp.lt.f32.partialorder %v1294_v35, 62.0  ;;  %v5600_v61 = vcvt.s32.f32 %v4157_v38 }
 0x157   : > { %v1350_v41 = vadd.f32 %v1349_v8, %v1335_v36  ;;  %v1180_v27 = vadd.f32 %v4109_v12, %v1160_v5  ;;  %v1162_v58 = vadd.f32 %v4170_v19, %v1007_v15  ;;  %v5601_v14 = vcvt.s32.f32 %v4160_v30 }
 0x158   : > { %v1297_v39 = vsub.f32 %v5600_v61, %v1281_v29  ;;  %v4292_v10 = vsel %vm1309_vm1, 1.0, %v5589_v25  ;;  %vm1311_vm6 = vcmp.lt.f32.partialorder %v1295_v26, 62.0  ;;  %v1164_v2 = vadd.f32 %v1146_v47, %v1013_v33 }
 0x159   : > { %v1351_v50 = vadd.f32 %v1350_v41, %v1336_v0  ;;  %v1296_v32 = vsub.f32 %v5601_v14, %v1280_v9  ;;  %v1340_v36 = vmul.f32 %v4282_v11, %v1179_v4  ;;  %v1181_v17 = vadd.f32 %v4109_v12, %v1161_v53 }
 0x15a   : > { %v1163_v38 = vadd.f32 %v1143_v60, %v1010_v22  ;;  %v4297_v8 = vsel %vm1310_vm2, 1.0, %v5589_v25  ;;  %vm1313_vm7 = vcmp.lt.f32.partialorder %v1297_v39, 62.0  ;;  %v1341_v30 = vmul.f32 %v4292_v10, %v1180_v27 }
 0x15b   : > { %v1352_v16 = vadd.f32 %v1351_v50, %v1337_v63  ;;  %v1182_v19 = vadd.f32 %v4109_v12, %v1162_v58  ;;  %vm1312_vm8 = vcmp.lt.f32.partialorder %v1296_v32, 62.0  ;;  %v4302_v42 = vsel %vm1311_vm6, 1.0, %v5589_v25 }
 0x15c   : > { %v4305_v31 = vadd.f32 %v4109_v12, %v1164_v2  ;;  %v1342_v0 = vmul.f32 %v4297_v8, %v1181_v17  ;;  %v4309_v60 = vadd.f32 %v4109_v12, %v1163_v38  ;;  %v4312_v3 = vsel %vm1313_vm7, 1.0, %v5589_v25 }
 0x15d   : > { %v1353_v40 = vadd.f32 %v1352_v16, %v1338_v57  ;;  %v4315_v55 = vsel %vm1312_vm8, 1.0, %v5589_v25  ;;  %v1343_v41 = vmul.f32 %v4302_v42, %v1182_v19  ;;  %vm2133_vm0 = vcmask 523264  }
 0x15e   : > { %v1345_v46 = vmul.f32 %v4312_v3, %v4305_v31  ;;  %v1344_v35 = vmul.f32 %v4315_v55, %v4309_v60 }
 0x15f   : > { %v1354_v45 = vadd.f32 %v1353_v40, %v1339_v62 }
 0x160   : > { %v1360_v12 = vsel %vm1017_vm5, %v1345_v46, 0.0 }
 0x161   : > { %v1355_v52 = vadd.f32 %v1354_v45, %v1340_v36  ;;  %v5604_v36 = vld [vmem:[#allocation37_spill] sm:$0xff] }
 0x163   : > { %v1356_v24 = vadd.f32 %v1355_v52, %v1341_v30 }
 0x165   : > { %v1357_v63 = vadd.f32 %v1356_v24, %v1342_v0 }
 0x167   : > { %v1358_v29 = vadd.f32 %v1357_v63, %v1343_v41 }
 0x169   : > { %v1359_v5 = vadd.f32 %v1358_v29, %v1344_v35 }
 0x16b   : > { %v1361_v15 = vadd.f32 %v1360_v12, %v1359_v5 }
 0x16d   : > { %v1362_v9 = vrot.slane %v1361_v15, 4 }
 0x16f   : > { %v1363_v50 = vadd.f32 %v1362_v9, %v1361_v15 }
 0x171   : > { %v1364_v57 = vrot.slane %v1363_v50, 2 }
 0x173   : > { %v1365_v13 = vadd.f32 %v1364_v57, %v1363_v50 }
 0x175   : > { %v1366_v26 = vrot.slane %v1365_v13, 1 }
 0x177   : > { %v1367_v33 = vadd.f32 %v1366_v26, %v1365_v13 }
 0x179   : > { %v1368_v53 = vmul.f32 0.008064516, %v1367_v33 }
 0x17b   : > { %v4324_v59 = vsub.f32 %v4185_v51, %v1368_v53  ;;  %v4327_v22 = vsub.f32 %v4173_v21, %v1368_v53  ;;  %v4330_v47 = vsub.f32 %v4227_v48, %v1368_v53  ;;  %v4333_v16 = vsub.f32 %v4235_v49, %v1368_v53 }
 0x17c   : > { %v4336_v62 = vsub.f32 %v4243_v20, %v1368_v53  ;;  %v4339_v61 = vsub.f32 %v4251_v18, %v1368_v53  ;;  %v4342_v39 = vsub.f32 %v4263_v34, %v1368_v53  ;;  %v4344_v51 = vsub.f32 %v1179_v4, %v1368_v53  ;;  %v5602_v4 = vld [vmem:[#allocation38_spill] sm:$0xff] }
 0x17d   : > { %v4346_v58 = vsub.f32 %v1180_v27, %v1368_v53  ;;  %v4348_v21 = vsub.f32 %v1181_v17, %v1368_v53  ;;  %v4350_v48 = vsub.f32 %v1182_v19, %v1368_v53  ;;  %v4353_v49 = vsub.f32 %v4188_v1, %v1368_v53  ;;  %v5603_v27 = vld [vmem:[#allocation39_spill] sm:$0xff] }
 0x17e   : > { %v1385_v20 = vmul.f32 %v4324_v59, %v4193_v54  ;;  %v1386_v18 = vmul.f32 %v4327_v22, %v4180_v43  ;;  %v4360_v34 = vsub.f32 %v4221_v7, %v1368_v53  ;;  %v4363_v14 = vsub.f32 %v5602_v4, %v1368_v53 }
 0x17f   : > { %v1387_v32 = vmul.f32 %v4353_v49, %v5603_v27  ;;  %v1390_v43 = vmul.f32 %v4330_v47, %v4116_v44  ;;  %v1391_v30 = vmul.f32 %v4333_v16, %v4126_v23  ;;  %v1392_v0 = vmul.f32 %v4336_v62, %v4139_v56 }
 0x180   : > { %v1401_v40 = vmul.f32 %v1385_v20, %v1385_v20  ;;  %v1402_v2 = vmul.f32 %v1386_v18, %v1386_v18  ;;  %v1388_v1 = vmul.f32 %v4360_v34, %v4217_v6  ;;  %v1389_v54 = vmul.f32 %v4363_v14, %v5604_v36 }
 0x181   : > { %v1403_v17 = vmul.f32 %v1387_v32, %v1387_v32  ;;  %v1406_v24 = vmul.f32 %v1390_v43, %v1390_v43  ;;  %v1393_v41 = vmul.f32 %v4339_v61, %v4143_v28  ;;  %v1407_v63 = vmul.f32 %v1391_v30, %v1391_v30 }
 0x182   : > { %v1417_v38 = vadd.f32 %v1402_v2, %v1401_v40  ;;  %v1404_v7 = vmul.f32 %v1388_v1, %v1388_v1  ;;  %v1405_v19 = vmul.f32 %v1389_v54, %v1389_v54  ;;  %v1394_v44 = vmul.f32 %v4342_v39, %v4239_v37 }
 0x183   : > { %v1408_v35 = vmul.f32 %v1392_v0, %v1392_v0  ;;  %v1395_v23 = vmul.f32 %v4344_v51, %v4282_v11  ;;  %v1409_v5 = vmul.f32 %v1393_v41, %v1393_v41  ;;  %v1396_v56 = vmul.f32 %v4346_v58, %v4292_v10  ;;  %v1825_v0 = vld [vmem:[%s5605_s2 + $0x78] sm:$0xff] }
 0x184   : > { %v1418_v45 = vadd.f32 %v1417_v38, %v1403_v17  ;;  %v1410_v15 = vmul.f32 %v1394_v44, %v1394_v44  ;;  %v4386_v50 = vsub.f32 %v4305_v31, %v1368_v53  ;;  %v4389_v28 = vsub.f32 %v4309_v60, %v1368_v53  ;;  %1894 = vmatpush.msrb.mxu3 %v1825_v0  ;;  %v1870_v0 = vld [vmem:[%s5605_s2 + $0x1e0] sm:$0xff] }
 0x185   : > { %v1397_v37 = vmul.f32 %v4348_v21, %v4297_v8  ;;  %v1411_v57 = vmul.f32 %v1395_v23, %v1395_v23  ;;  %v1398_v11 = vmul.f32 %v4350_v48, %v4302_v42  ;;  %v1412_v26 = vmul.f32 %v1396_v56, %v1396_v56  ;;  %v1857_v23 = vld [vmem:[%s5605_s2 + $0x178] sm:$0xff] }
 0x186   : > { %v1419_v52 = vadd.f32 %v1418_v45, %v1404_v7  ;;  %v1400_v10 = vmul.f32 %v4386_v50, %v4312_v3  ;;  %v1399_v31 = vmul.f32 %v4389_v28, %v4315_v55  ;;  %1970 = vmatpush.msrb.mxu0 %v1857_v23 }
 0x187   : > { %v1413_v20 = vmul.f32 %v1397_v37, %v1397_v37  ;;  %v1414_v60 = vmul.f32 %v1398_v11, %v1398_v11  ;;  %v3515_v11 = vld [vmem:[%s5607_s7] ss:$0 sm:$0xff] }
 0x188   : > { %v1420_v6 = vadd.f32 %v1419_v52, %v1405_v19  ;;  %v1416_v4 = vmul.f32 %v1400_v10, %v1400_v10  ;;  %v1415_v27 = vmul.f32 %v1399_v31, %v1399_v31 }
 0x18a   : > { %v1421_v46 = vadd.f32 %v1420_v6, %v1406_v24  ;;  %v1431_v40 = vsel %vm1017_vm5, %v1416_v4, 0.0  ;;  %v1824_v6 = vld [vmem:[%s5605_s2 + $0x70] sm:$0xff] }
 0x18b   : > { %1895 = vmatpush.msrb.mxu3 %v1824_v6 }
 0x18c   : > { %v1422_v29 = vadd.f32 %v1421_v46, %v1407_v63 }
 0x18e   : > { %v1423_v12 = vadd.f32 %v1422_v29, %v1408_v35  ;;  %v3514_v35 = vld [vmem:[%s5606_s25] ss:$0 sm:$0xff]  ;;  %v1889_v29 = vld [vmem:[%s5605_s2 + $0x278] sm:$0xff]  ;;  %s5617_s25 = sld [smem:[#allocation47_spill]] }
 0x18f   : > { %2046 = vmatpush.msrb.mxu2 %v1889_v29 }
 0x190   : > { %v1424_v9 = vadd.f32 %v1423_v12, %v1409_v5  ;;  %v1823_v5 = vld [vmem:[%s5605_s2 + $0x68] sm:$0xff]  ;;  %v1873_v12 = vld [vmem:[%s5605_s2 + $0x1f8] sm:$0xff] }
 0x191   : > { %1896 = vmatpush.msrb.mxu3 %v1823_v5  ;;  %2008 = vmatpush.msra.mxu1 %v1873_v12 }
 0x192   : > { %v1425_v13 = vadd.f32 %v1424_v9, %v1410_v15 }
 0x194   : > { %v1426_v33 = vadd.f32 %v1425_v13, %v1411_v57 }
 0x196   : > { %v1427_v18 = vadd.f32 %v1426_v33, %v1412_v26  ;;  %v1872_v33 = vld [vmem:[%s5605_s2 + $0x1f0] sm:$0xff] }
 0x197   : > { %2009 = vmatpush.msra.mxu1 %v1872_v33 }
 0x198   : > { %v1428_v53 = vadd.f32 %v1427_v18, %v1413_v20 }
 0x19a   : > { %v1429_v8 = vadd.f32 %v1428_v53, %v1414_v60  ;;  %v1821_v60 = vld [vmem:[%s5605_s2 + $0x58] sm:$0xff] }
 0x19c   : > { %v1430_v32 = vadd.f32 %v1429_v8, %v1415_v27 }
 0x19e   : > { %v1432_v2 = vadd.f32 %v1431_v40, %v1430_v32  ;;  %v1855_v32 = vld [vmem:[%s5605_s2 + $0x168] sm:$0xff] }
 0x1a0   : > { %v1433_v42 = vrot.slane %v1432_v2, 4 }
 0x1a2   : > { %v1434_v1 = vadd.f32 %v1433_v42, %v1432_v2 }
 0x1a4   : > { %v1435_v36 = vrot.slane %v1434_v1, 2 }
 0x1a6   : > { %v1436_v54 = vadd.f32 %v1435_v36, %v1434_v1  ;;  %v1871_v36 = vld [vmem:[%s5605_s2 + $0x1e8] sm:$0xff] }
 0x1a7   : > { %2010 = vmatpush.msra.mxu1 %v1871_v36  ;;  %v1867_v36 = vld [vmem:[%s5605_s2 + $0x1c8] sm:$0xff] }
 0x1a8   : > { %v1437_v17 = vrot.slane %v1436_v54, 1 }
 0x1a9   : > { %2011 = vmatpush.msra.mxu1 %v1870_v0 }
 0x1aa   : > { %v1438_v3 = vadd.f32 %v1437_v17, %v1436_v54 }
 0x1ac   : > { %v1439_v38 = vmul.f32 0.008064516, %v1438_v3 }
 0x1ae   : > { %v1440_v43 = vadd.f32 1e-05, %v1439_v38 }
 0x1b0   : > { %3526 = vrsqrt.f32 %v1440_v43  ;;  %vm1447_vm10 = vweird.f32 %v1440_v43 }
 0x1b6   : > { %v3527_v55 = vpop.eup %3526 }
 0x1b7   : > { %v1442_v7 = vmul.f32 %v3527_v55, %v1440_v43  ;;  %vm1448_vm9 = vweird.f32 %v3527_v55  ;;  %v1887_v43 = vld [vmem:[%s5605_s2 + $0x268] sm:$0xff] }
 0x1b8   : > { %vm1449_vm11 = vmor %vm1447_vm10, %vm1448_vm9 }
 0x1b9   : > { %v1443_v45 = vmul.f32 %v3527_v55, %v1442_v7 }
 0x1bb   : > { %v1444_v30 = vmul.f32 0.5, %v1443_v45 }
 0x1bd   : > { %v1445_v19 = vsub.f32 1.5, %v1444_v30 }
 0x1bf   : > { %v1446_v52 = vmul.f32 %v3527_v55, %v1445_v19 }
 0x1c1   : > { %v1450_v24 = vsel %vm1449_vm11, %v3527_v55, %v1446_v52  ;;  %v1820_v55 = vld [vmem:[%s5605_s2 + $0x50] sm:$0xff]  ;;  %v1854_v52 = vld [vmem:[%s5605_s2 + $0x160] sm:$0xff] }
 0x1c2   : > { %v1451_v41 = vmul.f32 %v1450_v24, %v4324_v59  ;;  %v1452_v63 = vmul.f32 %v1450_v24, %v4327_v22  ;;  %v1453_v46 = vmul.f32 %v1450_v24, %v4353_v49  ;;  %v1454_v44 = vmul.f32 %v1450_v24, %v4360_v34 }
 0x1c3   : > { %v1455_v59 = vmul.f32 %v1450_v24, %v4363_v14  ;;  %v1456_v22 = vmul.f32 %v1450_v24, %v4330_v47  ;;  %v1457_v49 = vmul.f32 %v1450_v24, %v4333_v16  ;;  %v1458_v34 = vmul.f32 %v1450_v24, %v4336_v62  ;;  %v1888_v16 = vld [vmem:[%s5605_s2 + $0x270] sm:$0xff] }
 0x1c4   : > { %v1459_v56 = vmul.f32 %v1450_v24, %v4339_v61  ;;  %v1460_v15 = vmul.f32 %v1450_v24, %v4342_v39  ;;  %v1461_v14 = vmul.f32 %v1450_v24, %v4344_v51  ;;  %v1462_v47 = vmul.f32 %v1450_v24, %v4346_v58  ;;  %v1822_v61 = vld [vmem:[%s5605_s2 + $0x60] sm:$0xff]  ;;  %2047 = vmatpush.msrb.mxu2 %v1888_v16 }
 0x1c5   : > { %v1463_v62 = vmul.f32 %v1450_v24, %v4348_v21  ;;  %v1464_v9 = vmul.f32 %v1450_v24, %v4350_v48  ;;  %v1465_v37 = vmul.f32 %v1450_v24, %v4389_v28  ;;  %v1466_v57 = vmul.f32 %v1450_v24, %v4386_v50  ;;  %v1856_v21 = vld [vmem:[%s5605_s2 + $0x170] sm:$0xff]  ;;  %1897 = vmatpush.msrb.mxu3 %v1822_v61 }
 0x1c6   : > { %v1471_v39 = vmul.f32 %v3514_v35, %v1451_v41  ;;  %v1472_v51 = vmul.f32 %v3514_v35, %v1452_v63  ;;  %v1473_v58 = vmul.f32 %v3514_v35, %v1453_v46  ;;  %v1474_v13 = vmul.f32 %v3514_v35, %v1454_v44  ;;  %1971 = vmatpush.msrb.mxu0 %v1856_v21  ;;  %v1886_v46 = vld [vmem:[%s5605_s2 + $0x260] sm:$0xff]  ;;  %v1819_v44 = vld [vmem:[%s5605_s2 + $0x48] sm:$0xff] }
 0x1c7   : > { %v1475_v48 = vmul.f32 %v3514_v35, %v1455_v59  ;;  %v1476_v50 = vmul.f32 %v3514_v35, %v1456_v22  ;;  %v1477_v28 = vmul.f32 %v3514_v35, %v1457_v49  ;;  %v1478_v26 = vmul.f32 %v3514_v35, %v1458_v34  ;;  %1898 = vmatpush.msrb.mxu3 %v1821_v60  ;;  %v1853_v22 = vld [vmem:[%s5605_s2 + $0x158] sm:$0xff] }
 0x1c8   : > { %v1479_v10 = vmul.f32 %v3514_v35, %v1459_v56  ;;  %v1480_v31 = vmul.f32 %v3514_v35, %v1460_v15  ;;  %v1481_v20 = vmul.f32 %v3514_v35, %v1461_v14  ;;  %v1482_v18 = vmul.f32 %v3514_v35, %v1462_v47  ;;  %1972 = vmatpush.msrb.mxu0 %v1855_v32  ;;  %v1869_v56 = vld [vmem:[%s5605_s2 + $0x1d8] sm:$0xff] }
 0x1c9   : > { %v1483_v53 = vmul.f32 %v3514_v35, %v1463_v62  ;;  %v1484_v4 = vmul.f32 %v3514_v35, %v1464_v9  ;;  %v1485_v27 = vmul.f32 %v3514_v35, %v1465_v37  ;;  %v1486_v8 = vmul.f32 %v3514_v35, %v1466_v57  ;;  %2048 = vmatpush.msrb.mxu2 %v1887_v43  ;;  %v1885_v15 = vld [vmem:[%s5605_s2 + $0x258] sm:$0xff]  ;;  %v1818_v62 = vld [vmem:[%s5605_s2 + $0x40] sm:$0xff]  ;;  %v1852_v9 = vld [vmem:[%s5605_s2 + $0x150] sm:$0xff] }
 0x1ca   : > { %v4458_v40 = vadd.f32 %v3515_v11, %v1471_v39  ;;  %v4460_v2 = vadd.f32 %v3515_v11, %v1472_v51  ;;  %v4462_v42 = vadd.f32 %v3515_v11, %v1473_v58  ;;  %v4464_v1 = vadd.f32 %v3515_v11, %v1474_v13  ;;  %1899 = vmatpush.msrb.mxu3 %v1820_v55  ;;  %v1868_v51 = vld [vmem:[%s5605_s2 + $0x1d0] sm:$0xff] }
 0x1cb   : > { %v4469_v54 = vadd.f32 %v3515_v11, %v1475_v48  ;;  %v4471_v17 = vadd.f32 %v3515_v11, %v1476_v50  ;;  %v4473_v3 = vadd.f32 %v3515_v11, %v1477_v28  ;;  %v4475_v38 = vadd.f32 %v3515_v11, %v1478_v26  ;;  %1973 = vmatpush.msrb.mxu0 %v1854_v52  ;;  %v1884_v48 = vld [vmem:[%s5605_s2 + $0x250] sm:$0xff] }
 0x1cc   : > { %v4483_v7 = vadd.f32 %v3515_v11, %v1479_v10  ;;  %v4485_v45 = vadd.f32 %v3515_v11, %v1480_v31  ;;  %v4487_v30 = vadd.f32 %v3515_v11, %v1481_v20  ;;  %v4489_v19 = vadd.f32 %v3515_v11, %v1482_v18  ;;  %2049 = vmatpush.msrb.mxu2 %v1886_v46  ;;  %v1817_v10 = vld [vmem:[%s5605_s2 + $0x38] sm:$0xff]  ;;  %v1883_v46 = vld [vmem:[%s5605_s2 + $0x248] sm:$0xff] }
 0x1cd   : > { %v4497_v24 = vadd.f32 %v3515_v11, %v1483_v53  ;;  %v4499_v6 = vadd.f32 %v3515_v11, %v1484_v4  ;;  %v4501_v41 = vadd.f32 %v3515_v11, %v1485_v27  ;;  %v4503_v63 = vadd.f32 %v3515_v11, %v1486_v8  ;;  %1900 = vmatpush.msrb.mxu3 %v1819_v44  ;;  %v1851_v53 = vld [vmem:[%s5605_s2 + $0x148] sm:$0xff]  ;;  %v1816_v44 = vld [vmem:[%s5605_s2 + $0x30] sm:$0xff] }
 0x1ce   : > { %v1523_v35 = vrot.slane %v4458_v40, 1  ;;  %v1524_v29 = vrot.slane %v4460_v2, 1  ;;  %v1526_v23 = vrot.slane %v4462_v42, 1  ;;  %v1528_v59 = vrot.slane %v4464_v1, 1  ;;  %1974 = vmatpush.msrb.mxu0 %v1853_v22  ;;  %2012 = vmatpush.msra.mxu1 %v1869_v56  ;;  %v1850_v22 = vld [vmem:[%s5605_s2 + $0x140] sm:$0xff] }
 0x1cf   : > { %v1530_v49 = vrot.slane %v4469_v54, 1  ;;  %v1532_v34 = vrot.slane %v4471_v17, 1  ;;  %v1534_v5 = vrot.slane %v4473_v3, 1  ;;  %v1536_v12 = vrot.slane %v4475_v38, 1  ;;  %2050 = vmatpush.msrb.mxu2 %v1885_v15  ;;  %1901 = vmatpush.msrb.mxu3 %v1818_v62  ;;  %v1882_v15 = vld [vmem:[%s5605_s2 + $0x240] sm:$0xff] }
 0x1d0   : > { %v4529_v14 = vsel %vm781_vm4, %v1523_v35, %v1524_v29  ;;  %v4532_v47 = vsel %vm781_vm4, %v1524_v29, %v1526_v23  ;;  %v1538_v16 = vrot.slane %v4483_v7, 1  ;;  %v4542_v37 = vsel %vm781_vm4, %v1526_v23, %v1528_v59  ;;  %1975 = vmatpush.msrb.mxu0 %v1852_v9  ;;  %2013 = vmatpush.msra.mxu1 %v1868_v51 }
 0x1d1   : > { %v4545_v57 = vsel %vm781_vm4, %v1530_v49, %v1532_v34  ;;  %v4548_v61 = vsel %vm781_vm4, %v1532_v34, %v1534_v5  ;;  %v4551_v39 = vsel %vm781_vm4, %v1534_v5, %v1536_v12  ;;  %v1540_v13 = vrot.slane %v4485_v45, 1  ;;  %2051 = vmatpush.msrb.mxu2 %v1884_v48  ;;  %1902 = vmatpush.msrb.mxu3 %v1817_v10 }
 0x1d2   : > { %v4557_v58 = vsel %vm781_vm4, %v1536_v12, %v1538_v16  ;;  %v1542_v11 = vrot.slane %v4487_v30, 1  ;;  %v1544_v21 = vrot.slane %v4489_v19, 1  ;;  %v1546_v50 = vrot.slane %v4497_v24, 1  ;;  %1976 = vmatpush.msrb.mxu0 %v1851_v53  ;;  %2014 = vmatpush.msra.mxu1 %v1867_v36 }
 0x1d3   : > { %v1548_v28 = vrot.slane %v4499_v6, 1  ;;  %v1550_v26 = vrot.slane %v4501_v41, 1  ;;  %v5544_v33 = vrot.slane %v4503_v63, 1  ;;  %v4573_v31 = vsel %vm781_vm4, %v1528_v59, %v1530_v49  ;;  %v1866_v49 = vld [vmem:[%s5605_s2 + $0x1c0] sm:$0xff]  ;;  %2052 = vmatpush.msrb.mxu2 %v1883_v46  ;;  %1903 = vmatpush.msrb.mxu3 %v1816_v44 }
 0x1d4   : > { %v4576_v20 = vsel %vm781_vm4, %v1538_v16, %v1540_v13  ;;  %v4579_v18 = vsel %vm781_vm4, %v1540_v13, %v1542_v11  ;;  %v4582_v60 = vsel %vm781_vm4, %v1542_v11, %v1544_v21  ;;  %v4588_v4 = vsel %vm781_vm4, %v1544_v21, %v1546_v50  ;;  %v1815_v16 = vld [vmem:[%s5605_s2 + $0x28] sm:$0xff]  ;;  %v1849_v11 = vld [vmem:[%s5605_s2 + $0x138] sm:$0xff]  ;;  %1977 = vmatpush.msrb.mxu0 %v1850_v22  ;;  %v1814_v46 = vld [vmem:[%s5605_s2 + $0x20] sm:$0xff] }
 0x1d5   : > { %v4591_v27 = vsel %vm781_vm4, %v1546_v50, %v1548_v28  ;;  %v4594_v8 = vsel %vm781_vm4, %v1548_v28, %v1550_v26  ;;  %v4599_v32 = vsel %vm781_vm4, %v1550_v26, %v5544_v33  ;;  %v1570_v43 = vmax.f32 %v4458_v40, %v4529_v14  ;;  %2015 = vmatpush.msra.mxu1 %v1866_v49  ;;  %v1865_v26 = vld [vmem:[%s5605_s2 + $0x1b8] sm:$0xff] }
 0x1d6   : > { %v1571_v55 = vmax.f32 %v4460_v2, %v4532_v47  ;;  %v1572_v52 = vmax.f32 %v4462_v42, %v4542_v37  ;;  %v1574_v0 = vmax.f32 %v4469_v54, %v4545_v57  ;;  %v1575_v35 = vmax.f32 %v4471_v17, %v4548_v61  ;;  %2053 = vmatpush.msrb.mxu2 %v1882_v15  ;;  %v1848_v15 = vld [vmem:[%s5605_s2 + $0x130] sm:$0xff] }
 0x1d7   : > { %v1576_v29 = vmax.f32 %v4473_v3, %v4551_v39  ;;  %v1577_v23 = vmax.f32 %v4475_v38, %v4557_v58  ;;  %v1573_v62 = vmax.f32 %v4464_v1, %v4573_v31  ;;  %v1586_v13 = vrot.slane %v4458_v40, 2  ;;  %1904 = vmatpush.msrb.mxu3 %v1815_v16  ;;  %1978 = vmatpush.msrb.mxu0 %v1849_v11  ;;  %v1864_v16 = vld [vmem:[%s5605_s2 + $0x1b0] sm:$0xff]  ;;  %v1863_v40 = vld [vmem:[%s5605_s2 + $0x1a8] sm:$0xff] }
 0x1d8   : > { %v1587_v21 = vrot.slane %v4460_v2, 2  ;;  %v1589_v48 = vrot.slane %v4462_v42, 2  ;;  %v1591_v50 = vrot.slane %v4464_v1, 2  ;;  %v1593_v28 = vrot.slane %v4469_v54, 2  ;;  %v1881_v1 = vld [vmem:[%s5605_s2 + $0x238] sm:$0xff]  ;;  %2016 = vmatpush.msra.mxu1 %v1865_v26  ;;  %v1880_v11 = vld [vmem:[%s5605_s2 + $0x230] sm:$0xff] }
 0x1d9   : > { %v1595_v10 = vrot.slane %v4471_v17, 2  ;;  %v1597_v31 = vrot.slane %v4473_v3, 2  ;;  %v1599_v53 = vrot.slane %v4475_v38, 2  ;;  %v1601_v36 = vrot.slane %v4483_v7, 2  ;;  %2054 = vmatpush.msrb.mxu2 %v1881_v1  ;;  %1905 = vmatpush.msrb.mxu3 %v1814_v46  ;;  %v1847_v1 = vld [vmem:[%s5605_s2 + $0x128] sm:$0xff]  ;;  %v1812_v2 = vld [vmem:[%s5605_s2 + $0x10] sm:$0xff] }
 0x1da   : > { %v1588_v44 = vsel %vm1017_vm5, %v1586_v13, %v1587_v21  ;;  %v1590_v22 = vsel %vm1017_vm5, %v1587_v21, %v1589_v48  ;;  %v1592_v49 = vsel %vm1017_vm5, %v1589_v48, %v1591_v50  ;;  %v1594_v33 = vsel %vm1017_vm5, %v1591_v50, %v1593_v28  ;;  %1979 = vmatpush.msrb.mxu0 %v1848_v15  ;;  %v1846_v42 = vld [vmem:[%s5605_s2 + $0x120] sm:$0xff] }
 0x1db   : > { %v1596_v51 = vsel %vm1017_vm5, %v1593_v28, %v1595_v10  ;;  %v1598_v9 = vsel %vm1017_vm5, %v1595_v10, %v1597_v31  ;;  %v1600_v13 = vsel %vm1017_vm5, %v1597_v31, %v1599_v53  ;;  %v1602_v21 = vsel %vm1017_vm5, %v1599_v53, %v1601_v36  ;;  %v1813_v28 = vld [vmem:[%s5605_s2 + $0x18] sm:$0xff]  ;;  %2017 = vmatpush.msra.mxu1 %v1864_v16  ;;  %v1862_v3 = vld [vmem:[%s5605_s2 + $0x1a0] sm:$0xff] }
 0x1dc   : > { %v1603_v48 = vrot.slane %v4485_v45, 2  ;;  %v1605_v50 = vrot.slane %v4487_v30, 2  ;;  %v1607_v56 = vrot.slane %v4489_v19, 2  ;;  %v1609_v12 = vrot.slane %v4497_v24, 2  ;;  %2055 = vmatpush.msrb.mxu2 %v1880_v11  ;;  %1906 = vmatpush.msrb.mxu3 %v1813_v28  ;;  %v1878_v38 = vld [vmem:[%s5605_s2 + $0x220] sm:$0xff] }
 0x1dd   : > { %v1611_v26 = vrot.slane %v4499_v6, 2  ;;  %v1613_v10 = vrot.slane %v4501_v41, 2  ;;  %v1615_v31 = vrot.slane %v4503_v63, 2  ;;  %v1633_v53 = vmax.f32 %v1570_v43, %v1588_v44  ;;  %1980 = vmatpush.msrb.mxu0 %v1847_v1  ;;  %2018 = vmatpush.msra.mxu1 %v1863_v40  ;;  %v1858_v28 = vld [vmem:[%s5605_s2 + $0x180] sm:$0xff] }
 0x1de   : > { %v1604_v46 = vsel %vm1017_vm5, %v1601_v36, %v1603_v48  ;;  %v1606_v5 = vsel %vm1017_vm5, %v1603_v48, %v1605_v50  ;;  %v1608_v34 = vsel %vm1017_vm5, %v1605_v50, %v1607_v56  ;;  %v1610_v59 = vsel %vm1017_vm5, %v1607_v56, %v1609_v12  ;;  %v1879_v56 = vld [vmem:[%s5605_s2 + $0x228] sm:$0xff]  ;;  %1907 = vmatpush.msrb.mxu3 %v1812_v2  ;;  %v1840_v48 = vld [vmem:[%s5605_s2 + $0xf0] sm:$0xff] }
 0x1df   : > { %v1612_v14 = vsel %vm1017_vm5, %v1609_v12, %v1611_v26  ;;  %v1614_v43 = vsel %vm1017_vm5, %v1611_v26, %v1613_v10  ;;  %v1616_v44 = vsel %vm1017_vm5, %v1613_v10, %v1615_v31  ;;  %v1634_v36 = vmax.f32 %v1571_v55, %v1590_v22  ;;  %2056 = vmatpush.msrb.mxu2 %v1879_v56  ;;  %v1874_v26 = vld [vmem:[%s5605_s2 + $0x200] sm:$0xff] }
 0x1e0   : > { %v1635_v15 = vmax.f32 %v1572_v52, %v1592_v49  ;;  %v1636_v12 = vmax.f32 %v1573_v62, %v1594_v33  ;;  %v1637_v16 = vmax.f32 %v1574_v0, %v1596_v51  ;;  %v4733_v11 = vmax.f32 %v1575_v35, %v1598_v9  ;;  %1981 = vmatpush.msrb.mxu0 %v1846_v42  ;;  %v1859_v9 = vld [vmem:[%s5605_s2 + $0x188] sm:$0xff] }
 0x1e1   : > { %v4744_v47 = vmax.f32 %v1576_v29, %v1600_v13  ;;  %v4749_v54 = vmax.f32 %v1577_v23, %v1602_v21  ;;  %v5608_v17 = vmax.f32 %v4483_v7, %v4576_v20  ;;  %v5609_v57 = vmax.f32 %v4485_v45, %v4579_v18  ;;  %2019 = vmatpush.msra.mxu1 %v1862_v3  ;;  %v1860_v29 = vld [vmem:[%s5605_s2 + $0x190] sm:$0xff]  ;;  %v1875_v51 = vld [vmem:[%s5605_s2 + $0x208] sm:$0xff]  ;;  %v1842_v21 = vld [vmem:[%s5605_s2 + $0x100] sm:$0xff] }
 0x1e2   : > { %v5610_v39 = vmax.f32 %v4487_v30, %v4582_v60  ;;  %v5611_v58 = vmax.f32 %v4489_v19, %v4588_v4  ;;  %v5612_v33 = vmax.f32 %v4497_v24, %v4591_v27  ;;  %v5613_v18 = vmax.f32 %v4499_v6, %v4594_v8  ;;  %v1811_v30 = vld [vmem:[%s5605_s2 + $0x8] sm:$0xff]  ;;  %v1845_v19 = vld [vmem:[%s5605_s2 + $0x118] sm:$0xff]  ;;  %2057 = vmatpush.msrb.mxu2 %v1878_v38  ;;  %v1876_v23 = vld [vmem:[%s5605_s2 + $0x210] sm:$0xff] }
 0x1e3   : > { %v4754_v37 = vmax.f32 %v5608_v17, %v1604_v46  ;;  %v4759_v61 = vmax.f32 %v5609_v57, %v1606_v5  ;;  %v5614_v60 = vmax.f32 %v4501_v41, %v4599_v32  ;;  %v1649_v4 = vmax.f32 %v1633_v53, 0.0  ;;  %v1861_v6 = vld [vmem:[%s5605_s2 + $0x198] sm:$0xff]  ;;  %v1810_v41 = vld [vmem:[%s5605_s2] sm:$0xff]  ;;  %v1844_v32 = vld [vmem:[%s5605_s2 + $0x110] sm:$0xff]  ;;  %1908 = vmatpush.msrb.mxu3 %v1811_v30  ;;  %1982 = vmatpush.msrb.mxu0 %v1845_v19 }
 0x1e4   : > { %v4770_v7 = vmax.f32 %v5610_v39, %v1608_v34  ;;  %v4775_v45 = vmax.f32 %v5611_v58, %v1610_v59  ;;  %v4780_v20 = vmax.f32 %v5612_v33, %v1612_v14  ;;  %v4785_v55 = vmax.f32 %v5613_v18, %v1614_v43  ;;  %v1877_v8 = vld [vmem:[%s5605_s2 + $0x218] sm:$0xff]  ;;  %2020 = vmatpush.msra.mxu1 %v1861_v6  ;;  %v1843_v5 = vld [vmem:[%s5605_s2 + $0x108] sm:$0xff]  ;;  %v1838_v14 = vld [vmem:[%s5605_s2 + $0xe0] sm:$0xff] }
 0x1e5   : > { %v4796_v24 = vmax.f32 %v5614_v60, %v1616_v44  ;;  %v1650_v27 = vmax.f32 %v1634_v36, 0.0  ;;  %v1651_v52 = vmax.f32 %v1635_v15, 0.0  ;;  %v1652_v0 = vmax.f32 %v1636_v12, 0.0  ;;  %1665 = vst [vmem:[#allocation4] sm:$0xff] %v1649_v4  ;;  %2058 = vmatpush.msrb.mxu2 %v1877_v8  ;;  %v1841_v34 = vld [vmem:[%s5605_s2 + $0xf8] sm:$0xff]  ;;  %1909 = vmatpush.msrb.mxu3 %v1810_v41  ;;  %v1839_v53 = vld [vmem:[%s5605_s2 + $0xe8] sm:$0xff] }
 0x1e6   : > { %v1653_v35 = vmax.f32 %v1637_v16, 0.0  ;;  %v1654_v59 = vmax.f32 %v4733_v11, 0.0  ;;  %v1655_v62 = vmax.f32 %v4744_v47, 0.0  ;;  %1983 = vmatpush.msrb.mxu0 %v1844_v32  ;;  %v5615_v22 = vrot.slane %v4503_v63, 1  ;;  %2021 = vmatpush.msra.mxu1 %v1860_v29  ;;  %v1837_v15 = vld [vmem:[%s5605_s2 + $0xd8] sm:$0xff]  ;;  %v1835_v3 = vld [vmem:[%s5605_s2 + $0xc8] sm:$0xff] }
 0x1e7   : > { %1666 = vst [vmem:[#allocation4 + $0x8] sm:$0xff] %v1650_v27  ;;  %v1656_v13 = vmax.f32 %v4749_v54, 0.0  ;;  %2059 = vmatpush.msrb.mxu2 %v1876_v23  ;;  %v1657_v50 = vmax.f32 %v4754_v37, 0.0  ;;  %1932 = vmatpush.msra.mxu3 %v1841_v34  ;;  %v1658_v10 = vmax.f32 %v4759_v61, 0.0  ;;  %v1659_v1 = vmax.f32 %v4770_v7, 0.0  ;;  %v1836_v54 = vld [vmem:[%s5605_s2 + $0xd0] sm:$0xff] }
 0x1e8   : > { %1667 = vst [vmem:[#allocation4 + $0x10] sm:$0xff] %v1651_v52  ;;  %v1585_v49 = vmax.f32 %v4503_v63, %v5615_v22  ;;  %1984 = vmatpush.msrb.mxu0 %v1843_v5  ;;  %2022 = vmatpush.msra.mxu1 %v1859_v9  ;;  %v1660_v40 = vmax.f32 %v4775_v45, 0.0  ;;  %v1661_v43 = vmax.f32 %v4780_v20, 0.0  ;;  %v1662_v36 = vmax.f32 %v4785_v55, 0.0  ;;  %v1834_v45 = vld [vmem:[%s5605_s2 + $0xc0] sm:$0xff]  ;;  %v1833_v18 = vld [vmem:[%s5605_s2 + $0xb8] sm:$0xff] }
 0x1e9   : > { %1668 = vst [vmem:[#allocation4 + $0x18] sm:$0xff] %v1652_v0  ;;  %2060 = vmatpush.msrb.mxu2 %v1875_v51  ;;  %1933 = vmatpush.msra.mxu3 %v1840_v48  ;;  %v1663_v12 = vmax.f32 %v4796_v24, 0.0  ;;  %v1832_v4 = vld [vmem:[%s5605_s2 + $0xb0] sm:$0xff]  ;;  %v1831_v27 = vld [vmem:[%s5605_s2 + $0xa8] sm:$0xff]  ;;  %v1830_v8 = vld [vmem:[%s5605_s2 + $0xa0] sm:$0xff] }
 0x1ea   : > { %1669 = vst [vmem:[#allocation4 + $0x20] sm:$0xff] %v1653_v35  ;;  %1985 = vmatpush.msrb.mxu0 %v1842_v21  ;;  %v1648_v46 = vmax.f32 %v1585_v49, %v1615_v31  ;;  %2023 = vmatpush.msra.mxu1 %v1858_v28  ;;  %v1829_v32 = vld [vmem:[%s5605_s2 + $0x98] sm:$0xff]  ;;  %v1828_v34 = vld [vmem:[%s5605_s2 + $0x90] sm:$0xff]  ;;  %v1827_v5 = vld [vmem:[%s5605_s2 + $0x88] sm:$0xff] }
 0x1eb   : > { %1670 = vst [vmem:[#allocation4 + $0x28] sm:$0xff] %v1654_v59  ;;  %2061 = vmatpush.msrb.mxu2 %v1874_v26  ;;  %1934 = vmatpush.msra.mxu3 %v1839_v53  ;;  %v1826_v22 = vld [vmem:[%s5605_s2 + $0x80] sm:$0xff] }
 0x1ec   : > { %1671 = vst [vmem:[#allocation4 + $0x30] sm:$0xff] %v1655_v62  ;;  %v1664_v11 = vmax.f32 %v1648_v46, 0.0 }
 0x1ed   : > { %1672 = vst [vmem:[#allocation4 + $0x38] sm:$0xff] %v1656_v13  ;;  %1935 = vmatpush.msra.mxu3 %v1838_v14 }
 0x1ee   : > { %1673 = vst [vmem:[#allocation4 + $0x40] sm:$0xff] %v1657_v50  ;;  %v4859_v44 = vld [vmem:[#allocation4] ss:$2 sm:$0xff] }
 0x1ef   : > { %1674 = vst [vmem:[#allocation4 + $0x48] sm:$0xff] %v1658_v10  ;;  %1910 = vmatmul.f32.vlgmr.msrb.gmra.mxu3 %v4859_v44  ;;  %v1742_v63 = vrot.slane %v4859_v44, 2  ;;  %v1765_v31 = vrot.slane %v4859_v44, 3  ;;  %v1788_v56 = vrot.slane %v4859_v44, 4 }
 0x1f0   : > { %1675 = vst [vmem:[#allocation4 + $0x50] sm:$0xff] %v1659_v1  ;;  %v4870_v16 = vld [vmem:[#allocation4 + $0x10] ss:$2 sm:$0xff]  ;;  %1936 = vmatpush.msra.mxu3 %v1837_v15 }
 0x1f1   : > { %1676 = vst [vmem:[#allocation4 + $0x58] sm:$0xff] %v1660_v40  ;;  %v1743_v2 = vrot.slane %v4870_v16, 2  ;;  %v1766_v42 = vrot.slane %v4870_v16, 3  ;;  %v1789_v47 = vrot.slane %v4870_v16, 4 }
 0x1f2   : > { %1677 = vst [vmem:[#allocation4 + $0x60] sm:$0xff] %v1661_v43  ;;  %v4881_v61 = vld [vmem:[#allocation4 + $0x20] ss:$2 sm:$0xff]  ;;  %1937 = vmatpush.msra.mxu3 %v1836_v54 }
 0x1f3   : > { %1678 = vst [vmem:[#allocation4 + $0x68] sm:$0xff] %v1662_v36  ;;  %v1744_v17 = vsel %vm1017_vm5, %v1742_v63, %v1743_v2  ;;  %v1767_v37 = vsel %vm1764_vm12, %v1765_v31, %v1766_v42  ;;  %v1790_v57 = vsel %vm1787_vm13, %v1788_v56, %v1789_v47  ;;  %v1745_v39 = vrot.slane %v4881_v61, 2 }
 0x1f4   : > { %1679 = vst [vmem:[#allocation4 + $0x70] sm:$0xff] %v1663_v12  ;;  %1986 = vmatmul.f32.vlgmr.msrb.gmra.mxu0 %v1744_v17  ;;  %2024 = vmatmul.f32.vlgmr.msra.gmra.mxu1 %v1767_v37  ;;  %v1687_v38 = vld [vmem:[#allocation4 + $0x30] ss:$2 sm:$0x3f]  ;;  %v1768_v7 = vrot.slane %v4881_v61, 3  ;;  %v1791_v33 = vrot.slane %v4881_v61, 4 }
 0x1f5   : > { %1680 = vst [vmem:[#allocation4 + $0x78] sm:$0xf] %v1664_v11  ;;  %2062 = vmatmul.f32.vlgmr.msrb.gmra.mxu2 %v1790_v57  ;;  %1938 = vmatpush.msra.mxu3 %v1835_v3  ;;  %v1746_v30 = vsel %vm1017_vm5, %v1743_v2, %v1745_v39  ;;  %v1720_v2 = vrot.slane %v4859_v44, 1  ;;  %v1723_v57 = vrot.slane %v4881_v61, 1 }
 0x1f6   : > { %v1693_v58 = vld [vmem:[#allocation4 + $0x40] ss:$2 sm:$0xff]  ;;  %1691 = vst [vmem:[#allocation5 + $0x18] sm:$0x3f] %v1687_v38  ;;  %v1769_v19 = vsel %vm1764_vm12, %v1766_v42, %v1768_v7  ;;  %v1792_v60 = vsel %vm1787_vm13, %v1789_v47, %v1791_v33  ;;  %v1721_v42 = vrot.slane %v4870_v16, 1 }
 0x1f7   : > { %1913 = vmatmul.f32.gmra.mxu3 %v4870_v16  ;;  %1700 = vst [vmem:[#allocation5 + $0x1e] sm:$0xff] %v1693_v58 }
 0x1f8   : > { %v1695_v20 = vld [vmem:[#allocation4 + $0x50] ss:$2 sm:$0xff]  ;;  %1939 = vmatpush.msra.mxu3 %v1834_v45  ;;  %v1722_v37 = vsel %vm781_vm4, %v1720_v2, %v1721_v42  ;;  %v1724_v3 = vsel %vm781_vm4, %v1721_v42, %v1723_v57 }
 0x1f9   : > { %1701 = vst [vmem:[#allocation5 + $0x26] sm:$0xff] %v1695_v20 }
 0x1fa   : > { %v1697_v55 = vld [vmem:[#allocation4 + $0x60] ss:$2 sm:$0xff]  ;;  %1940 = vmatpush.msra.mxu3 %v1833_v18 }
 0x1fb   : > { %1702 = vst [vmem:[#allocation5 + $0x2e] sm:$0xff] %v1697_v55 }
 0x1fc   : > { %1989 = vmatmul.f32.gmra.mxu0 %v1746_v30  ;;  %2027 = vmatmul.f32.gmra.mxu1 %v1769_v19  ;;  %v1699_v24 = vld [vmem:[#allocation4 + $0x70] ss:$2 sm:$0x3f] }
 0x1fd   : > { %2065 = vmatmul.f32.gmra.mxu2 %v1792_v60  ;;  %1703 = vst [vmem:[#allocation5 + $0x36] sm:$0x3f] %v1699_v24  ;;  %1941 = vmatpush.msra.mxu3 %v1832_v4 }
 0x1fe   : > { %v4906_v6 = vld [vmem:[#allocation5 + $0x18] sm:$0xff] }
 0x1ff   : > { %1916 = vmatmul.f32.gmra.mxu3 %v4881_v61  ;;  %v1747_v52 = vrot.slane %v4906_v6, 2  ;;  %v1770_v0 = vrot.slane %v4906_v6, 3  ;;  %v1793_v41 = vrot.slane %v4906_v6, 4  ;;  %v1725_v44 = vrot.slane %v4906_v6, 1 }
 0x200   : > { %1942 = vmatpush.msra.mxu3 %v1831_v27  ;;  %v4920_v59 = vld [vmem:[#allocation5 + $0x20] sm:$0xff] }
 0x201   : > { %v1748_v35 = vsel %vm1017_vm5, %v1745_v39, %v1747_v52  ;;  %v1771_v29 = vsel %vm1764_vm12, %v1768_v7, %v1770_v0  ;;  %v1794_v23 = vsel %vm1787_vm13, %v1791_v33, %v1793_v41  ;;  %v1749_v62 = vrot.slane %v4920_v59, 2 }
 0x202   : > { %1943 = vmatpush.msra.mxu3 %v1830_v8  ;;  %v1772_v9 = vrot.slane %v4920_v59, 3  ;;  %v1795_v51 = vrot.slane %v4920_v59, 4  ;;  %v1709_v48 = vld [vmem:[#allocation5 + $0x28] sm:$0xff]  ;;  %v1726_v16 = vsel %vm781_vm4, %v1723_v57, %v1725_v44  ;;  %v1727_v38 = vrot.slane %v4920_v59, 1 }
 0x203   : > { %v1750_v49 = vsel %vm1017_vm5, %v1747_v52, %v1749_v62  ;;  %v1751_v50 = vrot.slane %v1709_v48, 2  ;;  %v1774_v28 = vrot.slane %v1709_v48, 3  ;;  %v1797_v26 = vrot.slane %v1709_v48, 4  ;;  %v5616_v8 = vld [vmem:[#allocation33_spill] sm:$0xff] }
 0x204   : > { %1992 = vmatmul.f32.gmra.mxu0 %v1748_v35  ;;  %2030 = vmatmul.f32.gmra.mxu1 %v1771_v29  ;;  %v1773_v13 = vsel %vm1764_vm12, %v1770_v0, %v1772_v9  ;;  %v1796_v21 = vsel %vm1787_vm13, %v1793_v41, %v1795_v51  ;;  %v1710_v46 = vld [vmem:[#allocation5 + $0x30] sm:$0xff]  ;;  %v1711_v56 = vld [vmem:[#allocation5 + $0x38] sm:$0xf]  ;;  %v1728_v39 = vsel %vm781_vm4, %v1725_v44, %v1727_v38  ;;  %v1729_v7 = vrot.slane %v1709_v48, 1  ;;  %v4970_v41 = vld [vmem:[%s5617_s25] ss:$0 sm:$0xff] }
 0x205   : > { %2068 = vmatmul.f32.gmra.mxu2 %v1794_v23  ;;  %1944 = vmatpush.msra.mxu3 %v1829_v32  ;;  %v1752_v10 = vsel %vm1017_vm5, %v1749_v62, %v1751_v50  ;;  %v1775_v53 = vsel %vm1764_vm12, %v1772_v9, %v1774_v28  ;;  %v1798_v1 = vsel %vm1787_vm13, %v1795_v51, %v1797_v26  ;;  %v1753_v40 = vrot.slane %v1710_v46, 2  ;;  %v5618_v32 = vld [vmem:[#allocation32_spill] sm:$0xff] }
 0x206   : > { %v1776_v14 = vrot.slane %v1710_v46, 3  ;;  %v1799_v43 = vrot.slane %v1710_v46, 4  ;;  %v1755_v15 = vrot.slane %v1711_v56, 2  ;;  %v1778_v12 = vrot.slane %v1711_v56, 3 }
 0x207   : > { %1919 = vmatmul.f32.gmra.mxu3 %v4906_v6  ;;  %v1754_v36 = vsel %vm1017_vm5, %v1751_v50, %v1753_v40  ;;  %v1801_v11 = vrot.slane %v1711_v56, 4  ;;  %v1730_v58 = vsel %vm781_vm4, %v1727_v38, %v1729_v7  ;;  %v1731_v45 = vrot.slane %v1710_v46, 1  ;;  %v5620_v50 = vld [vmem:[#allocation29_spill] sm:$0xff] }
 0x208   : > { %1945 = vmatpush.msra.mxu3 %v1828_v34  ;;  %v1777_v63 = vsel %vm1764_vm12, %v1774_v28, %v1776_v14  ;;  %v1800_v31 = vsel %vm1787_vm13, %v1797_v26, %v1799_v43  ;;  %v1756_v47 = vsel %vm1017_vm5, %v1753_v40, %v1755_v15  ;;  %v1779_v54 = vsel %vm1764_vm12, %v1776_v14, %v1778_v12 }
 0x209   : > { %v1802_v17 = vsel %vm1787_vm13, %v1799_v43, %v1801_v11  ;;  %v1732_v61 = vsel %vm781_vm4, %v1729_v7, %v1731_v45  ;;  %v1733_v33 = vrot.slane %v1711_v56, 1  ;;  %v2084_v52 = vmul.f32 0.033333335, %v5616_v8 }
 0x20a   : > { %1946 = vmatpush.msra.mxu3 %v1827_v5  ;;  %v2085_v35 = vmul.f32 0.033333335, %v5618_v32  ;;  %vm2309_vm13 = vcmask 521216  }
 0x20b   : > { %v1734_v20 = vsel %vm781_vm4, %v1731_v45, %v1733_v33  ;;  %v2091_v29 = vfloor.f32 %v2084_v52  ;;  %v5624_v33 = vld [vmem:[#allocation20_spill] sm:$0xff] }
 0x20c   : > { %1947 = vmatpush.msra.mxu3 %v1826_v22  ;;  %1995 = vmatmul.f32.gmra.mxu0 %v1750_v49  ;;  %v5619_v22 = vld [vmem:[#allocation34_spill] sm:$0xff] }
 0x20d   : > { %2033 = vmatmul.f32.gmra.mxu1 %v1773_v13  ;;  %2071 = vmatmul.f32.gmra.mxu2 %v1796_v21  ;;  %v2098_v9 = vmul.f32 30.0, %v2091_v29  ;;  %v2086_v49 = vmul.f32 0.033333335, %v5619_v22 }
 0x20f   : > { %1922 = vmatmul.f32.gmra.mxu3 %v4920_v59  ;;  %v2092_v59 = vfloor.f32 %v2085_v35  ;;  %v2105_v28 = vsub.f32 %v5620_v50, %v2098_v9  ;;  %v2093_v26 = vfloor.f32 %v2086_v49  ;;  %v5625_v35 = vld [vmem:[#allocation35_spill] sm:$0xff] }
 0x211   : > { %v2099_v21 = vmul.f32 30.0, %v2092_v59  ;;  %vm2112_vm14 = vcmp.lt.f32.partialorder %v2105_v28, 26.0 }
 0x212   : > { %v4982_v11 = vsel %vm2112_vm14, 1.0, %v5589_v25 }
 0x214   : > { %1998 = vmatmul.f32.gmra.mxu0 %v1752_v10 }
 0x215   : > { %2036 = vmatmul.f32.gmra.mxu1 %v1775_v53  ;;  %2074 = vmatmul.f32.gmra.mxu2 %v1798_v1  ;;  %v5621_v1 = vld [vmem:[#allocation28_spill] sm:$0xff] }
 0x217   : > { %1925 = vmatmul.f32.gmra.mxu3 %v1709_v48 }
 0x21c   : > { %2001 = vmatmul.f32.gmra.mxu0 %v1754_v36  ;;  %v2100_v36 = vmul.f32 30.0, %v2093_v26 }
 0x21d   : > { %2039 = vmatmul.f32.gmra.mxu1 %v1777_v63  ;;  %2077 = vmatmul.f32.gmra.mxu2 %v1800_v31  ;;  %v5622_v63 = vld [vmem:[#allocation36_spill] sm:$0xff] }
 0x21e   : > { %v2087_v31 = vmul.f32 0.033333335, %v5622_v63 }
 0x21f   : > { %1928 = vmatmul.f32.gmra.mxu3 %v1710_v46  ;;  %v2106_v46 = vsub.f32 %v5621_v1, %v2099_v21  ;;  %v5626_v21 = vld [vmem:[#allocation23_spill] sm:$0xff] }
 0x221   : > { %vm2113_vm15 = vcmp.lt.f32.partialorder %v2106_v46, 26.0 }
 0x224   : > { %2004 = vmatmul.f32.gmra.mxu0 %v1756_v47  ;;  %v4985_v47 = vsel %vm2113_vm15, 1.0, %v5589_v25 }
 0x225   : > { %2042 = vmatmul.f32.gmra.mxu1 %v1779_v54  ;;  %2080 = vmatmul.f32.gmra.mxu2 %v1802_v17  ;;  %v5623_v54 = vld [vmem:[#allocation30_spill] sm:$0xff] }
 0x226   : > { %v2107_v17 = vsub.f32 %v5623_v54, %v2100_v36 }
 0x227   : > { %1948 = vmatmul.f32.vlgmr.msra.gmra.mxu3 %v1722_v37  ;;  %v2094_v37 = vfloor.f32 %v2087_v31 }
 0x228   : > { %vm2114_vm1 = vcmp.lt.f32.partialorder %v2107_v17, 26.0 }
 0x229   : > { %v2101_v7 = vmul.f32 30.0, %v2094_v37 }
 0x22b   : > { %v2108_v29 = vsub.f32 %v5625_v35, %v2101_v7 }
 0x22d   : > { %vm2115_vm2 = vcmp.lt.f32.partialorder %v2108_v29, 26.0 }
 0x22e   : > { %v5010_v28 = vsel %vm2115_vm2, 1.0, %v5589_v25 }
 0x22f   : > { %1951 = vmatmul.f32.gmra.mxu3 %v1724_v3 }
 0x237   : > { %1954 = vmatmul.f32.gmra.mxu3 %v1726_v16 }
 0x23f   : > { %1957 = vmatmul.f32.gmra.mxu3 %v1728_v39 }
 0x247   : > { %1960 = vmatmul.f32.gmra.mxu3 %v1730_v58 }
 0x24f   : > { %1963 = vmatmul.f32.gmra.mxu3 %v1732_v61 }
 0x257   : > { %1966 = vmatmul.f32.gmra.mxu3 %v1734_v20  ;;  %v2088_v20 = vmul.f32 0.033333335, %v5624_v33 }
 0x271   : > { %v1987_v4 = vpop.f32.mrf.mxu0  ;;  %v2025_v27 = vpop.f32.mrf.mxu1 }
 0x272   : > { %v1911_v18 = vpop.f32.mrf.mxu3 }
 0x273   : > { %v1912_v23 = vadd.f32 %v4970_v41, %v1911_v18 }
 0x278   : > { %v2063_v0 = vpop.f32.mrf.mxu2 }
 0x279   : > { %v1990_v34 = vpop.f32.mrf.mxu0  ;;  %v2028_v51 = vpop.f32.mrf.mxu1 }
 0x27a   : > { %v1914_v55 = vpop.f32.mrf.mxu3 }
 0x27b   : > { %v1915_v10 = vadd.f32 %v4970_v41, %v1914_v55 }
 0x280   : > { %v2066_v48 = vpop.f32.mrf.mxu2 }
 0x281   : > { %v1993_v43 = vpop.f32.mrf.mxu0  ;;  %v2031_v12 = vpop.f32.mrf.mxu1 }
 0x282   : > { %v1917_v30 = vpop.f32.mrf.mxu3 }
 0x283   : > { %v1918_v57 = vadd.f32 %v4970_v41, %v1917_v30 }
 0x288   : > { %v2069_v42 = vpop.f32.mrf.mxu2 }
 0x289   : > { %v1996_v18 = vpop.f32.mrf.mxu0 }
 0x28a   : > { %v1920_v19 = vpop.f32.mrf.mxu3 }
 0x28b   : > { %v1921_v52 = vadd.f32 %v4970_v41, %v1920_v19  ;;  %v2089_v19 = vmul.f32 0.033333335, %v5626_v21 }
 0x28d   : > { %v2096_v63 = vfloor.f32 %v2089_v19 }
 0x290   : > { %v2072_v59 = vpop.f32.mrf.mxu2 }
 0x292   : > { %v4960_v60 = vpop.f32.mrf.mxu3 }
 0x293   : > { %v1924_v26 = vadd.f32 %v4970_v41, %v4960_v60 }
 0x298   : > { %v2075_v31 = vpop.f32.mrf.mxu2 }
 0x29a   : > { %v4962_v24 = vpop.f32.mrf.mxu3 }
 0x2a2   : > { %v4964_v6 = vpop.f32.mrf.mxu3 }
 0x2aa   : > { %v1949_v5 = vpop.f32.mrf.mxu3 }
 0x2ab   : > { %v1950_v62 = vadd.f32 %v1949_v5, %v1912_v23  ;;  %v2095_v23 = vfloor.f32 %v2088_v20 }
 0x2ad   : > { %v1988_v13 = vadd.f32 %v1987_v4, %v1950_v62  ;;  %v2034_v4 = vpop.f32.mrf.mxu1  ;;  %v2102_v22 = vmul.f32 30.0, %v2095_v23 }
 0x2af   : > { %v2026_v53 = vadd.f32 %v2025_v27, %v1988_v13  ;;  %v4999_v27 = vsel %vm2114_vm1, 1.0, %v5589_v25 }
 0x2b1   : > { %v4979_v56 = vadd.f32 %v2063_v0, %v2026_v53  ;;  %v5627_v53 = vld [vmem:[#allocation16_spill] sm:$0xff] }
 0x2b2   : > { %v1952_v40 = vpop.f32.mrf.mxu3  ;;  %v2109_v46 = vsub.f32 %v5627_v53, %v2102_v22 }
 0x2b3   : > { %v1953_v14 = vadd.f32 %v1952_v40, %v1915_v10  ;;  %v2126_v3 = vmul.f32 %v4982_v11, %v4979_v56 }
 0x2b4   : > { %vm2116_vm6 = vcmp.lt.f32.partialorder %v2109_v46, 26.0 }
 0x2b5   : > { %v1991_v15 = vadd.f32 %v1990_v34, %v1953_v14  ;;  %v2134_v58 = vsel %vm2133_vm0, %v2126_v3, 0.0  ;;  %v2037_v40 = vpop.f32.mrf.mxu1  ;;  %v2123_v60 = vsel %vm2116_vm6, 1.0, %v5589_v25  ;;  %v1927_v3 = vadd.f32 %v4970_v41, %v4962_v24 }
 0x2b6   : > { %v1930_v24 = vadd.f32 %v4970_v41, %v4964_v6 }
 0x2b7   : > { %v2029_v2 = vadd.f32 %v2028_v51, %v1991_v15 }
 0x2b9   : > { %v4991_v44 = vadd.f32 %v2066_v48, %v2029_v2  ;;  %v1999_v48 = vpop.f32.mrf.mxu0  ;;  %v5628_v2 = vld [vmem:[#allocation25_spill] sm:$0xff] }
 0x2ba   : > { %v1955_v16 = vpop.f32.mrf.mxu3 }
 0x2bb   : > { %v2127_v38 = vmul.f32 %v4985_v47, %v4991_v44  ;;  %v1956_v39 = vadd.f32 %v1955_v16, %v1918_v57  ;;  %v2103_v57 = vmul.f32 30.0, %v2096_v63 }
 0x2bd   : > { %v2135_v45 = vsel %vm2133_vm0, %v2127_v38, 0.0  ;;  %v1994_v61 = vadd.f32 %v1993_v43, %v1956_v39  ;;  %v2040_v20 = vpop.f32.mrf.mxu1 }
 0x2be   : > { %v2136_v55 = vadd.f32 %v2135_v45, %v2134_v58 }
 0x2bf   : > { %v2032_v30 = vadd.f32 %v2031_v12, %v1994_v61  ;;  %v5629_v61 = vld [vmem:[#allocation18_spill] sm:$0xff] }
 0x2c0   : > { %v2110_v33 = vsub.f32 %v5629_v61, %v2103_v57 }
 0x2c1   : > { %v5002_v0 = vadd.f32 %v2069_v42, %v2032_v30  ;;  %v2090_v42 = vmul.f32 0.033333335, %v5628_v2  ;;  %v2002_v39 = vpop.f32.mrf.mxu0 }
 0x2c2   : > { %v1958_v34 = vpop.f32.mrf.mxu3  ;;  %vm2117_vm7 = vcmp.lt.f32.partialorder %v2110_v33, 26.0 }
 0x2c3   : > { %v2128_v5 = vmul.f32 %v4999_v27, %v5002_v0  ;;  %v1959_v62 = vadd.f32 %v1958_v34, %v1921_v52  ;;  %v2097_v38 = vfloor.f32 %v2090_v42 }
 0x2c5   : > { %v2137_v9 = vsel %vm2133_vm0, %v2128_v5, 0.0  ;;  %v1997_v51 = vadd.f32 %v1996_v18, %v1959_v62  ;;  %v2104_v30 = vmul.f32 30.0, %v2097_v38  ;;  %v2124_v5 = vsel %vm2117_vm7, 1.0, %v5589_v25 }
 0x2c6   : > { %v2138_v49 = vadd.f32 %v2137_v9, %v2136_v55  ;;  %vm2525_vm7 = vcmask 519168  }
 0x2c7   : > { %v2035_v13 = vadd.f32 %v2034_v4, %v1997_v51  ;;  %v2078_v4 = vpop.f32.mrf.mxu2 }
 0x2c9   : > { %v2073_v10 = vadd.f32 %v2072_v59, %v2035_v13  ;;  %v5630_v59 = vld [vmem:[#allocation22_spill] sm:$0xff]  ;;  %v2005_v51 = vpop.f32.mrf.mxu0  ;;  %v2043_v13 = vpop.f32.mrf.mxu1 }
 0x2ca   : > { %v1961_v14 = vpop.f32.mrf.mxu3  ;;  %v2111_v34 = vsub.f32 %v5630_v59, %v2104_v30 }
 0x2cb   : > { %v2129_v43 = vmul.f32 %v5010_v28, %v2073_v10  ;;  %v1962_v36 = vadd.f32 %v1961_v14, %v1924_v26 }
 0x2cc   : > { %vm2118_vm8 = vcmp.lt.f32.partialorder %v2111_v34, 26.0 }
 0x2cd   : > { %v2139_v15 = vsel %vm2133_vm0, %v2129_v43, 0.0  ;;  %v2000_v12 = vadd.f32 %v1999_v48, %v1962_v36  ;;  %v2125_v48 = vsel %vm2118_vm8, 1.0, %v5589_v25  ;;  %vm2531_vm8 = vcmask 516096  }
 0x2ce   : > { %v2140_v17 = vadd.f32 %v2139_v15, %v2138_v49 }
 0x2cf   : > { %v2038_v37 = vadd.f32 %v2037_v40, %v2000_v12  ;;  %v2081_v19 = vpop.f32.mrf.mxu2 }
 0x2d1   : > { %v2076_v16 = vadd.f32 %v2075_v31, %v2038_v37 }
 0x2d2   : > { %v1964_v7 = vpop.f32.mrf.mxu3 }
 0x2d3   : > { %v2130_v58 = vmul.f32 %v2123_v60, %v2076_v16  ;;  %v1965_v45 = vadd.f32 %v1964_v7, %v1927_v3 }
 0x2d5   : > { %v2141_v18 = vsel %vm2133_vm0, %v2130_v58, 0.0  ;;  %v2003_v55 = vadd.f32 %v2002_v39, %v1965_v45 }
 0x2d6   : > { %v2142_v52 = vadd.f32 %v2141_v18, %v2140_v17 }
 0x2d7   : > { %v2041_v29 = vadd.f32 %v2040_v20, %v2003_v55 }
 0x2d9   : > { %v2079_v23 = vadd.f32 %v2078_v4, %v2041_v29 }
 0x2da   : > { %v1967_v62 = vpop.f32.mrf.mxu3 }
 0x2db   : > { %v1968_v9 = vadd.f32 %v1967_v62, %v1930_v24  ;;  %v2131_v22 = vmul.f32 %v2124_v5, %v2079_v23 }
 0x2dd   : > { %v2006_v49 = vadd.f32 %v2005_v51, %v1968_v9  ;;  %v2143_v26 = vsel %vm2133_vm0, %v2131_v22, 0.0 }
 0x2de   : > { %v2144_v41 = vadd.f32 %v2143_v26, %v2142_v52 }
 0x2df   : > { %v2044_v21 = vadd.f32 %v2043_v13, %v2006_v49 }
 0x2e1   : > { %v2082_v46 = vadd.f32 %v2081_v19, %v2044_v21 }
 0x2e3   : > { %v2132_v6 = vmul.f32 %v2125_v48, %v2082_v46 }
 0x2e5   : > { %v2145_v40 = vsel %vm2133_vm0, %v2132_v6, 0.0 }
 0x2e6   : > { %v2146_v14 = vadd.f32 %v2145_v40, %v2144_v41  ;;  %v3403_v40 = vld [vmem:[%s5476_s10 + $0x78] sm:$0xff] }
 0x2e7   : > { %2352 = vmatpush.msrb.mxu3 %v3403_v40 }
 0x2e8   : > { %v2147_v43 = vrot.slane %v2146_v14, 4 }
 0x2ea   : > { %v2148_v36 = vadd.f32 %v2147_v43, %v2146_v14  ;;  %v3402_v14 = vld [vmem:[%s5476_s10 + $0x70] sm:$0xff] }
 0x2eb   : > { %2353 = vmatpush.msrb.mxu3 %v3402_v14 }
 0x2ec   : > { %v2149_v63 = vrot.slane %v2148_v36, 2 }
 0x2ee   : > { %v2150_v31 = vadd.f32 %v2149_v63, %v2148_v36  ;;  %v3401_v36 = vld [vmem:[%s5476_s10 + $0x68] sm:$0xff] }
 0x2ef   : > { %2354 = vmatpush.msrb.mxu3 %v3401_v36 }
 0x2f0   : > { %v2151_v15 = vrot.slane %v2150_v31, 1 }
 0x2f2   : > { %v2152_v12 = vadd.f32 %v2151_v15, %v2150_v31  ;;  %v3400_v31 = vld [vmem:[%s5476_s10 + $0x60] sm:$0xff] }
 0x2f3   : > { %2355 = vmatpush.msrb.mxu3 %v3400_v31  ;;  %v2325_v31 = vld [vmem:[%s5476_s10 + $0x38] sm:$0xff] }
 0x2f4   : > { %v2153_v2 = vmul.f32 0.01923077, %v2152_v12  ;;  %v3517_v12 = vld [vmem:[%s5631_s1] ss:$0 sm:$0xff]  ;;  %s3603_s1 = smov 2  }
 0x2f6   : > { %v5031_v42 = vsub.f32 %v4979_v56, %v2153_v2  ;;  %v5034_v17 = vsub.f32 %v4991_v44, %v2153_v2  ;;  %v5037_v37 = vsub.f32 %v5002_v0, %v2153_v2  ;;  %v5039_v57 = vsub.f32 %v2073_v10, %v2153_v2 }
 0x2f7   : > { %v5041_v3 = vsub.f32 %v2076_v16, %v2153_v2  ;;  %v5043_v38 = vsub.f32 %v2079_v23, %v2153_v2  ;;  %v2160_v0 = vsub.f32 %v2082_v46, %v2153_v2  ;;  %v3399_v2 = vld [vmem:[%s5476_s10 + $0x58] sm:$0xff] }
 0x2f8   : > { %v2161_v39 = vmul.f32 %v5031_v42, %v4982_v11  ;;  %v2162_v7 = vmul.f32 %v5034_v17, %v4985_v47  ;;  %v2163_v56 = vmul.f32 %v5037_v37, %v4999_v27  ;;  %v2164_v44 = vmul.f32 %v5039_v57, %v5010_v28  ;;  %2356 = vmatpush.msrb.mxu3 %v3399_v2 }
 0x2f9   : > { %v2165_v10 = vmul.f32 %v5041_v3, %v2123_v60  ;;  %v2166_v33 = vmul.f32 %v5043_v38, %v2124_v5  ;;  %v2167_v55 = vmul.f32 %v2160_v0, %v2125_v48 }
 0x2fa   : > { %v2168_v58 = vmul.f32 %v2161_v39, %v2161_v39  ;;  %v2169_v16 = vmul.f32 %v2162_v7, %v2162_v7  ;;  %v2170_v45 = vmul.f32 %v2163_v56, %v2163_v56  ;;  %v2171_v20 = vmul.f32 %v2164_v44, %v2164_v44 }
 0x2fb   : > { %v2172_v30 = vmul.f32 %v2165_v10, %v2165_v10  ;;  %v2173_v28 = vmul.f32 %v2166_v33, %v2166_v33  ;;  %v2174_v29 = vmul.f32 %v2167_v55, %v2167_v55 }
 0x2fc   : > { %v2175_v11 = vsel %vm2133_vm0, %v2168_v58, 0.0  ;;  %v2176_v18 = vsel %vm2133_vm0, %v2169_v16, 0.0  ;;  %v2178_v27 = vsel %vm2133_vm0, %v2170_v45, 0.0  ;;  %v2180_v52 = vsel %vm2133_vm0, %v2171_v20, 0.0  ;;  %v3518_v58 = vld [vmem:[%s5475_s9] ss:$0 sm:$0xff] }
 0x2fd   : > { %v2177_v47 = vadd.f32 %v2176_v18, %v2175_v11  ;;  %v2182_v24 = vsel %vm2133_vm0, %v2172_v30, 0.0  ;;  %v2184_v34 = vsel %vm2133_vm0, %v2173_v28, 0.0  ;;  %v2186_v62 = vsel %vm2133_vm0, %v2174_v29, 0.0  ;;  %v3398_v16 = vld [vmem:[%s5476_s10 + $0x50] sm:$0xff] }
 0x2fe   : > { %2357 = vmatpush.msrb.mxu3 %v3398_v16 }
 0x2ff   : > { %v2179_v4 = vadd.f32 %v2178_v27, %v2177_v47 }
 0x301   : > { %v2181_v60 = vadd.f32 %v2180_v52, %v2179_v4 }
 0x303   : > { %v2183_v23 = vadd.f32 %v2182_v24, %v2181_v60 }
 0x305   : > { %v2185_v5 = vadd.f32 %v2184_v34, %v2183_v23 }
 0x307   : > { %v2187_v9 = vadd.f32 %v2186_v62, %v2185_v5 }
 0x309   : > { %v2188_v51 = vrot.slane %v2187_v9, 4 }
 0x30b   : > { %v2189_v22 = vadd.f32 %v2188_v51, %v2187_v9 }
 0x30d   : > { %v2190_v49 = vrot.slane %v2189_v22, 2 }
 0x30f   : > { %v2191_v13 = vadd.f32 %v2190_v49, %v2189_v22 }
 0x311   : > { %v2192_v21 = vrot.slane %v2191_v13, 1 }
 0x313   : > { %v2193_v19 = vadd.f32 %v2192_v21, %v2191_v13 }
 0x315   : > { %v2194_v48 = vmul.f32 0.01923077, %v2193_v19 }
 0x317   : > { %v2195_v26 = vadd.f32 1e-05, %v2194_v48 }
 0x319   : > { %3528 = vrsqrt.f32 %v2195_v26  ;;  %vm2202_vm10 = vweird.f32 %v2195_v26 }
 0x31f   : > { %v3529_v46 = vpop.eup %3528 }
 0x320   : > { %v2197_v6 = vmul.f32 %v3529_v46, %v2195_v26  ;;  %vm2203_vm9 = vweird.f32 %v3529_v46 }
 0x321   : > { %vm2204_vm11 = vmor %vm2202_vm10, %vm2203_vm9  ;;  %vm2687_vm9 = vcmask 130048  }
 0x322   : > { %v2198_v41 = vmul.f32 %v3529_v46, %v2197_v6 }
 0x324   : > { %v2199_v43 = vmul.f32 0.5, %v2198_v41 }
 0x326   : > { %v2200_v63 = vsub.f32 1.5, %v2199_v43 }
 0x328   : > { %v2201_v15 = vmul.f32 %v3529_v46, %v2200_v63 }
 0x32a   : > { %v2205_v39 = vsel %vm2204_vm11, %v3529_v46, %v2201_v15  ;;  %v2324_v15 = vld [vmem:[%s5476_s10 + $0x30] sm:$0xff] }
 0x32b   : > { %v2206_v7 = vmul.f32 %v2205_v39, %v5031_v42  ;;  %v2207_v56 = vmul.f32 %v2205_v39, %v5034_v17  ;;  %v2208_v44 = vmul.f32 %v2205_v39, %v5037_v37  ;;  %v2209_v10 = vmul.f32 %v2205_v39, %v5039_v57  ;;  %v3397_v57 = vld [vmem:[%s5476_s10 + $0x48] sm:$0xff] }
 0x32c   : > { %v2210_v45 = vmul.f32 %v2205_v39, %v5041_v3  ;;  %v2211_v33 = vmul.f32 %v2205_v39, %v5043_v38  ;;  %v2212_v20 = vmul.f32 %v2205_v39, %v2160_v0  ;;  %v3396_v38 = vld [vmem:[%s5476_s10 + $0x40] sm:$0xff]  ;;  %2358 = vmatpush.msrb.mxu3 %v3397_v57 }
 0x32d   : > { %v2217_v42 = vmul.f32 %v3517_v12, %v2206_v7  ;;  %v2218_v17 = vmul.f32 %v3517_v12, %v2207_v56  ;;  %v2219_v11 = vmul.f32 %v3517_v12, %v2208_v44  ;;  %v2220_v37 = vmul.f32 %v3517_v12, %v2209_v10  ;;  %v2323_v10 = vld [vmem:[%s5476_s10 + $0x28] sm:$0xff] }
 0x32e   : > { %v2221_v18 = vmul.f32 %v3517_v12, %v2210_v45  ;;  %v2222_v47 = vmul.f32 %v3517_v12, %v2211_v33  ;;  %v2223_v55 = vmul.f32 %v3517_v12, %v2212_v20  ;;  %2359 = vmatpush.msrb.mxu3 %v3396_v38  ;;  %v2321_v38 = vld [vmem:[%s5476_s10 + $0x18] sm:$0xff] }
 0x32f   : > { %v2228_v30 = vadd.f32 %v3518_v58, %v2217_v42  ;;  %v2229_v27 = vadd.f32 %v3518_v58, %v2218_v17  ;;  %v2230_v4 = vadd.f32 %v3518_v58, %v2219_v11  ;;  %v2231_v3 = vadd.f32 %v3518_v58, %v2220_v37  ;;  %v2322_v37 = vld [vmem:[%s5476_s10 + $0x20] sm:$0xff] }
 0x330   : > { %v2232_v0 = vadd.f32 %v3518_v58, %v2221_v18  ;;  %v2233_v28 = vadd.f32 %v3518_v58, %v2222_v47  ;;  %v2234_v52 = vadd.f32 %v3518_v58, %v2223_v55  ;;  %2379 = vmatpush.msra.mxu3 %v2325_v31 }
 0x331   : > { %v2242_v60 = vrot.slane %v2228_v30, 1  ;;  %v2243_v29 = vrot.slane %v2229_v27, 1  ;;  %v2245_v24 = vrot.slane %v2230_v4, 1  ;;  %v2247_v23 = vrot.slane %v2231_v3, 1 }
 0x332   : > { %v2249_v34 = vrot.slane %v2232_v0, 1  ;;  %v2251_v5 = vrot.slane %v2233_v28, 1  ;;  %v2253_v62 = vrot.slane %v2234_v52, 1  ;;  %v2269_v9 = vrot.slane %v2228_v30, 2  ;;  %2380 = vmatpush.msra.mxu3 %v2324_v15 }
 0x333   : > { %v2244_v51 = vsel %vm781_vm4, %v2242_v60, %v2243_v29  ;;  %v2246_v22 = vsel %vm781_vm4, %v2243_v29, %v2245_v24  ;;  %v2248_v49 = vsel %vm781_vm4, %v2245_v24, %v2247_v23  ;;  %v2270_v13 = vrot.slane %v2229_v27, 2  ;;  %v2318_v60 = vld [vmem:[%s5476_s10] sm:$0xff] }
 0x334   : > { %v2250_v21 = vsel %vm781_vm4, %v2247_v23, %v2249_v34  ;;  %v2252_v19 = vsel %vm781_vm4, %v2249_v34, %v2251_v5  ;;  %v2254_v48 = vsel %vm781_vm4, %v2251_v5, %v2253_v62  ;;  %v2262_v26 = vmax.f32 %v2228_v30, %v2244_v51  ;;  %2381 = vmatpush.msra.mxu3 %v2323_v10 }
 0x335   : > { %v2263_v46 = vmax.f32 %v2229_v27, %v2246_v22  ;;  %v2264_v6 = vmax.f32 %v2230_v4, %v2248_v49  ;;  %v2265_v41 = vmax.f32 %v2231_v3, %v2250_v21  ;;  %v2266_v40 = vmax.f32 %v2232_v0, %v2252_v19  ;;  %v3414_v22 = vld [vmem:[%s5476_s10 + $0xb0] sm:$0xff]  ;;  %v3413_v49 = vld [vmem:[%s5476_s10 + $0xa8] sm:$0xff]  ;;  %v3411_v21 = vld [vmem:[%s5476_s10 + $0x98] sm:$0xff] }
 0x336   : > { %v2267_v14 = vmax.f32 %v2233_v28, %v2254_v48  ;;  %v2268_v43 = vmax.f32 %v2234_v52, %v2253_v62  ;;  %v2271_v36 = vsel %vm1017_vm5, %v2269_v9, %v2270_v13  ;;  %v2272_v63 = vrot.slane %v2230_v4, 2  ;;  %2382 = vmatpush.msra.mxu3 %v2322_v37  ;;  %v3415_v9 = vld [vmem:[%s5476_s10 + $0xb8] sm:$0xff]  ;;  %v3410_v19 = vld [vmem:[%s5476_s10 + $0x90] sm:$0xff]  ;;  %v3409_v48 = vld [vmem:[%s5476_s10 + $0x88] sm:$0xff] }
 0x337   : > { %v2274_v12 = vrot.slane %v2231_v3, 2  ;;  %v2276_v2 = vrot.slane %v2232_v0, 2  ;;  %v2278_v39 = vrot.slane %v2233_v28, 2  ;;  %v2280_v7 = vrot.slane %v2234_v52, 2  ;;  %v2320_v0 = vld [vmem:[%s5476_s10 + $0x10] sm:$0xff]  ;;  %v2319_v52 = vld [vmem:[%s5476_s10 + $0x8] sm:$0xff] }
 0x338   : > { %v2273_v56 = vsel %vm1017_vm5, %v2270_v13, %v2272_v63  ;;  %v2289_v44 = vmax.f32 %v2262_v26, %v2271_v36  ;;  %2383 = vmatpush.msra.mxu3 %v2321_v38  ;;  %v3412_v13 = vld [vmem:[%s5476_s10 + $0xa0] sm:$0xff]  ;;  %v2441_v36 = vmul.f32 0.125, %v5616_v8 }
 0x339   : > { %v2275_v58 = vsel %vm1017_vm5, %v2272_v63, %v2274_v12  ;;  %v2277_v16 = vsel %vm1017_vm5, %v2274_v12, %v2276_v2  ;;  %v2279_v45 = vsel %vm1017_vm5, %v2276_v2, %v2278_v39  ;;  %v2281_v33 = vsel %vm1017_vm5, %v2278_v39, %v2280_v7  ;;  %v3408_v26 = vld [vmem:[%s5476_s10 + $0x80] sm:$0xff] }
 0x33a   : > { %v2290_v20 = vmax.f32 %v2263_v46, %v2273_v56  ;;  %v2291_v42 = vmax.f32 %v2264_v6, %v2275_v58  ;;  %v2292_v17 = vmax.f32 %v2265_v41, %v2277_v16  ;;  %v2293_v11 = vmax.f32 %v2266_v40, %v2279_v45  ;;  %2384 = vmatpush.msra.mxu3 %v2320_v0  ;;  %v3519_v58 = vld [vmem:[%s5477_s11] ss:$0 sm:$0xff] }
 0x33b   : > { %v2294_v57 = vmax.f32 %v2267_v14, %v2281_v33  ;;  %v2295_v18 = vmax.f32 %v2268_v43, %v2280_v7  ;;  %v2296_v47 = vmax.f32 %v2289_v44, 0.0  ;;  %v2442_v63 = vmul.f32 0.125, %v5618_v32 }
 0x33c   : > { %v2297_v55 = vmax.f32 %v2290_v20, 0.0  ;;  %v2298_v30 = vmax.f32 %v2291_v42, 0.0  ;;  %v2299_v27 = vmax.f32 %v2292_v17, 0.0  ;;  %v2300_v4 = vmax.f32 %v2293_v11, 0.0  ;;  %2385 = vmatpush.msra.mxu3 %v2319_v52 }
 0x33d   : > { %2303 = vst.msk [vmem:[#allocation6] sm:$0xff] %vm2133_vm0, %v2296_v47  ;;  %v2301_v3 = vmax.f32 %v2294_v57, 0.0  ;;  %v2302_v28 = vmax.f32 %v2295_v18, 0.0  ;;  %v2443_v15 = vfloor.f32 %v2441_v36  ;;  %v2444_v12 = vfloor.f32 %v2442_v63 }
 0x33e   : > { %2304 = vst.msk [vmem:[#allocation6 + $0x8] sm:$0xff] %vm2133_vm0, %v2297_v55  ;;  %2386 = vmatpush.msra.mxu3 %v2318_v60 }
 0x33f   : > { %2305 = vst.msk [vmem:[#allocation6 + $0x10] sm:$0xff] %vm2133_vm0, %v2298_v30  ;;  %v2445_v2 = vmul.f32 8.0, %v2443_v15  ;;  %v2446_v39 = vmul.f32 8.0, %v2444_v12  ;;  %v2545_v15 = vld [vmem:[%s5480_s14 + $0x18] sm:$0xff] }
 0x340   : > { %2306 = vst.msk [vmem:[#allocation6 + $0x18] sm:$0xff] %vm2133_vm0, %v2299_v27 }
 0x341   : > { %2307 = vst.msk [vmem:[#allocation6 + $0x20] sm:$0xff] %vm2133_vm0, %v2300_v4  ;;  %v2447_v44 = vsub.f32 %v5620_v50, %v2445_v2  ;;  %v2448_v16 = vsub.f32 %v5621_v1, %v2446_v39  ;;  %v3420_v2 = vld [vmem:[%s5480_s14 + $0x50] sm:$0xff] }
 0x342   : > { %2308 = vst.msk [vmem:[#allocation6 + $0x28] sm:$0xff] %vm2133_vm0, %v2301_v3  ;;  %v2544_v39 = vld [vmem:[%s5480_s14 + $0x10] sm:$0xff] }
 0x343   : > { %2310 = vst.msk [vmem:[#allocation6 + $0x30] sm:$0x3f] %vm2309_vm13, %v2302_v28  ;;  %vm2449_vm14 = vcmp.lt.f32.partialorder %v2447_v44, 6.0  ;;  %vm2450_vm15 = vcmp.lt.f32.partialorder %v2448_v16, 6.0  ;;  %v2543_v44 = vld [vmem:[%s5480_s14 + $0x8] sm:$0xff]  ;;  %v2542_v16 = vld [vmem:[%s5480_s14] sm:$0xff] }
 0x344   : > { %v2451_v32 = vsel %vm2449_vm14, 1.0, %v5589_v25  ;;  %v2452_v42 = vsel %vm2450_vm15, 1.0, %v5589_v25 }
 0x346   : > { %v2311_v29 = vld [vmem:[#allocation6] ss:$3 sm:$0xff] }
 0x347   : > { %2312 = vst.msk [vmem:[#allocation7] sm:$0xff] %vm2133_vm0, %v2311_v29 }
 0x34a   : > { %v2314_v24 = vld [vmem:[#allocation6 + $0x1e] ss:$3 sm:$0xff] }
 0x34b   : > { %2315 = vst.msk [vmem:[#allocation7 + $0x8] sm:$0xff] %vm2133_vm0, %v2314_v24 }
 0x34e   : > { %v2316_v23 = vld [vmem:[#allocation7] sm:$0xff] }
 0x34f   : > { %v2337_v34 = vrot.slane %v2316_v23, 1  ;;  %v2403_v46 = vrot.slane %v2316_v23, 2 }
 0x352   : > { %v2317_v5 = vld [vmem:[#allocation7 + $0x8] sm:$0xff] }
 0x353   : > { %v2338_v62 = vrot.slane %v2317_v5, 1  ;;  %v2404_v6 = vrot.slane %v2317_v5, 2 }
 0x355   : > { %v2339_v51 = vsel %vm781_vm4, %v2337_v34, %v2338_v62  ;;  %v2405_v41 = vsel %vm1017_vm5, %v2403_v46, %v2404_v6  ;;  %v3424_v46 = vld [vmem:[%s5480_s14 + $0x70] sm:$0xff] }
 0x356   : > { %3404 = vmatmul.msk.f32.vlgmr.msrb.gmra.mxu3 %vm2133_vm0, %v2339_v51 }
 0x357   : > { %2418 = vmatpush.msrb.mxu3 %v3415_v9 }
 0x359   : > { %2419 = vmatpush.msrb.mxu3 %v3414_v22 }
 0x35b   : > { %2420 = vmatpush.msrb.mxu3 %v3413_v49 }
 0x35d   : > { %2421 = vmatpush.msrb.mxu3 %v3412_v13 }
 0x35e   : > { %3405 = vmatmul.msk.f32.gmra.mxu3 %vm2133_vm0, %v2338_v62 }
 0x35f   : > { %2422 = vmatpush.msrb.mxu3 %v3411_v21 }
 0x361   : > { %2423 = vmatpush.msrb.mxu3 %v3410_v19 }
 0x363   : > { %2424 = vmatpush.msrb.mxu3 %v3409_v48  ;;  %v3425_v48 = vld [vmem:[%s5480_s14 + $0x78] sm:$0xff] }
 0x364   : > { %2572 = vmatpush.msra.mxu0 %v3425_v48  ;;  %v2649_v48 = vld [vmem:[%s5484_s18 + $0x8] sm:$0xff] }
 0x365   : > { %2425 = vmatpush.msrb.mxu3 %v3408_v26  ;;  %v2549_v26 = vld [vmem:[%s5480_s14 + $0x38] sm:$0xff] }
 0x366   : > { %3406 = vmatmul.msk.f32.vlgmr.msra.gmra.mxu3 %vm2133_vm0, %v2316_v23  ;;  %2595 = vmatpush.msrb.mxu1 %v2549_v26  ;;  %v3522_v26 = vld [vmem:[%s5481_s15] ss:$0 sm:$0xff] }
 0x367   : > { %2573 = vmatpush.msra.mxu0 %v3424_v46 }
 0x36e   : > { %3407 = vmatmul.msk.f32.gmra.mxu3 %vm2133_vm0, %v2317_v5 }
 0x376   : > { %3416 = vmatmul.msk.f32.vlgmr.msrb.gmra.mxu3 %vm2133_vm0, %v2405_v41  ;;  %v3423_v41 = vld [vmem:[%s5480_s14 + $0x68] sm:$0xff] }
 0x377   : > { %2574 = vmatpush.msra.mxu0 %v3423_v41 }
 0x37e   : > { %3417 = vmatmul.msk.f32.gmra.mxu3 %vm2133_vm0, %v2404_v6  ;;  %v2548_v6 = vld [vmem:[%s5480_s14 + $0x30] sm:$0xff] }
 0x37f   : > { %2596 = vmatpush.msrb.mxu1 %v2548_v6 }
 0x3d9   : > { %v2361_v40 = vpop.f32.mrf.mxu3 }
 0x3e1   : > { %v2364_v14 = vpop.f32.mrf.mxu3 }
 0x3e9   : > { %v2388_v43 = vpop.f32.mrf.mxu3 }
 0x3ea   : > { %v2389_v56 = vadd.f32 %v2388_v43, %v2361_v40  ;;  %v2547_v40 = vld [vmem:[%s5480_s14 + $0x28] sm:$0xff]  ;;  %v2546_v43 = vld [vmem:[%s5480_s14 + $0x20] sm:$0xff] }
 0x3eb   : > { %2597 = vmatpush.msrb.mxu1 %v2547_v40 }
 0x3ed   : > { %2598 = vmatpush.msrb.mxu1 %v2546_v43  ;;  %v2648_v43 = vld [vmem:[%s5484_s18] sm:$0xff] }
 0x3ef   : > { %2599 = vmatpush.msrb.mxu1 %v2545_v15 }
 0x3f1   : > { %v2391_v31 = vpop.f32.mrf.mxu3  ;;  %2600 = vmatpush.msrb.mxu1 %v2544_v39  ;;  %v3538_v39 = vld [vmem:[#allocation2 + $0x38] sm:$0xff] }
 0x3f2   : > { %v2392_v8 = vadd.f32 %v2391_v31, %v2364_v14  ;;  %v3422_v14 = vld [vmem:[%s5480_s14 + $0x60] sm:$0xff]  ;;  %v3421_v31 = vld [vmem:[%s5480_s14 + $0x58] sm:$0xff] }
 0x3f3   : > { %2575 = vmatpush.msra.mxu0 %v3422_v14  ;;  %2601 = vmatpush.msrb.mxu1 %v2543_v44  ;;  %v3541_v44 = vld [vmem:[#allocation2 + $0x20] sm:$0xff] }
 0x3f5   : > { %2576 = vmatpush.msra.mxu0 %v3421_v31  ;;  %2602 = vmatpush.msrb.mxu1 %v2542_v16  ;;  %v3544_v16 = vld [vmem:[#allocation2 + $0x8] sm:$0xff] }
 0x3f7   : > { %2577 = vmatpush.msra.mxu0 %v3420_v2  ;;  %v2681_v2 = vld [vmem:[%s5486_s20] sm:$0xff] }
 0x3f9   : > { %v2427_v7 = vpop.f32.mrf.mxu3 }
 0x3fa   : > { %v2433_v10 = vadd.f32 %v2427_v7, %v2389_v56  ;;  %v3419_v56 = vld [vmem:[%s5480_s14 + $0x48] sm:$0xff] }
 0x3fb   : > { %2578 = vmatpush.msra.mxu0 %v3419_v56  ;;  %v3540_v56 = vld [vmem:[#allocation2 + $0x28] sm:$0xff] }
 0x3fc   : > { %v2439_v45 = vadd.f32 %v3519_v58, %v2433_v10 }
 0x3fe   : > { %v2453_v17 = vmul.f32 %v2451_v32, %v2439_v45 }
 0x400   : > { %v2455_v57 = vsel %vm2133_vm0, %v2453_v17, 0.0  ;;  %v2618_v17 = vld [vmem:[%s5482_s16 + $0x28] sm:$0xff] }
 0x401   : > { %v2430_v33 = vpop.f32.mrf.mxu3  ;;  %2637 = vmatpush.msra.mxu2 %v2618_v17  ;;  %v2740_v17 = vld [vmem:[%s5489_s23] sm:$0x1f] }
 0x402   : > { %v2434_v20 = vadd.f32 %v2430_v33, %v2392_v8 }
 0x404   : > { %v2440_v11 = vadd.f32 %v3519_v58, %v2434_v20  ;;  %v3418_v58 = vld [vmem:[%s5480_s14 + $0x40] sm:$0xff] }
 0x405   : > { %2579 = vmatpush.msra.mxu0 %v3418_v58  ;;  %v3543_v58 = vld [vmem:[#allocation2 + $0x10] sm:$0xff] }
 0x406   : > { %v2454_v37 = vmul.f32 %v2452_v42, %v2440_v11 }
 0x408   : > { %v2456_v18 = vsel %vm2309_vm13, %v2454_v37, 0.0 }
 0x409   : > { %v2457_v47 = vadd.f32 %v2456_v18, %v2455_v57  ;;  %v2616_v18 = vld [vmem:[%s5482_s16 + $0x18] sm:$0xff] }
 0x40b   : > { %v2458_v55 = vrot.slane %v2457_v47, 4 }
 0x40d   : > { %v2459_v30 = vadd.f32 %v2458_v55, %v2457_v47 }
 0x40f   : > { %v2460_v27 = vrot.slane %v2459_v30, 2 }
 0x411   : > { %v2461_v4 = vadd.f32 %v2460_v27, %v2459_v30  ;;  %v2615_v30 = vld [vmem:[%s5482_s16 + $0x10] sm:$0xff] }
 0x413   : > { %v2462_v3 = vrot.slane %v2461_v4, 1 }
 0x415   : > { %v2463_v38 = vadd.f32 %v2462_v3, %v2461_v4 }
 0x417   : > { %v2464_v0 = vmul.f32 0.083333336, %v2463_v38 }
 0x419   : > { %v2465_v28 = vsub.f32 %v2439_v45, %v2464_v0  ;;  %v2466_v52 = vsub.f32 %v2440_v11, %v2464_v0  ;;  %v3520_v45 = vld [vmem:[%s5478_s12] ss:$0 sm:$0xff]  ;;  %v2614_v0 = vld [vmem:[%s5482_s16 + $0x8] sm:$0xff] }
 0x41a   : > { %v2617_v11 = vld [vmem:[%s5482_s16 + $0x20] sm:$0xff] }
 0x41b   : > { %v2467_v60 = vmul.f32 %v2465_v28, %v2451_v32  ;;  %v2468_v29 = vmul.f32 %v2466_v52, %v2452_v42  ;;  %v3521_v42 = vld [vmem:[%s5479_s13] ss:$0 sm:$0xff]  ;;  %2638 = vmatpush.msra.mxu2 %v2617_v11  ;;  %v3546_v11 = vld [vmem:[#allocation2 + $0x78] sm:$0xff] }
 0x41d   : > { %v2469_v25 = vmul.f32 %v2467_v60, %v2467_v60  ;;  %v2470_v24 = vmul.f32 %v2468_v29, %v2468_v29  ;;  %2639 = vmatpush.msra.mxu2 %v2616_v18  ;;  %v3595_v18 = vmov 4  }
 0x41e   : > { %3488 = vset.pattern.permute.xlu2 %v3595_v18 }
 0x41f   : > { %v2471_v23 = vsel %vm2133_vm0, %v2469_v25, 0.0  ;;  %v2472_v34 = vsel %vm2309_vm13, %v2470_v24, 0.0  ;;  %2640 = vmatpush.msra.mxu2 %v2615_v30  ;;  %v3549_v30 = vld [vmem:[#allocation2 + $0x60] sm:$0xff] }
 0x420   : > { %v2473_v5 = vadd.f32 %v2472_v34, %v2471_v23 }
 0x421   : > { %2641 = vmatpush.msra.mxu2 %v2614_v0  ;;  %v3525_v0 = vld [vmem:[%s5487_s21] ss:$0 sm:$0xff] }
 0x422   : > { %v2474_v62 = vrot.slane %v2473_v5, 4 }
 0x424   : > { %v2475_v9 = vadd.f32 %v2474_v62, %v2473_v5 }
 0x426   : > { %v2476_v51 = vrot.slane %v2475_v9, 2 }
 0x428   : > { %v2477_v22 = vadd.f32 %v2476_v51, %v2475_v9 }
 0x42a   : > { %v2478_v49 = vrot.slane %v2477_v22, 1 }
 0x42c   : > { %v2479_v13 = vadd.f32 %v2478_v49, %v2477_v22 }
 0x42e   : > { %v2480_v21 = vmul.f32 0.083333336, %v2479_v13  ;;  %v2613_v13 = vld [vmem:[%s5482_s16] sm:$0xff] }
 0x42f   : > { %2642 = vmatpush.msra.mxu2 %v2613_v13 }
 0x430   : > { %v2481_v19 = vadd.f32 1e-05, %v2480_v21  ;;  %v2651_v21 = vld [vmem:[%s5484_s18 + $0x18] sm:$0xff] }
 0x431   : > { %2672 = vmatpush.msra.mxu3 %v2651_v21  ;;  %3433 = vmatpush.msk.msrb.mxu2 %vm1764_vm12, %v2740_v17 }
 0x432   : > { %3530 = vrsqrt.f32 %v2481_v19  ;;  %vm2488_vm2 = vweird.f32 %v2481_v19 }
 0x438   : > { %v3531_v36 = vpop.eup %3530 }
 0x439   : > { %v2483_v63 = vmul.f32 %v3531_v36, %v2481_v19  ;;  %vm2489_vm1 = vweird.f32 %v3531_v36  ;;  %v2650_v19 = vld [vmem:[%s5484_s18 + $0x10] sm:$0xff] }
 0x43a   : > { %vm2490_vm6 = vmor %vm2488_vm2, %vm2489_vm1  ;;  %2673 = vmatpush.msra.mxu3 %v2650_v19 }
 0x43b   : > { %v2484_v12 = vmul.f32 %v3531_v36, %v2483_v63  ;;  %v3523_v63 = vld [vmem:[%s5483_s17] ss:$0 sm:$0xff] }
 0x43c   : > { %2674 = vmatpush.msra.mxu3 %v2649_v48 }
 0x43d   : > { %v2485_v7 = vmul.f32 0.5, %v2484_v12 }
 0x43e   : > { %2675 = vmatpush.msra.mxu3 %v2648_v43 }
 0x43f   : > { %v2486_v10 = vsub.f32 1.5, %v2485_v7  ;;  %v3539_v7 = vld [vmem:[#allocation2 + $0x30] sm:$0xff] }
 0x441   : > { %v2487_v8 = vmul.f32 %v3531_v36, %v2486_v10  ;;  %v3542_v10 = vld [vmem:[#allocation2 + $0x18] sm:$0xff] }
 0x443   : > { %v2491_v32 = vsel %vm2490_vm6, %v3531_v36, %v2487_v8  ;;  %v2682_v36 = vld [vmem:[%s5486_s20 + $0x8] sm:$0xff]  ;;  %v3545_v8 = vld [vmem:[#allocation2] sm:$0xff] }
 0x444   : > { %v2492_v33 = vmul.f32 %v2491_v32, %v2465_v28  ;;  %v2493_v20 = vmul.f32 %v2491_v32, %v2466_v52  ;;  %2705 = vmatpush.msrb.mxu0 %v2682_v36 }
 0x446   : > { %v2498_v37 = vmul.f32 %v3520_v45, %v2492_v33  ;;  %v2499_v57 = vmul.f32 %v3520_v45, %v2493_v20  ;;  %2706 = vmatpush.msrb.mxu0 %v2681_v2  ;;  %v3524_v45 = vld [vmem:[%s5485_s19] ss:$0 sm:$0xff] }
 0x448   : > { %v2504_v47 = vadd.f32 %v3521_v42, %v2498_v37  ;;  %v2505_v55 = vadd.f32 %v3521_v42, %v2499_v57  ;;  %v2712_v42 = vld [vmem:[%s5488_s22] sm:$0x1f]  ;;  %v3547_v37 = vld [vmem:[#allocation2 + $0x70] sm:$0xff]  ;;  %v3548_v57 = vld [vmem:[#allocation2 + $0x68] sm:$0xff] }
 0x449   : > { %3431 = vmatpush.msk.msra.mxu1 %vm1764_vm12, %v2712_v42  ;;  %vm2713_vm12 = vcmask 39936  }
 0x44a   : > { %v2508_v27 = vrot.slane %v2504_v47, 1  ;;  %v2509_v4 = vrot.slane %v2505_v55, 1  ;;  %v2515_v3 = vrot.slane %v2504_v47, 2  ;;  %v2516_v38 = vrot.slane %v2505_v55, 2 }
 0x44c   : > { %v2510_v28 = vsel %vm781_vm4, %v2508_v27, %v2509_v4  ;;  %v2514_v52 = vmax.f32 %v2505_v55, %v2509_v4  ;;  %v2517_v29 = vsel %vm1017_vm5, %v2515_v3, %v2516_v38  ;;  %vm2623_vm4 = vcmask 392192   ;;  %v3550_v27 = vld [vmem:[#allocation2 + $0x58] sm:$0xff]  ;;  %v3551_v4 = vld [vmem:[#allocation2 + $0x50] sm:$0xff]  ;;  %v3552_v3 = vld [vmem:[#allocation2 + $0x48] sm:$0xff] }
 0x44d   : > { %v2513_v60 = vmax.f32 %v2504_v47, %v2510_v28  ;;  %vm2656_vm5 = vcmask 261120   ;;  %v3596_v47 = vmov 2   ;;  %v3597_v55 = vmov 0  }
 0x44e   : > { %v2521_v25 = vmax.f32 %v2514_v52, %v2516_v38  ;;  %3486 = vset.pattern.permute.xlu1 %v3596_v47  ;;  %3484 = vset.pattern.permute.xlu0 %v3597_v55  ;;  %v3553_v38 = vld [vmem:[#allocation2 + $0x40] sm:$0xff] }
 0x44f   : > { %v2520_v24 = vmax.f32 %v2513_v60, %v2517_v29 }
 0x450   : > { %v2523_v23 = vmax.f32 %v2521_v25, 0.0  ;;  %v3598_v25 = vmov 5  }
 0x451   : > { %v2522_v34 = vmax.f32 %v2520_v24, 0.0  ;;  %v3599_v24 = vmov 3  }
 0x452   : > { %2526 = vst.msk [vmem:[#allocation8 + $0x8] sm:$0xf] %vm2525_vm7, %v2523_v23  ;;  %v3600_v23 = vmov 1  }
 0x453   : > { %2524 = vst.msk [vmem:[#allocation8] sm:$0xff] %vm2133_vm0, %v2522_v34 }
 0x459   : > { %v2535_v5 = vld [vmem:[#allocation8 + $0x8] ss:$2 sm:$0x3] }
 0x45a   : > { %v2527_v62 = vld [vmem:[#allocation8] ss:$2 sm:$0x3]  ;;  %2539 = vst.msk [vmem:[#allocation9 + $0x1] sm:$0x1] %vm2531_vm8, %v2535_v5  ;;  %v2537_v9 = vrot.slane %v2535_v5, 1 }
 0x45b   : > { %2532 = vst.msk [vmem:[#allocation9] sm:$0x1] %vm2531_vm8, %v2527_v62  ;;  %v2529_v51 = vrot.slane %v2527_v62, 1  ;;  %v5632_v5 = vld [vmem:[#allocation13_spill] sm:$0xff]  ;;  %v5633_v62 = vld [vmem:[#allocation26_spill] sm:$0xff] }
 0x45c   : > { %2540 = vst.msk [vmem:[#allocation9 + $0x3] sm:$0x1] %vm2531_vm8, %v2537_v9  ;;  %v5634_v9 = vlaneseq }
 0x45d   : > { %2533 = vst.msk [vmem:[#allocation9 + $0x2] sm:$0x1] %vm2531_vm8, %v2529_v51 }
 0x45e   : > { %v2765_v51 = vand.u32 127, %v5634_v9 }
 0x462   : > { %v2541_v22 = vld [vmem:[#allocation9] sm:$0x3] }
 0x463   : > { %3427 = vmatmul.msk.f32.vlgmr.msrb.gmra.mxu1 %vm2133_vm0, %v2541_v22  ;;  %v5307_v22 = vcvt.s32.f32 %v2765_v51 }
 0x464   : > { %v2551_v49 = vld [vmem:[#allocation9 + $0x2] sm:$0x3] }
 0x465   : > { %3426 = vmatmul.msk.f32.vlgmr.msra.gmra.mxu0 %vm2133_vm0, %v2551_v49  ;;  %v2767_v49 = vmul.f32 0.015873017, %v5307_v22 }
 0x466   : > { %3156 = vmatpush.msra.mxu0 %v3538_v39 }
 0x467   : > { %v2768_v13 = vmul.f32 6.0, %v2767_v49 }
 0x468   : > { %3157 = vmatpush.msra.mxu0 %v3539_v7 }
 0x469   : > { %v2769_v21 = vfloor.f32 %v2768_v13  ;;  %v5637_v13 = vld [vmem:[#allocation24_spill] sm:$0xff] }
 0x46a   : > { %3158 = vmatpush.msra.mxu0 %v3540_v56 }
 0x46b   : > { %v2770_v19 = vmax.f32 %v2769_v21, 0.0 }
 0x46c   : > { %3159 = vmatpush.msra.mxu0 %v3541_v44 }
 0x46e   : > { %3160 = vmatpush.msra.mxu0 %v3542_v10 }
 0x470   : > { %3161 = vmatpush.msra.mxu0 %v3543_v58 }
 0x472   : > { %3162 = vmatpush.msra.mxu0 %v3544_v16 }
 0x474   : > { %3163 = vmatpush.msra.mxu0 %v3545_v8 }
 0x4e0   : > { %v2604_v46 = vpop.f32.mrf.mxu1 }
 0x4e2   : > { %v2581_v6 = vpop.f32.mrf.mxu0 }
 0x4e3   : > { %v2605_v41 = vadd.f32 %v2604_v46, %v2581_v6  ;;  %v2771_v46 = vmin.f32 %v2770_v19, 5.0 }
 0x4e5   : > { %v2611_v40 = vadd.f32 %v3522_v26, %v2605_v41  ;;  %vm2772_vm10 = vcmp.eq.f32.partialorder %v2771_v46, 0.0  ;;  %vm2785_vm11 = vcmp.eq.f32.partialorder %v2771_v46, 1.0  ;;  %vm2796_vm13 = vcmp.eq.f32.partialorder %v2771_v46, 2.0 }
 0x4e6   : > { %vm2807_vm14 = vcmp.eq.f32.partialorder %v2771_v46, 3.0  ;;  %vm2818_vm15 = vcmp.eq.f32.partialorder %v2771_v46, 4.0  ;;  %vm2829_vm1 = vcmp.eq.f32.partialorder %v2771_v46, 5.0 }
 0x4e7   : > { %v2612_v14 = vmax.f32 %v2611_v40, 0.0 }
 0x4e9   : > { %3428 = vmatmul.msk.f32.vlgmr.msra.gmra.mxu2 %vm2623_vm4, %v2612_v14 }
 0x4ea   : > { %3257 = vmatpush.msra.mxu2 %v3546_v11 }
 0x4ec   : > { %3258 = vmatpush.msra.mxu2 %v3547_v37 }
 0x4ee   : > { %3259 = vmatpush.msra.mxu2 %v3548_v57 }
 0x4f0   : > { %3260 = vmatpush.msra.mxu2 %v3549_v30 }
 0x4f2   : > { %3261 = vmatpush.msra.mxu2 %v3550_v27 }
 0x4f4   : > { %3262 = vmatpush.msra.mxu2 %v3551_v4 }
 0x4f6   : > { %3263 = vmatpush.msra.mxu2 %v3552_v3 }
 0x4f8   : > { %3264 = vmatpush.msra.mxu2 %v3553_v38 }
 0x56c   : > { %v2644_v31 = vpop.f32.mrf.mxu2 }
 0x56d   : > { %v2645_v15 = vadd.f32 %v3523_v63, %v2644_v31 }
 0x56f   : > { %v2647_v12 = vmax.f32 %v2645_v15, 0.0 }
 0x571   : > { %3429 = vmatmul.msk.f32.vlgmr.msra.gmra.mxu3 %vm2656_vm5, %v2647_v12 }
 0x5f4   : > { %v2677_v32 = vpop.f32.mrf.mxu3 }
 0x5f5   : > { %v2678_v33 = vadd.f32 %v3524_v45, %v2677_v32 }
 0x5f7   : > { %v2680_v20 = vmax.f32 %v2678_v33, 0.0 }
 0x5f9   : > { %3430 = vmatmul.msk.f32.vlgmr.msrb.gmra.mxu0 %vm2687_vm9, %v2680_v20 }
 0x676   : > { %v2708_v28 = vpop.f32.mrf.mxu0 }
 0x677   : > { %v2709_v52 = vadd.f32 %v3525_v0, %v2708_v28 }
 0x679   : > { %3532 = vtanh.f32 %v2709_v52 }
 0x67f   : > { %v3533_v60 = vpop.eup %3532 }
 0x680   : > { %3432 = vmatmul.msk.f32.vlgmr.msra.gmra.mxu1 %vm2713_vm12, %v3533_v60  ;;  %3434 = vmatmul.msk.f32.vlgmr.msrb.gmra.mxu2 %vm2713_vm12, %v3533_v60 }
 0x6fd   : > { %v2737_v29 = vpop.f32.mrf.mxu1 }
 0x6fe   : > { %2820 = vperm.xlu2 %3488, %v2737_v29   ;;  %2798 = vperm.xlu1 %3486, %v2737_v29  }
 0x6ff   : > { %2775 = vperm.xlu0 %3484, %v2737_v29  }
 0x703   : > { %v2761_v34 = vpop.f32.mrf.mxu2 }
 0x706   : > { %3489 = vset.pattern.permute.xlu2 %v3598_v25  ;;  %3487 = vset.pattern.permute.xlu1 %v3599_v24 }
 0x707   : > { %3485 = vset.pattern.permute.xlu0 %v3600_v23  ;;  %2831 = vperm.xlu2 %3489, %v2737_v29  }
 0x708   : > { %2809 = vperm.xlu1 %3487, %v2737_v29   ;;  %2787 = vperm.xlu0 %3485, %v2737_v29  }
 0x70f   : > { %3491 = vset.pattern.permute.xlu2 %v3600_v23 }
 0x710   : > { %3490 = vset.pattern.permute.xlu1 %v3597_v55  ;;  %3492 = vset.pattern.permute.xlu0 %v3596_v47 }
 0x711   : > { %2792 = vperm.xlu2 %3491, %v2761_v34   ;;  %2781 = vperm.xlu1 %3490, %v2761_v34  }
 0x712   : > { %2803 = vperm.xlu0 %3492, %v2761_v34  }
 0x719   : > { %3494 = vset.pattern.permute.xlu2 %v3595_v18  ;;  %3493 = vset.pattern.permute.xlu1 %v3599_v24 }
 0x71a   : > { %2825 = vperm.xlu2 %3494, %v2761_v34   ;;  %2814 = vperm.xlu1 %3493, %v2761_v34  }
 0x71b   : > { %3497 = vset.pattern.permute.xlu0 %v5632_v5 }
 0x722   : > { %3495 = vset.pattern.permute.xlu1 %v3598_v25  ;;  %3496 = vset.pattern.permute.xlu2 %v5632_v5 }
 0x723   : > { %2836 = vperm.xlu1 %3495, %v2761_v34  }
 0x72b   : > { %3498 = vset.pattern.permute.xlu1 %v5633_v62 }
 0x758   : > { %v2821_v6 = vpop.permute.xlu2 %2820 }
 0x761   : > { %v2832_v31 = vpop.permute.xlu2 %2831 }
 0x76b   : > { %v2793_v58 = vpop.permute.xlu2 %2792 }
 0x770   : > { %v2799_v48 = vpop.permute.xlu1 %2798 }
 0x771   : > { %v2776_v26 = vpop.permute.xlu0 %2775 }
 0x772   : > { %v2778_v41 = vsel %vm2772_vm10, %v2776_v26, 0.0 }
 0x774   : > { %v2826_v4 = vpop.permute.xlu2 %2825 }
 0x77a   : > { %v2810_v40 = vpop.permute.xlu1 %2809  ;;  %v2788_v14 = vpop.permute.xlu0 %2787 }
 0x77b   : > { %v2790_v43 = vsel %vm2785_vm11, %v2788_v14, %v2778_v41 }
 0x77c   : > { %v2801_v36 = vsel %vm2796_vm13, %v2799_v48, %v2790_v43 }
 0x77d   : > { %v2812_v63 = vsel %vm2807_vm14, %v2810_v40, %v2801_v36 }
 0x77e   : > { %v2823_v15 = vsel %vm2818_vm15, %v2821_v6, %v2812_v63 }
 0x77f   : > { %v2834_v12 = vsel %vm2829_vm1, %v2832_v31, %v2823_v15 }
 0x780   : > { %v2842_v2 = vand.u32 2147483647, %v2834_v12  ;;  %v2840_v44 = vmul.f32 1.442695, %v2834_v12 }
 0x782   : > { %vm5316_vm2 = vcmp.lt.f32.partialorder %v2842_v2, 1e-06 }
 0x783   : > { %v2782_v7 = vpop.permute.xlu1 %2781  ;;  %v2845_v56 = vsel %vm5316_vm2, 1.0, %v2834_v12 }
 0x784   : > { %3534 = vrcp.f32 %v2845_v56  ;;  %v2784_v16 = vsel %vm2772_vm10, %v2782_v7, 0.0  ;;  %v2857_v20 = vand.u32 2147483648, %v2845_v56  ;;  %v2855_v17 = vand.u32 2147483647, %v2845_v56  ;;  %v2804_v37 = vpop.permute.xlu0 %2803  ;;  %v5638_v7 = vld [vmem:[#allocation27_spill] sm:$0xff] }
 0x785   : > { %3536 = vpow2.f32 %v2840_v44  ;;  %v2795_v33 = vsel %vm2785_vm11, %v2793_v58, %v2784_v16  ;;  %vm2851_vm7 = vweird.f32 %v2845_v56 }
 0x786   : > { %v2806_v57 = vsel %vm2796_vm13, %v2804_v37, %v2795_v33  ;;  %v2858_v55 = vor.u32 1.1754944e-38, %v2857_v20  ;;  %vm2856_vm4 = vcmp.eq.f32.partialorder %v2855_v17, 8.507059e+37 }
 0x78a   : > { %v3535_v10 = vpop.eup %3534 }
 0x78b   : > { %v2847_v8 = vmul.f32 %v3535_v10, %v2845_v56  ;;  %vm2852_vm6 = vweird.f32 %v3535_v10  ;;  %v3537_v11 = vpop.eup %3536  ;;  %v5639_v56 = vld [vmem:[#allocation31_spill] sm:$0xff] }
 0x78c   : > { %v2815_v45 = vpop.permute.xlu1 %2814  ;;  %vm2853_vm8 = vmor %vm2851_vm7, %vm2852_vm6  ;;  %v3435_v30 = vadd.f32 -1.0, %v3537_v11  ;;  %v2862_v29 = vmul.f32 %v3537_v11, %v2767_v49 }
 0x78d   : > { %v2848_v32 = vsub.f32 1.0, %v2847_v8  ;;  %v2817_v47 = vsel %vm2807_vm14, %v2815_v45, %v2806_v57 }
 0x78e   : > { %v2828_v0 = vsel %vm2818_vm15, %v2826_v4, %v2817_v47 }
 0x78f   : > { %v2849_v42 = vmul.f32 %v3535_v10, %v2848_v32 }
 0x791   : > { %v2850_v18 = vadd.f32 %v3535_v10, %v2849_v42 }
 0x793   : > { %v2854_v27 = vsel %vm2853_vm8, %v3535_v10, %v2850_v18 }
 0x794   : > { %v2859_v3 = vsel %vm2856_vm4, %v2858_v55, %v2854_v27 }
 0x795   : > { %v2837_v38 = vpop.permute.xlu1 %2836  ;;  %v2860_v28 = vmul.f32 %v3435_v30, %v2859_v3 }
 0x796   : > { %v2839_v52 = vsel %vm2829_vm1, %v2837_v38, %v2828_v0 }
 0x797   : > { %v2861_v60 = vsel %vm5316_vm2, 1.0, %v2860_v28 }
 0x798   : > { %v2863_v25 = vmul.f32 %v2861_v60, %v2839_v52 }
 0x79a   : > { %v2864_v24 = vadd.f32 %v2863_v25, %v2862_v29 }
 0x79c   : > { %v2865_v23 = vmax.f32 %v2864_v24, 0.0 }
 0x79e   : > { %v2866_v34 = vmin.f32 %v2865_v23, 1.0 }
 0x7a0   : > { %v2867_v5 = vmul.f32 63.0, %v2866_v34 }
 0x7a2   : > { %v5330_v9 = vperm.slane %v2867_v5, 0  ;;  %v5332_v51 = vperm.slane %v2867_v5, 1  ;;  %v2869_v26 = vrot.slane %v2867_v5, 1 }
 0x7a4   : > { %2998 = vperm.xlu1 %3498, %v5332_v51   ;;  %2992 = vperm.xlu2 %3496, %v5332_v51   ;;  %v2881_v21 = vsub.f32 %v5330_v9, %v5637_v13  ;;  %v2880_v19 = vsub.f32 %v5330_v9, %v5630_v59  ;;  %v2879_v49 = vsub.f32 %v5330_v9, %v5629_v61  ;;  %v5349_v31 = vperm.slane %v2869_v26, 0 }
 0x7a5   : > { %2943 = vperm.xlu0 %3497, %v5330_v9   ;;  %v2878_v48 = vsub.f32 %v5330_v9, %v5627_v53  ;;  %v2877_v40 = vsub.f32 %v5330_v9, %v5625_v35  ;;  %v2876_v63 = vsub.f32 %v5330_v9, %v5623_v54  ;;  %v2875_v39 = vsub.f32 %v5330_v9, %v5621_v1 }
 0x7a6   : > { %v2897_v46 = vand.u32 2147483647, %v2881_v21  ;;  %v2896_v6 = vand.u32 2147483647, %v2880_v19  ;;  %v2895_v41 = vand.u32 2147483647, %v2879_v49  ;;  %v2874_v16 = vsub.f32 %v5330_v9, %v5620_v50 }
 0x7a7   : > { %v2894_v36 = vand.u32 2147483647, %v2878_v48  ;;  %v2893_v2 = vand.u32 2147483647, %v2877_v40  ;;  %v2892_v58 = vand.u32 2147483647, %v2876_v63  ;;  %v2889_v8 = vsub.f32 %v5349_v31, %v5637_v13 }
 0x7a8   : > { %v2913_v14 = vsub.f32 1.0, %v2897_v46  ;;  %v2912_v43 = vsub.f32 1.0, %v2896_v6  ;;  %v2911_v12 = vsub.f32 1.0, %v2895_v41  ;;  %v2891_v33 = vand.u32 2147483647, %v2875_v39  ;;  %v5641_v40 = vld [vmem:[#allocation14_spill] sm:$0xff] }
 0x7a9   : > { %v2910_v10 = vsub.f32 1.0, %v2894_v36  ;;  %v2909_v32 = vsub.f32 1.0, %v2893_v2  ;;  %v2888_v20 = vsub.f32 %v5349_v31, %v5630_v59  ;;  %v2908_v42 = vsub.f32 1.0, %v2892_v58 }
 0x7aa   : > { %v2929_v15 = vmax.f32 %v2913_v14, 0.0  ;;  %v2928_v44 = vmax.f32 %v2912_v43, 0.0  ;;  %v2927_v45 = vmax.f32 %v2911_v12, 0.0  ;;  %v2890_v17 = vand.u32 2147483647, %v2874_v16  ;;  %v5642_v14 = vld [vmem:[#allocation19_spill] sm:$0xff] }
 0x7ab   : > { %v2905_v11 = vand.u32 2147483647, %v2889_v8  ;;  %v2887_v37 = vsub.f32 %v5349_v31, %v5629_v61  ;;  %v2925_v57 = vmax.f32 %v2909_v32, 0.0  ;;  %v2907_v18 = vsub.f32 1.0, %v2891_v33  ;;  %v5643_v43 = vld [vmem:[#allocation17_spill] sm:$0xff] }
 0x7ac   : > { %3500 = vset.pattern.permute.xlu1 %v5638_v7  ;;  %3499 = vset.pattern.permute.xlu2 %v5633_v62  ;;  %v2926_v62 = vmax.f32 %v2910_v10, 0.0  ;;  %v2904_v47 = vand.u32 2147483647, %v2888_v20  ;;  %v2886_v55 = vsub.f32 %v5349_v31, %v5627_v53  ;;  %v2924_v59 = vmax.f32 %v2908_v42, 0.0 }
 0x7ad   : > { %3502 = vset.pattern.permute.xlu0 %v5639_v56  ;;  %3112 = vmatpush.msrb.mxu3 %v2929_v15  ;;  %v2906_v30 = vsub.f32 1.0, %v2890_v17  ;;  %v2921_v27 = vsub.f32 1.0, %v2905_v11  ;;  %v2903_v4 = vand.u32 2147483647, %v2887_v37  ;;  %v2885_v61 = vsub.f32 %v5349_v31, %v5625_v35 }
 0x7ae   : > { %v2923_v3 = vmax.f32 %v2907_v18, 0.0  ;;  %v2920_v38 = vsub.f32 1.0, %v2904_v47  ;;  %v2902_v0 = vand.u32 2147483647, %v2886_v55  ;;  %v2884_v28 = vsub.f32 %v5349_v31, %v5623_v54  ;;  %v5640_v54 = vld [vmem:[#allocation15_spill] sm:$0xff] }
 0x7af   : > { %3113 = vmatpush.msrb.mxu3 %v2928_v44  ;;  %v2922_v52 = vmax.f32 %v2906_v30, 0.0  ;;  %v2937_v53 = vmax.f32 %v2921_v27, 0.0  ;;  %v2919_v60 = vsub.f32 1.0, %v2903_v4  ;;  %v2901_v29 = vand.u32 2147483647, %v2885_v61 }
 0x7b0   : > { %v2883_v25 = vsub.f32 %v5349_v31, %v5621_v1  ;;  %v2936_v35 = vmax.f32 %v2920_v38, 0.0  ;;  %v2918_v24 = vsub.f32 1.0, %v2902_v0  ;;  %v2900_v23 = vand.u32 2147483647, %v2884_v28 }
 0x7b1   : > { %3114 = vmatpush.msrb.mxu3 %v2927_v45  ;;  %v2882_v34 = vsub.f32 %v5349_v31, %v5620_v50  ;;  %v2935_v5 = vmax.f32 %v2919_v60, 0.0  ;;  %v2917_v13 = vsub.f32 1.0, %v2901_v29 }
 0x7b2   : > { %v2899_v21 = vand.u32 2147483647, %v2883_v25  ;;  %v2934_v1 = vmax.f32 %v2918_v24, 0.0  ;;  %v2916_v19 = vsub.f32 1.0, %v2900_v23 }
 0x7b3   : > { %3115 = vmatpush.msrb.mxu3 %v2926_v62  ;;  %v2898_v49 = vand.u32 2147483647, %v2882_v34  ;;  %v2933_v48 = vmax.f32 %v2917_v13, 0.0 }
 0x7b4   : > { %3004 = vperm.xlu1 %3500, %v5332_v51   ;;  %2949 = vperm.xlu2 %3499, %v5330_v9   ;;  %v2915_v26 = vsub.f32 1.0, %v2899_v21  ;;  %v2932_v46 = vmax.f32 %v2916_v19, 0.0 }
 0x7b5   : > { %3010 = vperm.xlu0 %3502, %v5332_v51   ;;  %3116 = vmatpush.msrb.mxu3 %v2925_v57  ;;  %v2914_v50 = vsub.f32 1.0, %v2898_v49 }
 0x7b6   : > { %v2931_v6 = vmax.f32 %v2915_v26, 0.0 }
 0x7b7   : > { %3117 = vmatpush.msrb.mxu3 %v2924_v59  ;;  %v2930_v41 = vmax.f32 %v2914_v50, 0.0 }
 0x7b9   : > { %3118 = vmatpush.msrb.mxu3 %v2923_v3 }
 0x7bb   : > { %3119 = vmatpush.msrb.mxu3 %v2922_v52 }
 0x7bc   : > { %3503 = vset.pattern.permute.xlu1 %v5639_v56  ;;  %3501 = vset.pattern.permute.xlu2 %v5638_v7 }
 0x7bd   : > { %3213 = vmatpush.msra.mxu3 %v2937_v53  ;;  %3507 = vset.pattern.permute.xlu0 %v5640_v54 }
 0x7bf   : > { %3214 = vmatpush.msra.mxu3 %v2936_v35 }
 0x7c1   : > { %3215 = vmatpush.msra.mxu3 %v2935_v5 }
 0x7c3   : > { %3216 = vmatpush.msra.mxu3 %v2934_v1 }
 0x7c4   : > { %2961 = vperm.xlu1 %3503, %v5330_v9   ;;  %2955 = vperm.xlu2 %3501, %v5330_v9  }
 0x7c5   : > { %3217 = vmatpush.msra.mxu3 %v2933_v48  ;;  %2973 = vperm.xlu0 %3507, %v5330_v9  }
 0x7c7   : > { %3218 = vmatpush.msra.mxu3 %v2932_v46 }
 0x7c9   : > { %3219 = vmatpush.msra.mxu3 %v2931_v6  ;;  %v3100_v6 = vld [vmem:[#allocation3] sm:$0x3] }
 0x7ca   : > { %3436 = vmatmul.msk.f32.vlgmr.msrb.gmra.mxu3 %vm2133_vm0, %v3100_v6 }
 0x7cb   : > { %3220 = vmatpush.msra.mxu3 %v2930_v41 }
 0x7cc   : > { %3505 = vset.pattern.permute.xlu1 %v5641_v40  ;;  %3504 = vset.pattern.permute.xlu2 %v5641_v40 }
 0x7cd   : > { %3512 = vset.pattern.permute.xlu0 %v5642_v14 }
 0x7d4   : > { %2967 = vperm.xlu1 %3505, %v5330_v9   ;;  %3016 = vperm.xlu2 %3504, %v5332_v51  }
 0x7dc   : > { %3508 = vset.pattern.permute.xlu1 %v5643_v43  ;;  %3506 = vset.pattern.permute.xlu2 %v5640_v54 }
 0x7e4   : > { %3028 = vperm.xlu1 %3508, %v5332_v51   ;;  %3022 = vperm.xlu2 %3506, %v5332_v51  }
 0x7ec   : > { %3510 = vset.pattern.permute.xlu1 %v5642_v14  ;;  %3509 = vset.pattern.permute.xlu2 %v5643_v43  ;;  %v3201_v43 = vld [vmem:[#allocation3 + $0x2] sm:$0x3] }
 0x7ed   : > { %3445 = vmatmul.msk.f32.vlgmr.msra.gmra.mxu3 %vm2133_vm0, %v3201_v43 }
 0x7f4   : > { %3034 = vperm.xlu1 %3510, %v5332_v51   ;;  %2979 = vperm.xlu2 %3509, %v5330_v9  }
 0x7fc   : > { %3511 = vset.pattern.permute.xlu2 %v5642_v14 }
 0x7fe   : > { %v2993_v36 = vpop.permute.xlu2 %2992 }
 0x7ff   : > { %v3044_v63 = vsub.f32 %v2993_v36, %v5307_v22 }
 0x801   : > { %v3060_v31 = vand.u32 2147483647, %v3044_v63 }
 0x803   : > { %v3076_v15 = vsub.f32 1.0, %v3060_v31 }
 0x804   : > { %2985 = vperm.xlu2 %3511, %v5330_v9  }
 0x805   : > { %v3092_v12 = vmax.f32 %v3076_v15, 0.0 }
 0x807   : > { %3446 = vmatmul.msk.f32.vlgmr.msra.gmra.mxu2 %vm2133_vm0, %v3092_v12 }
 0x80e   : > { %v2950_v39 = vpop.permute.xlu2 %2949 }
 0x80f   : > { %v3037_v10 = vsub.f32 %v2950_v39, %v5307_v22 }
 0x811   : > { %v3053_v32 = vand.u32 2147483647, %v3037_v10 }
 0x813   : > { %v3069_v9 = vsub.f32 1.0, %v3053_v32 }
 0x815   : > { %v3085_v42 = vmax.f32 %v3069_v9, 0.0 }
 0x816   : > { %v2999_v2 = vpop.permute.xlu1 %2998 }
 0x817   : > { %v3045_v7 = vsub.f32 %v2999_v2, %v5307_v22  ;;  %v2944_v56 = vpop.permute.xlu0 %2943 }
 0x818   : > { %v3036_v51 = vsub.f32 %v2944_v56, %v5307_v22 }
 0x819   : > { %v3061_v44 = vand.u32 2147483647, %v3045_v7 }
 0x81a   : > { %v3052_v58 = vand.u32 2147483647, %v3036_v51 }
 0x81b   : > { %v3077_v16 = vsub.f32 1.0, %v3061_v44 }
 0x81c   : > { %v3068_v8 = vsub.f32 1.0, %v3052_v58 }
 0x81d   : > { %v3093_v45 = vmax.f32 %v3077_v16, 0.0 }
 0x81e   : > { %v3084_v33 = vmax.f32 %v3068_v8, 0.0  ;;  %v2956_v20 = vpop.permute.xlu2 %2955 }
 0x81f   : > { %3447 = vmatmul.msk.f32.gmra.mxu2 %vm2133_vm0, %v3093_v45  ;;  %v3038_v62 = vsub.f32 %v2956_v20, %v5307_v22 }
 0x820   : > { %3437 = vmatmul.msk.f32.vlgmr.msra.gmra.mxu0 %vm2133_vm0, %v3084_v33 }
 0x821   : > { %v3054_v17 = vand.u32 2147483647, %v3038_v62 }
 0x823   : > { %v3070_v55 = vsub.f32 1.0, %v3054_v17 }
 0x825   : > { %v3086_v4 = vmax.f32 %v3070_v55, 0.0 }
 0x826   : > { %v3005_v11 = vpop.permute.xlu1 %3004 }
 0x827   : > { %v3046_v37 = vsub.f32 %v3005_v11, %v5307_v22  ;;  %v3011_v57 = vpop.permute.xlu0 %3010 }
 0x828   : > { %3438 = vmatmul.msk.f32.gmra.mxu0 %vm2133_vm0, %v3085_v42  ;;  %v3047_v47 = vsub.f32 %v3011_v57, %v5307_v22 }
 0x829   : > { %v3062_v18 = vand.u32 2147483647, %v3046_v37 }
 0x82a   : > { %v3063_v27 = vand.u32 2147483647, %v3047_v47 }
 0x82b   : > { %v3078_v59 = vsub.f32 1.0, %v3062_v18 }
 0x82c   : > { %v3079_v3 = vsub.f32 1.0, %v3063_v27 }
 0x82d   : > { %v3094_v30 = vmax.f32 %v3078_v59, 0.0 }
 0x82e   : > { %v3017_v61 = vpop.permute.xlu2 %3016  ;;  %v3095_v0 = vmax.f32 %v3079_v3, 0.0 }
 0x82f   : > { %3448 = vmatmul.msk.f32.gmra.mxu2 %vm2133_vm0, %v3094_v30  ;;  %v3048_v38 = vsub.f32 %v3017_v61, %v5307_v22 }
 0x830   : > { %3439 = vmatmul.msk.f32.gmra.mxu0 %vm2133_vm0, %v3086_v4 }
 0x831   : > { %v3064_v28 = vand.u32 2147483647, %v3048_v38 }
 0x833   : > { %v3080_v60 = vsub.f32 1.0, %v3064_v28 }
 0x835   : > { %v3096_v35 = vmax.f32 %v3080_v60, 0.0 }
 0x836   : > { %v2962_v52 = vpop.permute.xlu1 %2961 }
 0x837   : > { %v3039_v53 = vsub.f32 %v2962_v52, %v5307_v22  ;;  %3449 = vmatmul.msk.f32.gmra.mxu2 %vm2133_vm0, %v3095_v0  ;;  %v2974_v13 = vpop.permute.xlu0 %2973 }
 0x838   : > { %v3041_v49 = vsub.f32 %v2974_v13, %v5307_v22 }
 0x839   : > { %v3055_v29 = vand.u32 2147483647, %v3039_v53 }
 0x83a   : > { %v3057_v46 = vand.u32 2147483647, %v3041_v49 }
 0x83b   : > { %v3071_v25 = vsub.f32 1.0, %v3055_v29 }
 0x83c   : > { %v3073_v40 = vsub.f32 1.0, %v3057_v46 }
 0x83d   : > { %v3087_v24 = vmax.f32 %v3071_v25, 0.0 }
 0x83e   : > { %v3023_v23 = vpop.permute.xlu2 %3022  ;;  %v3089_v36 = vmax.f32 %v3073_v40, 0.0 }
 0x83f   : > { %3440 = vmatmul.msk.f32.gmra.mxu0 %vm2133_vm0, %v3087_v24  ;;  %3450 = vmatmul.msk.f32.gmra.mxu2 %vm2133_vm0, %v3096_v35  ;;  %v3049_v34 = vsub.f32 %v3023_v23, %v5307_v22 }
 0x841   : > { %v3065_v54 = vand.u32 2147483647, %v3049_v34 }
 0x843   : > { %v3081_v5 = vsub.f32 1.0, %v3065_v54 }
 0x845   : > { %v3097_v21 = vmax.f32 %v3081_v5, 0.0 }
 0x846   : > { %v2968_v1 = vpop.permute.xlu1 %2967 }
 0x847   : > { %v3040_v19 = vsub.f32 %v2968_v1, %v5307_v22  ;;  %3451 = vmatmul.msk.f32.gmra.mxu2 %vm2133_vm0, %v3097_v21 }
 0x849   : > { %v3056_v48 = vand.u32 2147483647, %v3040_v19 }
 0x84b   : > { %v3072_v26 = vsub.f32 1.0, %v3056_v48 }
 0x84d   : > { %v3088_v50 = vmax.f32 %v3072_v26, 0.0  ;;  %v3121_v59 = vpop.f32.mrf.mxu3 }
 0x84e   : > { %v2980_v41 = vpop.permute.xlu2 %2979 }
 0x84f   : > { %3441 = vmatmul.msk.f32.gmra.mxu0 %vm2133_vm0, %v3088_v50  ;;  %v3042_v14 = vsub.f32 %v2980_v41, %v5307_v22 }
 0x851   : > { %v3058_v63 = vand.u32 2147483647, %v3042_v14 }
 0x853   : > { %v3074_v12 = vsub.f32 1.0, %v3058_v63 }
 0x855   : > { %v3090_v7 = vmax.f32 %v3074_v12, 0.0 }
 0x856   : > { %v3029_v31 = vpop.permute.xlu1 %3028 }
 0x857   : > { %v3050_v15 = vsub.f32 %v3029_v31, %v5307_v22  ;;  %3442 = vmatmul.msk.f32.gmra.mxu0 %vm2133_vm0, %v3089_v36 }
 0x859   : > { %v3066_v2 = vand.u32 2147483647, %v3050_v15 }
 0x85b   : > { %v3082_v39 = vsub.f32 1.0, %v3066_v2 }
 0x85d   : > { %v3098_v56 = vmax.f32 %v3082_v39, 0.0 }
 0x85e   : > { %v2986_v51 = vpop.permute.xlu2 %2985 }
 0x85f   : > { %3443 = vmatmul.msk.f32.gmra.mxu0 %vm2133_vm0, %v3090_v7  ;;  %3452 = vmatmul.msk.f32.gmra.mxu2 %vm2133_vm0, %v3098_v56  ;;  %v3043_v44 = vsub.f32 %v2986_v51, %v5307_v22 }
 0x861   : > { %v3059_v10 = vand.u32 2147483647, %v3043_v44 }
 0x863   : > { %v3075_v58 = vsub.f32 1.0, %v3059_v10 }
 0x865   : > { %v3091_v16 = vmax.f32 %v3075_v58, 0.0 }
 0x866   : > { %v3035_v8 = vpop.permute.xlu1 %3034 }
 0x867   : > { %v3051_v45 = vsub.f32 %v3035_v8, %v5307_v22  ;;  %3444 = vmatmul.msk.f32.gmra.mxu0 %vm2133_vm0, %v3091_v16 }
 0x869   : > { %v3067_v32 = vand.u32 2147483647, %v3051_v45 }
 0x86b   : > { %v3083_v33 = vsub.f32 1.0, %v3067_v32 }
 0x86d   : > { %v3099_v20 = vmax.f32 %v3083_v33, 0.0 }
 0x86f   : > { %3453 = vmatmul.msk.f32.gmra.mxu2 %vm2133_vm0, %v3099_v20  ;;  %vm3189_vm0 = vcmask 517120  }
 0x870   : > { %3190 = vst.msk [vmem:[#allocation3] sm:$0x3] %vm3189_vm0, %v3121_v59  ;;  %v3222_v27 = vpop.f32.mrf.mxu3 }
 0x871   : > { %3199 = vst.msk [vmem:[#allocation10] sm:$0x3] %vm3189_vm0, %v3121_v59 }
 0x872   : > { %3290 = vst.msk [vmem:[#allocation3 + $0x2] sm:$0x3] %vm3189_vm0, %v3222_v27 }
 0x873   : > { %3300 = vst.msk [vmem:[#allocation10 + $0x2] sm:$0x3] %vm3189_vm0, %v3222_v27 }
 0x874   : > { %3461 = dma.vmem_to_hbm [thread:$0]  (%p5449_p4), %s3307_s0, 64, %s3309_s26, [#allocation11], %s3602_s8, %s3602_s8, %s3603_s1  }
 0x88a   : > { %v3266_v9 = vpop.f32.mrf.mxu2 }
 0x88b   : > { %3291 = vst.msk [vmem:[#allocation2 + $0x40] sm:$0xff] %vm813_vm3, %v3266_v9 }
 0x89d   : > { %v3165_v62 = vpop.f32.mrf.mxu0 }
 0x89e   : > { %3191 = vst.msk [vmem:[#allocation2] sm:$0xff] %vm813_vm3, %v3165_v62 }
 0x8a2   : > { %v3269_v42 = vpop.f32.mrf.mxu2 }
 0x8a3   : > { %3292 = vst.msk [vmem:[#allocation2 + $0x48] sm:$0xff] %vm813_vm3, %v3269_v42 }
 0x8a5   : > { %v3168_v17 = vpop.f32.mrf.mxu0 }
 0x8a6   : > { %3192 = vst.msk [vmem:[#allocation2 + $0x8] sm:$0xff] %vm813_vm3, %v3168_v17 }
 0x8ad   : > { %v3171_v22 = vpop.f32.mrf.mxu0 }
 0x8ae   : > { %3193 = vst.msk [vmem:[#allocation2 + $0x10] sm:$0xff] %vm813_vm3, %v3171_v22 }
 0x8b2   : > { %v3272_v11 = vpop.f32.mrf.mxu2 }
 0x8b3   : > { %3293 = vst.msk [vmem:[#allocation2 + $0x50] sm:$0xff] %vm813_vm3, %v3272_v11 }
 0x8ba   : > { %v3275_v37 = vpop.f32.mrf.mxu2 }
 0x8bb   : > { %3294 = vst.msk [vmem:[#allocation2 + $0x58] sm:$0xff] %vm813_vm3, %v3275_v37 }
 0x8bc   : > { %v3174_v57 = vpop.f32.mrf.mxu0 }
 0x8bd   : > { %3194 = vst.msk [vmem:[#allocation2 + $0x18] sm:$0xff] %vm813_vm3, %v3174_v57 }
 0x8c2   : > { %v3278_v18 = vpop.f32.mrf.mxu2 }
 0x8c3   : > { %3295 = vst.msk [vmem:[#allocation2 + $0x60] sm:$0xff] %vm813_vm3, %v3278_v18 }
 0x8ca   : > { %v3281_v47 = vpop.f32.mrf.mxu2 }
 0x8cb   : > { %3296 = vst.msk [vmem:[#allocation2 + $0x68] sm:$0xff] %vm813_vm3, %v3281_v47 }
 0x8cc   : > { %v3177_v55 = vpop.f32.mrf.mxu0 }
 0x8cd   : > { %3195 = vst.msk [vmem:[#allocation2 + $0x20] sm:$0xff] %vm813_vm3, %v3177_v55 }
 0x8d4   : > { %v3180_v30 = vpop.f32.mrf.mxu0 }
 0x8d5   : > { %3196 = vst.msk [vmem:[#allocation2 + $0x28] sm:$0xff] %vm813_vm3, %v3180_v30 }
 0x8dc   : > { %v3183_v4 = vpop.f32.mrf.mxu0 }
 0x8dd   : > { %3197 = vst.msk [vmem:[#allocation2 + $0x30] sm:$0xff] %vm813_vm3, %v3183_v4 }
 0x8e2   : > { %v3284_v61 = vpop.f32.mrf.mxu2 }
 0x8e3   : > { %3297 = vst.msk [vmem:[#allocation2 + $0x70] sm:$0xff] %vm813_vm3, %v3284_v61 }
 0x8e4   : > { %v3186_v3 = vpop.f32.mrf.mxu0 }
 0x8e5   : > { %3198 = vst.msk [vmem:[#allocation2 + $0x38] sm:$0xff] %vm813_vm3, %v3186_v3 }
 0x8f2   : > { %v3287_v38 = vpop.f32.mrf.mxu2 }
 0x8f3   : > { %3298 = vst.msk [vmem:[#allocation2 + $0x78] sm:$0xff] %vm813_vm3, %v3287_v38 }
 0x8f4   : > { %3587 = dma.done.wait (%p5449_p4), [#allocation11], 64  }
 0x8f5   : > { %3589 = vsyncadd (%p5449_p4), [#allocation11], 4294967232 }
 0x8f6 PF: > { %s35_s5 = sadd.s32 1, %s3592_s5  }
 0x8f7   : > { %p32_p5 = scmp.ge.s32.totalorder %s35_s5, 4  }
 0x8f9   :  { %34 = sbr.rel (!%p32_p5) target bundleno = 11 (0xb), region = 161 }
 0x8fe   :  { %3325 = vsyncpa [#allocation11], 1 }
 0x8ff   :  { %3327 = vsyncpa [#allocation11 + $0x1], 1 }

</bundles_post_ra>
